<compile_context>
chip_gen: v7x
topology: tpu7x:2x2x1
jax: 0.10.0
libtpu: 0.0.40
codegen_flags: <defaults>
</compile_context>

<pallas_src>
import functools

import jax
import jax.numpy as jnp
from jax.experimental import pallas as pl
from jax.experimental.pallas import tpu as pltpu

NEG_SLOPE = 0.1
LANE = 128


def _leaky_relu(x):
    return jnp.where(x >= 0, x, NEG_SLOPE * x)


def _round_up(x, m):
    return (x + m - 1) // m * m


def double_conv_kernel(x_ref, w1_ref, w2_ref, o_ref, mid_ref, *, H, W, tH):
    """One batch element per grid step.

    x_ref  : (1, H+2, W+2, Cin_p)   spatially pre-padded, channel-padded input
    w1_ref : (9, Cin_p, Cout_p)     conv1 weights, one (Cin_p, Cout_p) tile/tap
    w2_ref : (9, Cout_p, Cout_p)    conv2 weights
    o_ref  : (1, H, W, Cout_p)      output tile (channel padding sliced off
                                    in the wrapper)
    mid_ref: (H+2, W+2, Cout_p)     scratch: padded conv1 activation
    """
    cin_p = x_ref.shape[-1]
    cout_p = o_ref.shape[-1]
    n_tiles = H // tH

    # Zero only the 1-pixel border of the staging buffer (cheap; the interior
    # is fully overwritten every step).  Done every step so "parallel" batch
    # sharding across TensorCores stays correct (scratch is per-core).
    zrow = jnp.zeros((1, W + 2, cout_p), jnp.float32)
    mid_ref[0:1, :, :] = zrow
    mid_ref[H + 1:H + 2, :, :] = zrow
    zcol = jnp.zeros((H, 1, cout_p), jnp.float32)
    mid_ref[1:H + 1, 0:1, :] = zcol
    mid_ref[1:H + 1, W + 1:W + 2, :] = zcol

    # ---- conv1 (3x3, pad=1, no bias) + LeakyReLU, row-tiled ----------------
    for t in range(n_tiles):
        r0 = t * tH
        acc = jnp.zeros((tH * W, cout_p), jnp.float32)
        for dy in range(3):
            for dx in range(3):
                patch = x_ref[0, r0 + dy:r0 + dy + tH, dx:dx + W, :]
                acc += jnp.dot(patch.reshape(tH * W, cin_p),
                               w1_ref[dy * 3 + dx],
                               preferred_element_type=jnp.float32)
        acc = _leaky_relu(acc)
        mid_ref[1 + r0:1 + r0 + tH, 1:W + 1, :] = acc.reshape(tH, W, cout_p)

    # ---- conv2 (3x3, pad=1, no bias) + LeakyReLU, row-tiled ----------------
    for t in range(n_tiles):
        r0 = t * tH
        acc = jnp.zeros((tH * W, cout_p), jnp.float32)
        for dy in range(3):
            for dx in range(3):
                patch = mid_ref[r0 + dy:r0 + dy + tH, dx:dx + W, :]
                acc += jnp.dot(patch.reshape(tH * W, cout_p),
                               w2_ref[dy * 3 + dx],
                               preferred_element_type=jnp.float32)
        acc = _leaky_relu(acc)
        o_ref[0, r0:r0 + tH, :, :] = (
            acc.reshape(tH, W, cout_p).astype(o_ref.dtype))


def double_conv(x_nchw, w1_oihw, w2_oihw):
    """x_nchw: (N, Cin, H, W); w1: (Cout, Cin, 3, 3); w2: (Cout, Cout, 3, 3).

    Returns (N, Cout, H, W), matching PyTorch DoubleConv.forward (stride=1).
    """
    N, Cin, H, W = x_nchw.shape
    Cout = w1_oihw.shape[0]
    Cin_p = _round_up(Cin, LANE)
    Cout_p = _round_up(Cout, LANE)

    # glue: NCHW -> NHWC, spatial pad (+1 halo), channel pad to lane multiple
    x_nhwc = jnp.transpose(x_nchw, (0, 2, 3, 1))
    x_pad = jnp.pad(x_nhwc, ((0, 0), (1, 1), (1, 1), (0, Cin_p - Cin)))

    def prep_w(w_oihw, ci_p, co_p):
        w = jnp.transpose(w_oihw, (2, 3, 1, 0))              # OIHW -> HWIO
        w = jnp.pad(w, ((0, 0), (0, 0),
                        (0, ci_p - w.shape[2]), (0, co_p - w.shape[3])))
        return w.reshape(9, ci_p, co_p)                      # one tile per tap

    w1_r = prep_w(w1_oihw, Cin_p, Cout_p)
    w2_r = prep_w(w2_oihw, Cout_p, Cout_p)

    # row tile height: keeps the live f32 accumulator small
    tH = 8 if H % 8 == 0 else H

    kernel = functools.partial(double_conv_kernel, H=H, W=W, tH=tH)

    itemsize = jnp.dtype(x_nchw.dtype).itemsize
    flops = 2 * N * H * W * 9 * (Cin_p * Cout_p + Cout_p * Cout_p)
    bytes_accessed = itemsize * (
        N * (H + 2) * (W + 2) * Cin_p
        + 9 * Cin_p * Cout_p + 9 * Cout_p * Cout_p
        + N * H * W * Cout_p)

    out_nhwc = pl.pallas_call(
        kernel,
        out_shape=jax.ShapeDtypeStruct((N, H, W, Cout_p), x_nchw.dtype),
        grid_spec=pltpu.PrefetchScalarGridSpec(
            num_scalar_prefetch=0,
            grid=(N,),
            in_specs=[
                pl.BlockSpec((1, H + 2, W + 2, Cin_p),
                             lambda n: (n, 0, 0, 0)),
                pl.BlockSpec((9, Cin_p, Cout_p), lambda n: (0, 0, 0)),
                pl.BlockSpec((9, Cout_p, Cout_p), lambda n: (0, 0, 0)),
            ],
            out_specs=pl.BlockSpec((1, H, W, Cout_p),
                                   lambda n: (n, 0, 0, 0)),
            scratch_shapes=[pltpu.VMEM((H + 2, W + 2, Cout_p), jnp.float32)],
        ),
        compiler_params=pltpu.CompilerParams(
            dimension_semantics=("parallel",)),
        cost_estimate=pl.CostEstimate(
            flops=flops, transcendentals=0, bytes_accessed=bytes_accessed),
    )(x_pad, w1_r, w2_r)

    # strip channel padding (lane-dense inside the kernel), back to NCHW
    return jnp.transpose(out_nhwc[..., :Cout], (0, 3, 1, 2))


def _reference(x, w1, w2):
    """Pure-JAX reference matching the PyTorch module semantics."""
    def conv(y, w):
        return jax.lax.conv_general_dilated(
            y, w, window_strides=(1, 1), padding=((1, 1), (1, 1)),
            dimension_numbers=("NCHW", "OIHW", "NCHW"))
    y = conv(x, w1)
    y = jnp.where(y >= 0, y, NEG_SLOPE * y)
    y = conv(y, w2)
    y = jnp.where(y >= 0, y, NEG_SLOPE * y)
    return y


if __name__ == "__main__":
    # Small shapes consistent with the module's forward: NCHW input.
    N, Cin, Cout, H, W = 2, 4, 8, 16, 16

    key = jax.random.PRNGKey(0)
    kx, k1, k2 = jax.random.split(key, 3)

    # Deterministic synthetic parameters (kaiming-uniform-like bounds, as in
    # nn.Conv2d default init).
    bound1 = 1.0 / (Cin * 9) ** 0.5
    bound2 = 1.0 / (Cout * 9) ** 0.5
    w1 = jax.random.uniform(k1, (Cout, Cin, 3, 3), jnp.float32,
                            minval=-bound1, maxval=bound1)
    w2 = jax.random.uniform(k2, (Cout, Cout, 3, 3), jnp.float32,
                            minval=-bound2, maxval=bound2)
    x = jax.random.normal(kx, (N, Cin, H, W), jnp.float32)

    out = double_conv(x, w1, w2)
    out = jax.block_until_ready(out)

    ref = _reference(x, w1, w2)
    assert out.shape == (N, Cout, H, W), out.shape
    assert jnp.allclose(out, ref, atol=1e-5, rtol=1e-5), (
        float(jnp.max(jnp.abs(out - ref))))

    print("KERNEL_OK")
</pallas_src>

<mosaic_0001>
module attributes {stable_mosaic.version = 11 : i64} {
  func.func @double_conv_kernel(%arg0: i32, %arg1: memref<1x18x18x128xf32, #tpu.memory_space<vmem>>, %arg2: memref<9x128x128xf32, #tpu.memory_space<vmem>>, %arg3: memref<9x128x128xf32, #tpu.memory_space<vmem>>, %arg4: memref<1x16x16x128xf32, #tpu.memory_space<vmem>>, %arg5: memref<18x18x128xf32, #tpu.memory_space<vmem>>) attributes {dimension_semantics = [#tpu.dimension_semantics<parallel>], iteration_bounds = array<i64: 2>, scalar_prefetch = 0 : i64, scratch_operands = 1 : i64, tpu.core_type = #tpu.core_type<tc>, window_params = [{transform_indices = @transform_0, window_bounds = array<i64: 1, 18, 18, 128>}, {pipeline_mode = #tpu.pipeline_mode<synchronous>, transform_indices = @transform_1, window_bounds = array<i64: 9, 128, 128>}, {pipeline_mode = #tpu.pipeline_mode<synchronous>, transform_indices = @transform_2, window_bounds = array<i64: 9, 128, 128>}, {transform_indices = @transform_3, window_bounds = array<i64: 1, 16, 16, 128>}]} {
    %cst = arith.constant 0.000000e+00 : f32
    %0 = vector.broadcast %cst : f32 to vector<1x18x128xf32>
    %c0 = arith.constant 0 : index
    %c0_0 = arith.constant 0 : index
    %c0_1 = arith.constant 0 : index
    %1 = vector.load %arg5[%c0, %c0_0, %c0_1] : memref<18x18x128xf32, #tpu.memory_space<vmem>>, vector<1x18x128xf32>
    tpu.vector_store %arg5[%c0, %c0_0, %c0_1], %0 {strides = array<i32>} : memref<18x18x128xf32, #tpu.memory_space<vmem>>, vector<1x18x128xf32>,
    %c17 = arith.constant 17 : index
    %c0_2 = arith.constant 0 : index
    %c0_3 = arith.constant 0 : index
    %2 = vector.load %arg5[%c17, %c0_2, %c0_3] : memref<18x18x128xf32, #tpu.memory_space<vmem>>, vector<1x18x128xf32>
    tpu.vector_store %arg5[%c17, %c0_2, %c0_3], %0 {strides = array<i32>} : memref<18x18x128xf32, #tpu.memory_space<vmem>>, vector<1x18x128xf32>,
    %cst_4 = arith.constant 0.000000e+00 : f32
    %3 = vector.broadcast %cst_4 : f32 to vector<16x1x128xf32>
    %c1 = arith.constant 1 : index
    %c0_5 = arith.constant 0 : index
    %c0_6 = arith.constant 0 : index
    %4 = vector.load %arg5[%c1, %c0_5, %c0_6] : memref<18x18x128xf32, #tpu.memory_space<vmem>>, vector<16x1x128xf32>
    tpu.vector_store %arg5[%c1, %c0_5, %c0_6], %3 {strides = array<i32>} : memref<18x18x128xf32, #tpu.memory_space<vmem>>, vector<16x1x128xf32>,
    %c1_7 = arith.constant 1 : index
    %c17_8 = arith.constant 17 : index
    %c0_9 = arith.constant 0 : index
    %5 = vector.load %arg5[%c1_7, %c17_8, %c0_9] : memref<18x18x128xf32, #tpu.memory_space<vmem>>, vector<16x1x128xf32>
    tpu.vector_store %arg5[%c1_7, %c17_8, %c0_9], %3 {strides = array<i32>} : memref<18x18x128xf32, #tpu.memory_space<vmem>>, vector<16x1x128xf32>,
    %cst_10 = arith.constant 0.000000e+00 : f32
    %6 = vector.broadcast %cst_10 : f32 to vector<128x128xf32>
    %c0_11 = arith.constant 0 : index
    %c0_12 = arith.constant 0 : index
    %c0_13 = arith.constant 0 : index
    %c0_14 = arith.constant 0 : index
    %7 = vector.load %arg1[%c0_11, %c0_12, %c0_13, %c0_14] : memref<1x18x18x128xf32, #tpu.memory_space<vmem>>, vector<1x8x16x128xf32>
    %8 = vector.shape_cast %7 : vector<1x8x16x128xf32> to vector<8x16x128xf32>
    %9 = vector.shape_cast %8 : vector<8x16x128xf32> to vector<128x128xf32>
    %c0_15 = arith.constant 0 : index
    %c0_16 = arith.constant 0 : index
    %c0_17 = arith.constant 0 : index
    %10 = vector.load %arg2[%c0_15, %c0_16, %c0_17] : memref<9x128x128xf32, #tpu.memory_space<vmem>>, vector<1x128x128xf32>
    %11 = vector.shape_cast %10 : vector<1x128x128xf32> to vector<128x128xf32>
    %cst_18 = arith.constant dense<0.000000e+00> : vector<128x128xf32>
    %12 = tpu.matmul %9, %11, %cst_18 {dimension_numbers = #tpu.dot_dimension_numbers<[1], [0], [0], [1], [0, 0, 1, 1], [], []>} : vector<128x128xf32>, vector<128x128xf32>, vector<128x128xf32> -> vector<128x128xf32>
    %13 = arith.addf %6, %12 : vector<128x128xf32>
    %c0_19 = arith.constant 0 : index
    %c0_20 = arith.constant 0 : index
    %c1_21 = arith.constant 1 : index
    %c0_22 = arith.constant 0 : index
    %14 = vector.load %arg1[%c0_19, %c0_20, %c1_21, %c0_22] : memref<1x18x18x128xf32, #tpu.memory_space<vmem>>, vector<1x8x16x128xf32>
    %15 = vector.shape_cast %14 : vector<1x8x16x128xf32> to vector<8x16x128xf32>
    %16 = vector.shape_cast %15 : vector<8x16x128xf32> to vector<128x128xf32>
    %c1_23 = arith.constant 1 : index
    %c0_24 = arith.constant 0 : index
    %c0_25 = arith.constant 0 : index
    %17 = vector.load %arg2[%c1_23, %c0_24, %c0_25] : memref<9x128x128xf32, #tpu.memory_space<vmem>>, vector<1x128x128xf32>
    %18 = vector.shape_cast %17 : vector<1x128x128xf32> to vector<128x128xf32>
    %cst_26 = arith.constant dense<0.000000e+00> : vector<128x128xf32>
    %19 = tpu.matmul %16, %18, %cst_26 {dimension_numbers = #tpu.dot_dimension_numbers<[1], [0], [0], [1], [0, 0, 1, 1], [], []>} : vector<128x128xf32>, vector<128x128xf32>, vector<128x128xf32> -> vector<128x128xf32>
    %20 = arith.addf %13, %19 : vector<128x128xf32>
    %c0_27 = arith.constant 0 : index
    %c0_28 = arith.constant 0 : index
    %c2 = arith.constant 2 : index
    %c0_29 = arith.constant 0 : index
    %21 = vector.load %arg1[%c0_27, %c0_28, %c2, %c0_29] : memref<1x18x18x128xf32, #tpu.memory_space<vmem>>, vector<1x8x16x128xf32>
    %22 = vector.shape_cast %21 : vector<1x8x16x128xf32> to vector<8x16x128xf32>
    %23 = vector.shape_cast %22 : vector<8x16x128xf32> to vector<128x128xf32>
    %c2_30 = arith.constant 2 : index
    %c0_31 = arith.constant 0 : index
    %c0_32 = arith.constant 0 : index
    %24 = vector.load %arg2[%c2_30, %c0_31, %c0_32] : memref<9x128x128xf32, #tpu.memory_space<vmem>>, vector<1x128x128xf32>
    %25 = vector.shape_cast %24 : vector<1x128x128xf32> to vector<128x128xf32>
    %cst_33 = arith.constant dense<0.000000e+00> : vector<128x128xf32>
    %26 = tpu.matmul %23, %25, %cst_33 {dimension_numbers = #tpu.dot_dimension_numbers<[1], [0], [0], [1], [0, 0, 1, 1], [], []>} : vector<128x128xf32>, vector<128x128xf32>, vector<128x128xf32> -> vector<128x128xf32>
    %27 = arith.addf %20, %26 : vector<128x128xf32>
    %c0_34 = arith.constant 0 : index
    %c1_35 = arith.constant 1 : index
    %c0_36 = arith.constant 0 : index
    %c0_37 = arith.constant 0 : index
    %28 = vector.load %arg1[%c0_34, %c1_35, %c0_36, %c0_37] : memref<1x18x18x128xf32, #tpu.memory_space<vmem>>, vector<1x8x16x128xf32>
    %29 = vector.shape_cast %28 : vector<1x8x16x128xf32> to vector<8x16x128xf32>
    %30 = vector.shape_cast %29 : vector<8x16x128xf32> to vector<128x128xf32>
    %c3 = arith.constant 3 : index
    %c0_38 = arith.constant 0 : index
    %c0_39 = arith.constant 0 : index
    %31 = vector.load %arg2[%c3, %c0_38, %c0_39] : memref<9x128x128xf32, #tpu.memory_space<vmem>>, vector<1x128x128xf32>
    %32 = vector.shape_cast %31 : vector<1x128x128xf32> to vector<128x128xf32>
    %cst_40 = arith.constant dense<0.000000e+00> : vector<128x128xf32>
    %33 = tpu.matmul %30, %32, %cst_40 {dimension_numbers = #tpu.dot_dimension_numbers<[1], [0], [0], [1], [0, 0, 1, 1], [], []>} : vector<128x128xf32>, vector<128x128xf32>, vector<128x128xf32> -> vector<128x128xf32>
    %34 = arith.addf %27, %33 : vector<128x128xf32>
    %c0_41 = arith.constant 0 : index
    %c1_42 = arith.constant 1 : index
    %c1_43 = arith.constant 1 : index
    %c0_44 = arith.constant 0 : index
    %35 = vector.load %arg1[%c0_41, %c1_42, %c1_43, %c0_44] : memref<1x18x18x128xf32, #tpu.memory_space<vmem>>, vector<1x8x16x128xf32>
    %36 = vector.shape_cast %35 : vector<1x8x16x128xf32> to vector<8x16x128xf32>
    %37 = vector.shape_cast %36 : vector<8x16x128xf32> to vector<128x128xf32>
    %c4 = arith.constant 4 : index
    %c0_45 = arith.constant 0 : index
    %c0_46 = arith.constant 0 : index
    %38 = vector.load %arg2[%c4, %c0_45, %c0_46] : memref<9x128x128xf32, #tpu.memory_space<vmem>>, vector<1x128x128xf32>
    %39 = vector.shape_cast %38 : vector<1x128x128xf32> to vector<128x128xf32>
    %cst_47 = arith.constant dense<0.000000e+00> : vector<128x128xf32>
    %40 = tpu.matmul %37, %39, %cst_47 {dimension_numbers = #tpu.dot_dimension_numbers<[1], [0], [0], [1], [0, 0, 1, 1], [], []>} : vector<128x128xf32>, vector<128x128xf32>, vector<128x128xf32> -> vector<128x128xf32>
    %41 = arith.addf %34, %40 : vector<128x128xf32>
    %c0_48 = arith.constant 0 : index
    %c1_49 = arith.constant 1 : index
    %c2_50 = arith.constant 2 : index
    %c0_51 = arith.constant 0 : index
    %42 = vector.load %arg1[%c0_48, %c1_49, %c2_50, %c0_51] : memref<1x18x18x128xf32, #tpu.memory_space<vmem>>, vector<1x8x16x128xf32>
    %43 = vector.shape_cast %42 : vector<1x8x16x128xf32> to vector<8x16x128xf32>
    %44 = vector.shape_cast %43 : vector<8x16x128xf32> to vector<128x128xf32>
    %c5 = arith.constant 5 : index
    %c0_52 = arith.constant 0 : index
    %c0_53 = arith.constant 0 : index
    %45 = vector.load %arg2[%c5, %c0_52, %c0_53] : memref<9x128x128xf32, #tpu.memory_space<vmem>>, vector<1x128x128xf32>
    %46 = vector.shape_cast %45 : vector<1x128x128xf32> to vector<128x128xf32>
    %cst_54 = arith.constant dense<0.000000e+00> : vector<128x128xf32>
    %47 = tpu.matmul %44, %46, %cst_54 {dimension_numbers = #tpu.dot_dimension_numbers<[1], [0], [0], [1], [0, 0, 1, 1], [], []>} : vector<128x128xf32>, vector<128x128xf32>, vector<128x128xf32> -> vector<128x128xf32>
    %48 = arith.addf %41, %47 : vector<128x128xf32>
    %c0_55 = arith.constant 0 : index
    %c2_56 = arith.constant 2 : index
    %c0_57 = arith.constant 0 : index
    %c0_58 = arith.constant 0 : index
    %49 = vector.load %arg1[%c0_55, %c2_56, %c0_57, %c0_58] : memref<1x18x18x128xf32, #tpu.memory_space<vmem>>, vector<1x8x16x128xf32>
    %50 = vector.shape_cast %49 : vector<1x8x16x128xf32> to vector<8x16x128xf32>
    %51 = vector.shape_cast %50 : vector<8x16x128xf32> to vector<128x128xf32>
    %c6 = arith.constant 6 : index
    %c0_59 = arith.constant 0 : index
    %c0_60 = arith.constant 0 : index
    %52 = vector.load %arg2[%c6, %c0_59, %c0_60] : memref<9x128x128xf32, #tpu.memory_space<vmem>>, vector<1x128x128xf32>
    %53 = vector.shape_cast %52 : vector<1x128x128xf32> to vector<128x128xf32>
    %cst_61 = arith.constant dense<0.000000e+00> : vector<128x128xf32>
    %54 = tpu.matmul %51, %53, %cst_61 {dimension_numbers = #tpu.dot_dimension_numbers<[1], [0], [0], [1], [0, 0, 1, 1], [], []>} : vector<128x128xf32>, vector<128x128xf32>, vector<128x128xf32> -> vector<128x128xf32>
    %55 = arith.addf %48, %54 : vector<128x128xf32>
    %c0_62 = arith.constant 0 : index
    %c2_63 = arith.constant 2 : index
    %c1_64 = arith.constant 1 : index
    %c0_65 = arith.constant 0 : index
    %56 = vector.load %arg1[%c0_62, %c2_63, %c1_64, %c0_65] : memref<1x18x18x128xf32, #tpu.memory_space<vmem>>, vector<1x8x16x128xf32>
    %57 = vector.shape_cast %56 : vector<1x8x16x128xf32> to vector<8x16x128xf32>
    %58 = vector.shape_cast %57 : vector<8x16x128xf32> to vector<128x128xf32>
    %c7 = arith.constant 7 : index
    %c0_66 = arith.constant 0 : index
    %c0_67 = arith.constant 0 : index
    %59 = vector.load %arg2[%c7, %c0_66, %c0_67] : memref<9x128x128xf32, #tpu.memory_space<vmem>>, vector<1x128x128xf32>
    %60 = vector.shape_cast %59 : vector<1x128x128xf32> to vector<128x128xf32>
    %cst_68 = arith.constant dense<0.000000e+00> : vector<128x128xf32>
    %61 = tpu.matmul %58, %60, %cst_68 {dimension_numbers = #tpu.dot_dimension_numbers<[1], [0], [0], [1], [0, 0, 1, 1], [], []>} : vector<128x128xf32>, vector<128x128xf32>, vector<128x128xf32> -> vector<128x128xf32>
    %62 = arith.addf %55, %61 : vector<128x128xf32>
    %c0_69 = arith.constant 0 : index
    %c2_70 = arith.constant 2 : index
    %c2_71 = arith.constant 2 : index
    %c0_72 = arith.constant 0 : index
    %63 = vector.load %arg1[%c0_69, %c2_70, %c2_71, %c0_72] : memref<1x18x18x128xf32, #tpu.memory_space<vmem>>, vector<1x8x16x128xf32>
    %64 = vector.shape_cast %63 : vector<1x8x16x128xf32> to vector<8x16x128xf32>
    %65 = vector.shape_cast %64 : vector<8x16x128xf32> to vector<128x128xf32>
    %c8 = arith.constant 8 : index
    %c0_73 = arith.constant 0 : index
    %c0_74 = arith.constant 0 : index
    %66 = vector.load %arg2[%c8, %c0_73, %c0_74] : memref<9x128x128xf32, #tpu.memory_space<vmem>>, vector<1x128x128xf32>
    %67 = vector.shape_cast %66 : vector<1x128x128xf32> to vector<128x128xf32>
    %cst_75 = arith.constant dense<0.000000e+00> : vector<128x128xf32>
    %68 = tpu.matmul %65, %67, %cst_75 {dimension_numbers = #tpu.dot_dimension_numbers<[1], [0], [0], [1], [0, 0, 1, 1], [], []>} : vector<128x128xf32>, vector<128x128xf32>, vector<128x128xf32> -> vector<128x128xf32>
    %69 = arith.addf %62, %68 : vector<128x128xf32>
    %cst_76 = arith.constant 0.000000e+00 : f32
    %70 = vector.broadcast %cst_76 : f32 to vector<128x128xf32>
    %71 = arith.cmpf oge, %69, %70 : vector<128x128xf32>
    %cst_77 = arith.constant 1.000000e-01 : f32
    %72 = vector.broadcast %cst_77 : f32 to vector<128x128xf32>
    %73 = arith.mulf %72, %69 : vector<128x128xf32>
    %74 = arith.select %71, %69, %73 : vector<128x128xi1>, vector<128x128xf32>
    %75 = vector.shape_cast %74 : vector<128x128xf32> to vector<8x16x128xf32>
    %c1_78 = arith.constant 1 : index
    %c1_79 = arith.constant 1 : index
    %c0_80 = arith.constant 0 : index
    %76 = vector.load %arg5[%c1_78, %c1_79, %c0_80] : memref<18x18x128xf32, #tpu.memory_space<vmem>>, vector<8x16x128xf32>
    tpu.vector_store %arg5[%c1_78, %c1_79, %c0_80], %75 {strides = array<i32>} : memref<18x18x128xf32, #tpu.memory_space<vmem>>, vector<8x16x128xf32>,
    %cst_81 = arith.constant 0.000000e+00 : f32
    %77 = vector.broadcast %cst_81 : f32 to vector<128x128xf32>
    %c0_82 = arith.constant 0 : index
    %c8_83 = arith.constant 8 : index
    %c0_84 = arith.constant 0 : index
    %c0_85 = arith.constant 0 : index
    %78 = vector.load %arg1[%c0_82, %c8_83, %c0_84, %c0_85] : memref<1x18x18x128xf32, #tpu.memory_space<vmem>>, vector<1x8x16x128xf32>
    %79 = vector.shape_cast %78 : vector<1x8x16x128xf32> to vector<8x16x128xf32>
    %80 = vector.shape_cast %79 : vector<8x16x128xf32> to vector<128x128xf32>
    %c0_86 = arith.constant 0 : index
    %c0_87 = arith.constant 0 : index
    %c0_88 = arith.constant 0 : index
    %81 = vector.load %arg2[%c0_86, %c0_87, %c0_88] : memref<9x128x128xf32, #tpu.memory_space<vmem>>, vector<1x128x128xf32>
    %82 = vector.shape_cast %81 : vector<1x128x128xf32> to vector<128x128xf32>
    %cst_89 = arith.constant dense<0.000000e+00> : vector<128x128xf32>
    %83 = tpu.matmul %80, %82, %cst_89 {dimension_numbers = #tpu.dot_dimension_numbers<[1], [0], [0], [1], [0, 0, 1, 1], [], []>} : vector<128x128xf32>, vector<128x128xf32>, vector<128x128xf32> -> vector<128x128xf32>
    %84 = arith.addf %77, %83 : vector<128x128xf32>
    %c0_90 = arith.constant 0 : index
    %c8_91 = arith.constant 8 : index
    %c1_92 = arith.constant 1 : index
    %c0_93 = arith.constant 0 : index
    %85 = vector.load %arg1[%c0_90, %c8_91, %c1_92, %c0_93] : memref<1x18x18x128xf32, #tpu.memory_space<vmem>>, vector<1x8x16x128xf32>
    %86 = vector.shape_cast %85 : vector<1x8x16x128xf32> to vector<8x16x128xf32>
    %87 = vector.shape_cast %86 : vector<8x16x128xf32> to vector<128x128xf32>
    %c1_94 = arith.constant 1 : index
    %c0_95 = arith.constant 0 : index
    %c0_96 = arith.constant 0 : index
    %88 = vector.load %arg2[%c1_94, %c0_95, %c0_96] : memref<9x128x128xf32, #tpu.memory_space<vmem>>, vector<1x128x128xf32>
    %89 = vector.shape_cast %88 : vector<1x128x128xf32> to vector<128x128xf32>
    %cst_97 = arith.constant dense<0.000000e+00> : vector<128x128xf32>
    %90 = tpu.matmul %87, %89, %cst_97 {dimension_numbers = #tpu.dot_dimension_numbers<[1], [0], [0], [1], [0, 0, 1, 1], [], []>} : vector<128x128xf32>, vector<128x128xf32>, vector<128x128xf32> -> vector<128x128xf32>
    %91 = arith.addf %84, %90 : vector<128x128xf32>
    %c0_98 = arith.constant 0 : index
    %c8_99 = arith.constant 8 : index
    %c2_100 = arith.constant 2 : index
    %c0_101 = arith.constant 0 : index
    %92 = vector.load %arg1[%c0_98, %c8_99, %c2_100, %c0_101] : memref<1x18x18x128xf32, #tpu.memory_space<vmem>>, vector<1x8x16x128xf32>
    %93 = vector.shape_cast %92 : vector<1x8x16x128xf32> to vector<8x16x128xf32>
    %94 = vector.shape_cast %93 : vector<8x16x128xf32> to vector<128x128xf32>
    %c2_102 = arith.constant 2 : index
    %c0_103 = arith.constant 0 : index
    %c0_104 = arith.constant 0 : index
    %95 = vector.load %arg2[%c2_102, %c0_103, %c0_104] : memref<9x128x128xf32, #tpu.memory_space<vmem>>, vector<1x128x128xf32>
    %96 = vector.shape_cast %95 : vector<1x128x128xf32> to vector<128x128xf32>
    %cst_105 = arith.constant dense<0.000000e+00> : vector<128x128xf32>
    %97 = tpu.matmul %94, %96, %cst_105 {dimension_numbers = #tpu.dot_dimension_numbers<[1], [0], [0], [1], [0, 0, 1, 1], [], []>} : vector<128x128xf32>, vector<128x128xf32>, vector<128x128xf32> -> vector<128x128xf32>
    %98 = arith.addf %91, %97 : vector<128x128xf32>
    %c0_106 = arith.constant 0 : index
    %c9 = arith.constant 9 : index
    %c0_107 = arith.constant 0 : index
    %c0_108 = arith.constant 0 : index
    %99 = vector.load %arg1[%c0_106, %c9, %c0_107, %c0_108] : memref<1x18x18x128xf32, #tpu.memory_space<vmem>>, vector<1x8x16x128xf32>
    %100 = vector.shape_cast %99 : vector<1x8x16x128xf32> to vector<8x16x128xf32>
    %101 = vector.shape_cast %100 : vector<8x16x128xf32> to vector<128x128xf32>
    %c3_109 = arith.constant 3 : index
    %c0_110 = arith.constant 0 : index
    %c0_111 = arith.constant 0 : index
    %102 = vector.load %arg2[%c3_109, %c0_110, %c0_111] : memref<9x128x128xf32, #tpu.memory_space<vmem>>, vector<1x128x128xf32>
    %103 = vector.shape_cast %102 : vector<1x128x128xf32> to vector<128x128xf32>
    %cst_112 = arith.constant dense<0.000000e+00> : vector<128x128xf32>
    %104 = tpu.matmul %101, %103, %cst_112 {dimension_numbers = #tpu.dot_dimension_numbers<[1], [0], [0], [1], [0, 0, 1, 1], [], []>} : vector<128x128xf32>, vector<128x128xf32>, vector<128x128xf32> -> vector<128x128xf32>
    %105 = arith.addf %98, %104 : vector<128x128xf32>
    %c0_113 = arith.constant 0 : index
    %c9_114 = arith.constant 9 : index
    %c1_115 = arith.constant 1 : index
    %c0_116 = arith.constant 0 : index
    %106 = vector.load %arg1[%c0_113, %c9_114, %c1_115, %c0_116] : memref<1x18x18x128xf32, #tpu.memory_space<vmem>>, vector<1x8x16x128xf32>
    %107 = vector.shape_cast %106 : vector<1x8x16x128xf32> to vector<8x16x128xf32>
    %108 = vector.shape_cast %107 : vector<8x16x128xf32> to vector<128x128xf32>
    %c4_117 = arith.constant 4 : index
    %c0_118 = arith.constant 0 : index
    %c0_119 = arith.constant 0 : index
    %109 = vector.load %arg2[%c4_117, %c0_118, %c0_119] : memref<9x128x128xf32, #tpu.memory_space<vmem>>, vector<1x128x128xf32>
    %110 = vector.shape_cast %109 : vector<1x128x128xf32> to vector<128x128xf32>
    %cst_120 = arith.constant dense<0.000000e+00> : vector<128x128xf32>
    %111 = tpu.matmul %108, %110, %cst_120 {dimension_numbers = #tpu.dot_dimension_numbers<[1], [0], [0], [1], [0, 0, 1, 1], [], []>} : vector<128x128xf32>, vector<128x128xf32>, vector<128x128xf32> -> vector<128x128xf32>
    %112 = arith.addf %105, %111 : vector<128x128xf32>
    %c0_121 = arith.constant 0 : index
    %c9_122 = arith.constant 9 : index
    %c2_123 = arith.constant 2 : index
    %c0_124 = arith.constant 0 : index
    %113 = vector.load %arg1[%c0_121, %c9_122, %c2_123, %c0_124] : memref<1x18x18x128xf32, #tpu.memory_space<vmem>>, vector<1x8x16x128xf32>
    %114 = vector.shape_cast %113 : vector<1x8x16x128xf32> to vector<8x16x128xf32>
    %115 = vector.shape_cast %114 : vector<8x16x128xf32> to vector<128x128xf32>
    %c5_125 = arith.constant 5 : index
    %c0_126 = arith.constant 0 : index
    %c0_127 = arith.constant 0 : index
    %116 = vector.load %arg2[%c5_125, %c0_126, %c0_127] : memref<9x128x128xf32, #tpu.memory_space<vmem>>, vector<1x128x128xf32>
    %117 = vector.shape_cast %116 : vector<1x128x128xf32> to vector<128x128xf32>
    %cst_128 = arith.constant dense<0.000000e+00> : vector<128x128xf32>
    %118 = tpu.matmul %115, %117, %cst_128 {dimension_numbers = #tpu.dot_dimension_numbers<[1], [0], [0], [1], [0, 0, 1, 1], [], []>} : vector<128x128xf32>, vector<128x128xf32>, vector<128x128xf32> -> vector<128x128xf32>
    %119 = arith.addf %112, %118 : vector<128x128xf32>
    %c0_129 = arith.constant 0 : index
    %c10 = arith.constant 10 : index
    %c0_130 = arith.constant 0 : index
    %c0_131 = arith.constant 0 : index
    %120 = vector.load %arg1[%c0_129, %c10, %c0_130, %c0_131] : memref<1x18x18x128xf32, #tpu.memory_space<vmem>>, vector<1x8x16x128xf32>
    %121 = vector.shape_cast %120 : vector<1x8x16x128xf32> to vector<8x16x128xf32>
    %122 = vector.shape_cast %121 : vector<8x16x128xf32> to vector<128x128xf32>
    %c6_132 = arith.constant 6 : index
    %c0_133 = arith.constant 0 : index
    %c0_134 = arith.constant 0 : index
    %123 = vector.load %arg2[%c6_132, %c0_133, %c0_134] : memref<9x128x128xf32, #tpu.memory_space<vmem>>, vector<1x128x128xf32>
    %124 = vector.shape_cast %123 : vector<1x128x128xf32> to vector<128x128xf32>
    %cst_135 = arith.constant dense<0.000000e+00> : vector<128x128xf32>
    %125 = tpu.matmul %122, %124, %cst_135 {dimension_numbers = #tpu.dot_dimension_numbers<[1], [0], [0], [1], [0, 0, 1, 1], [], []>} : vector<128x128xf32>, vector<128x128xf32>, vector<128x128xf32> -> vector<128x128xf32>
    %126 = arith.addf %119, %125 : vector<128x128xf32>
    %c0_136 = arith.constant 0 : index
    %c10_137 = arith.constant 10 : index
    %c1_138 = arith.constant 1 : index
    %c0_139 = arith.constant 0 : index
    %127 = vector.load %arg1[%c0_136, %c10_137, %c1_138, %c0_139] : memref<1x18x18x128xf32, #tpu.memory_space<vmem>>, vector<1x8x16x128xf32>
    %128 = vector.shape_cast %127 : vector<1x8x16x128xf32> to vector<8x16x128xf32>
    %129 = vector.shape_cast %128 : vector<8x16x128xf32> to vector<128x128xf32>
    %c7_140 = arith.constant 7 : index
    %c0_141 = arith.constant 0 : index
    %c0_142 = arith.constant 0 : index
    %130 = vector.load %arg2[%c7_140, %c0_141, %c0_142] : memref<9x128x128xf32, #tpu.memory_space<vmem>>, vector<1x128x128xf32>
    %131 = vector.shape_cast %130 : vector<1x128x128xf32> to vector<128x128xf32>
    %cst_143 = arith.constant dense<0.000000e+00> : vector<128x128xf32>
    %132 = tpu.matmul %129, %131, %cst_143 {dimension_numbers = #tpu.dot_dimension_numbers<[1], [0], [0], [1], [0, 0, 1, 1], [], []>} : vector<128x128xf32>, vector<128x128xf32>, vector<128x128xf32> -> vector<128x128xf32>
    %133 = arith.addf %126, %132 : vector<128x128xf32>
    %c0_144 = arith.constant 0 : index
    %c10_145 = arith.constant 10 : index
    %c2_146 = arith.constant 2 : index
    %c0_147 = arith.constant 0 : index
    %134 = vector.load %arg1[%c0_144, %c10_145, %c2_146, %c0_147] : memref<1x18x18x128xf32, #tpu.memory_space<vmem>>, vector<1x8x16x128xf32>
    %135 = vector.shape_cast %134 : vector<1x8x16x128xf32> to vector<8x16x128xf32>
    %136 = vector.shape_cast %135 : vector<8x16x128xf32> to vector<128x128xf32>
    %c8_148 = arith.constant 8 : index
    %c0_149 = arith.constant 0 : index
    %c0_150 = arith.constant 0 : index
    %137 = vector.load %arg2[%c8_148, %c0_149, %c0_150] : memref<9x128x128xf32, #tpu.memory_space<vmem>>, vector<1x128x128xf32>
    %138 = vector.shape_cast %137 : vector<1x128x128xf32> to vector<128x128xf32>
    %cst_151 = arith.constant dense<0.000000e+00> : vector<128x128xf32>
    %139 = tpu.matmul %136, %138, %cst_151 {dimension_numbers = #tpu.dot_dimension_numbers<[1], [0], [0], [1], [0, 0, 1, 1], [], []>} : vector<128x128xf32>, vector<128x128xf32>, vector<128x128xf32> -> vector<128x128xf32>
    %140 = arith.addf %133, %139 : vector<128x128xf32>
    %cst_152 = arith.constant 0.000000e+00 : f32
    %141 = vector.broadcast %cst_152 : f32 to vector<128x128xf32>
    %142 = arith.cmpf oge, %140, %141 : vector<128x128xf32>
    %cst_153 = arith.constant 1.000000e-01 : f32
    %143 = vector.broadcast %cst_153 : f32 to vector<128x128xf32>
    %144 = arith.mulf %143, %140 : vector<128x128xf32>
    %145 = arith.select %142, %140, %144 : vector<128x128xi1>, vector<128x128xf32>
    %146 = vector.shape_cast %145 : vector<128x128xf32> to vector<8x16x128xf32>
    %c9_154 = arith.constant 9 : index
    %c1_155 = arith.constant 1 : index
    %c0_156 = arith.constant 0 : index
    %147 = vector.load %arg5[%c9_154, %c1_155, %c0_156] : memref<18x18x128xf32, #tpu.memory_space<vmem>>, vector<8x16x128xf32>
    tpu.vector_store %arg5[%c9_154, %c1_155, %c0_156], %146 {strides = array<i32>} : memref<18x18x128xf32, #tpu.memory_space<vmem>>, vector<8x16x128xf32>,
    %cst_157 = arith.constant 0.000000e+00 : f32
    %148 = vector.broadcast %cst_157 : f32 to vector<128x128xf32>
    %c0_158 = arith.constant 0 : index
    %c0_159 = arith.constant 0 : index
    %c0_160 = arith.constant 0 : index
    %149 = vector.load %arg5[%c0_158, %c0_159, %c0_160] : memref<18x18x128xf32, #tpu.memory_space<vmem>>, vector<8x16x128xf32>
    %150 = vector.shape_cast %149 : vector<8x16x128xf32> to vector<128x128xf32>
    %c0_161 = arith.constant 0 : index
    %c0_162 = arith.constant 0 : index
    %c0_163 = arith.constant 0 : index
    %151 = vector.load %arg3[%c0_161, %c0_162, %c0_163] : memref<9x128x128xf32, #tpu.memory_space<vmem>>, vector<1x128x128xf32>
    %152 = vector.shape_cast %151 : vector<1x128x128xf32> to vector<128x128xf32>
    %cst_164 = arith.constant dense<0.000000e+00> : vector<128x128xf32>
    %153 = tpu.matmul %150, %152, %cst_164 {dimension_numbers = #tpu.dot_dimension_numbers<[1], [0], [0], [1], [0, 0, 1, 1], [], []>} : vector<128x128xf32>, vector<128x128xf32>, vector<128x128xf32> -> vector<128x128xf32>
    %154 = arith.addf %148, %153 : vector<128x128xf32>
    %c0_165 = arith.constant 0 : index
    %c1_166 = arith.constant 1 : index
    %c0_167 = arith.constant 0 : index
    %155 = vector.load %arg5[%c0_165, %c1_166, %c0_167] : memref<18x18x128xf32, #tpu.memory_space<vmem>>, vector<8x16x128xf32>
    %156 = vector.shape_cast %155 : vector<8x16x128xf32> to vector<128x128xf32>
    %c1_168 = arith.constant 1 : index
    %c0_169 = arith.constant 0 : index
    %c0_170 = arith.constant 0 : index
    %157 = vector.load %arg3[%c1_168, %c0_169, %c0_170] : memref<9x128x128xf32, #tpu.memory_space<vmem>>, vector<1x128x128xf32>
    %158 = vector.shape_cast %157 : vector<1x128x128xf32> to vector<128x128xf32>
    %cst_171 = arith.constant dense<0.000000e+00> : vector<128x128xf32>
    %159 = tpu.matmul %156, %158, %cst_171 {dimension_numbers = #tpu.dot_dimension_numbers<[1], [0], [0], [1], [0, 0, 1, 1], [], []>} : vector<128x128xf32>, vector<128x128xf32>, vector<128x128xf32> -> vector<128x128xf32>
    %160 = arith.addf %154, %159 : vector<128x128xf32>
    %c0_172 = arith.constant 0 : index
    %c2_173 = arith.constant 2 : index
    %c0_174 = arith.constant 0 : index
    %161 = vector.load %arg5[%c0_172, %c2_173, %c0_174] : memref<18x18x128xf32, #tpu.memory_space<vmem>>, vector<8x16x128xf32>
    %162 = vector.shape_cast %161 : vector<8x16x128xf32> to vector<128x128xf32>
    %c2_175 = arith.constant 2 : index
    %c0_176 = arith.constant 0 : index
    %c0_177 = arith.constant 0 : index
    %163 = vector.load %arg3[%c2_175, %c0_176, %c0_177] : memref<9x128x128xf32, #tpu.memory_space<vmem>>, vector<1x128x128xf32>
    %164 = vector.shape_cast %163 : vector<1x128x128xf32> to vector<128x128xf32>
    %cst_178 = arith.constant dense<0.000000e+00> : vector<128x128xf32>
    %165 = tpu.matmul %162, %164, %cst_178 {dimension_numbers = #tpu.dot_dimension_numbers<[1], [0], [0], [1], [0, 0, 1, 1], [], []>} : vector<128x128xf32>, vector<128x128xf32>, vector<128x128xf32> -> vector<128x128xf32>
    %166 = arith.addf %160, %165 : vector<128x128xf32>
    %c1_179 = arith.constant 1 : index
    %c0_180 = arith.constant 0 : index
    %c0_181 = arith.constant 0 : index
    %167 = vector.load %arg5[%c1_179, %c0_180, %c0_181] : memref<18x18x128xf32, #tpu.memory_space<vmem>>, vector<8x16x128xf32>
    %168 = vector.shape_cast %167 : vector<8x16x128xf32> to vector<128x128xf32>
    %c3_182 = arith.constant 3 : index
    %c0_183 = arith.constant 0 : index
    %c0_184 = arith.constant 0 : index
    %169 = vector.load %arg3[%c3_182, %c0_183, %c0_184] : memref<9x128x128xf32, #tpu.memory_space<vmem>>, vector<1x128x128xf32>
    %170 = vector.shape_cast %169 : vector<1x128x128xf32> to vector<128x128xf32>
    %cst_185 = arith.constant dense<0.000000e+00> : vector<128x128xf32>
    %171 = tpu.matmul %168, %170, %cst_185 {dimension_numbers = #tpu.dot_dimension_numbers<[1], [0], [0], [1], [0, 0, 1, 1], [], []>} : vector<128x128xf32>, vector<128x128xf32>, vector<128x128xf32> -> vector<128x128xf32>
    %172 = arith.addf %166, %171 : vector<128x128xf32>
    %c1_186 = arith.constant 1 : index
    %c1_187 = arith.constant 1 : index
    %c0_188 = arith.constant 0 : index
    %173 = vector.load %arg5[%c1_186, %c1_187, %c0_188] : memref<18x18x128xf32, #tpu.memory_space<vmem>>, vector<8x16x128xf32>
    %174 = vector.shape_cast %173 : vector<8x16x128xf32> to vector<128x128xf32>
    %c4_189 = arith.constant 4 : index
    %c0_190 = arith.constant 0 : index
    %c0_191 = arith.constant 0 : index
    %175 = vector.load %arg3[%c4_189, %c0_190, %c0_191] : memref<9x128x128xf32, #tpu.memory_space<vmem>>, vector<1x128x128xf32>
    %176 = vector.shape_cast %175 : vector<1x128x128xf32> to vector<128x128xf32>
    %cst_192 = arith.constant dense<0.000000e+00> : vector<128x128xf32>
    %177 = tpu.matmul %174, %176, %cst_192 {dimension_numbers = #tpu.dot_dimension_numbers<[1], [0], [0], [1], [0, 0, 1, 1], [], []>} : vector<128x128xf32>, vector<128x128xf32>, vector<128x128xf32> -> vector<128x128xf32>
    %178 = arith.addf %172, %177 : vector<128x128xf32>
    %c1_193 = arith.constant 1 : index
    %c2_194 = arith.constant 2 : index
    %c0_195 = arith.constant 0 : index
    %179 = vector.load %arg5[%c1_193, %c2_194, %c0_195] : memref<18x18x128xf32, #tpu.memory_space<vmem>>, vector<8x16x128xf32>
    %180 = vector.shape_cast %179 : vector<8x16x128xf32> to vector<128x128xf32>
    %c5_196 = arith.constant 5 : index
    %c0_197 = arith.constant 0 : index
    %c0_198 = arith.constant 0 : index
    %181 = vector.load %arg3[%c5_196, %c0_197, %c0_198] : memref<9x128x128xf32, #tpu.memory_space<vmem>>, vector<1x128x128xf32>
    %182 = vector.shape_cast %181 : vector<1x128x128xf32> to vector<128x128xf32>
    %cst_199 = arith.constant dense<0.000000e+00> : vector<128x128xf32>
    %183 = tpu.matmul %180, %182, %cst_199 {dimension_numbers = #tpu.dot_dimension_numbers<[1], [0], [0], [1], [0, 0, 1, 1], [], []>} : vector<128x128xf32>, vector<128x128xf32>, vector<128x128xf32> -> vector<128x128xf32>
    %184 = arith.addf %178, %183 : vector<128x128xf32>
    %c2_200 = arith.constant 2 : index
    %c0_201 = arith.constant 0 : index
    %c0_202 = arith.constant 0 : index
    %185 = vector.load %arg5[%c2_200, %c0_201, %c0_202] : memref<18x18x128xf32, #tpu.memory_space<vmem>>, vector<8x16x128xf32>
    %186 = vector.shape_cast %185 : vector<8x16x128xf32> to vector<128x128xf32>
    %c6_203 = arith.constant 6 : index
    %c0_204 = arith.constant 0 : index
    %c0_205 = arith.constant 0 : index
    %187 = vector.load %arg3[%c6_203, %c0_204, %c0_205] : memref<9x128x128xf32, #tpu.memory_space<vmem>>, vector<1x128x128xf32>
    %188 = vector.shape_cast %187 : vector<1x128x128xf32> to vector<128x128xf32>
    %cst_206 = arith.constant dense<0.000000e+00> : vector<128x128xf32>
    %189 = tpu.matmul %186, %188, %cst_206 {dimension_numbers = #tpu.dot_dimension_numbers<[1], [0], [0], [1], [0, 0, 1, 1], [], []>} : vector<128x128xf32>, vector<128x128xf32>, vector<128x128xf32> -> vector<128x128xf32>
    %190 = arith.addf %184, %189 : vector<128x128xf32>
    %c2_207 = arith.constant 2 : index
    %c1_208 = arith.constant 1 : index
    %c0_209 = arith.constant 0 : index
    %191 = vector.load %arg5[%c2_207, %c1_208, %c0_209] : memref<18x18x128xf32, #tpu.memory_space<vmem>>, vector<8x16x128xf32>
    %192 = vector.shape_cast %191 : vector<8x16x128xf32> to vector<128x128xf32>
    %c7_210 = arith.constant 7 : index
    %c0_211 = arith.constant 0 : index
    %c0_212 = arith.constant 0 : index
    %193 = vector.load %arg3[%c7_210, %c0_211, %c0_212] : memref<9x128x128xf32, #tpu.memory_space<vmem>>, vector<1x128x128xf32>
    %194 = vector.shape_cast %193 : vector<1x128x128xf32> to vector<128x128xf32>
    %cst_213 = arith.constant dense<0.000000e+00> : vector<128x128xf32>
    %195 = tpu.matmul %192, %194, %cst_213 {dimension_numbers = #tpu.dot_dimension_numbers<[1], [0], [0], [1], [0, 0, 1, 1], [], []>} : vector<128x128xf32>, vector<128x128xf32>, vector<128x128xf32> -> vector<128x128xf32>
    %196 = arith.addf %190, %195 : vector<128x128xf32>
    %c2_214 = arith.constant 2 : index
    %c2_215 = arith.constant 2 : index
    %c0_216 = arith.constant 0 : index
    %197 = vector.load %arg5[%c2_214, %c2_215, %c0_216] : memref<18x18x128xf32, #tpu.memory_space<vmem>>, vector<8x16x128xf32>
    %198 = vector.shape_cast %197 : vector<8x16x128xf32> to vector<128x128xf32>
    %c8_217 = arith.constant 8 : index
    %c0_218 = arith.constant 0 : index
    %c0_219 = arith.constant 0 : index
    %199 = vector.load %arg3[%c8_217, %c0_218, %c0_219] : memref<9x128x128xf32, #tpu.memory_space<vmem>>, vector<1x128x128xf32>
    %200 = vector.shape_cast %199 : vector<1x128x128xf32> to vector<128x128xf32>
    %cst_220 = arith.constant dense<0.000000e+00> : vector<128x128xf32>
    %201 = tpu.matmul %198, %200, %cst_220 {dimension_numbers = #tpu.dot_dimension_numbers<[1], [0], [0], [1], [0, 0, 1, 1], [], []>} : vector<128x128xf32>, vector<128x128xf32>, vector<128x128xf32> -> vector<128x128xf32>
    %202 = arith.addf %196, %201 : vector<128x128xf32>
    %cst_221 = arith.constant 0.000000e+00 : f32
    %203 = vector.broadcast %cst_221 : f32 to vector<128x128xf32>
    %204 = arith.cmpf oge, %202, %203 : vector<128x128xf32>
    %cst_222 = arith.constant 1.000000e-01 : f32
    %205 = vector.broadcast %cst_222 : f32 to vector<128x128xf32>
    %206 = arith.mulf %205, %202 : vector<128x128xf32>
    %207 = arith.select %204, %202, %206 : vector<128x128xi1>, vector<128x128xf32>
    %208 = vector.shape_cast %207 : vector<128x128xf32> to vector<8x16x128xf32>
    %c0_223 = arith.constant 0 : index
    %c0_224 = arith.constant 0 : index
    %c0_225 = arith.constant 0 : index
    %c0_226 = arith.constant 0 : index
    %209 = vector.load %arg4[%c0_223, %c0_224, %c0_225, %c0_226] : memref<1x16x16x128xf32, #tpu.memory_space<vmem>>, vector<1x8x16x128xf32>
    %210 = vector.shape_cast %209 : vector<1x8x16x128xf32> to vector<8x16x128xf32>
    %211 = vector.shape_cast %208 : vector<8x16x128xf32> to vector<1x8x16x128xf32>
    tpu.vector_store %arg4[%c0_223, %c0_224, %c0_225, %c0_226], %211 {strides = array<i32>} : memref<1x16x16x128xf32, #tpu.memory_space<vmem>>, vector<1x8x16x128xf32>,
    %cst_227 = arith.constant 0.000000e+00 : f32
    %212 = vector.broadcast %cst_227 : f32 to vector<128x128xf32>
    %c8_228 = arith.constant 8 : index
    %c0_229 = arith.constant 0 : index
    %c0_230 = arith.constant 0 : index
    %213 = vector.load %arg5[%c8_228, %c0_229, %c0_230] : memref<18x18x128xf32, #tpu.memory_space<vmem>>, vector<8x16x128xf32>
    %214 = vector.shape_cast %213 : vector<8x16x128xf32> to vector<128x128xf32>
    %c0_231 = arith.constant 0 : index
    %c0_232 = arith.constant 0 : index
    %c0_233 = arith.constant 0 : index
    %215 = vector.load %arg3[%c0_231, %c0_232, %c0_233] : memref<9x128x128xf32, #tpu.memory_space<vmem>>, vector<1x128x128xf32>
    %216 = vector.shape_cast %215 : vector<1x128x128xf32> to vector<128x128xf32>
    %cst_234 = arith.constant dense<0.000000e+00> : vector<128x128xf32>
    %217 = tpu.matmul %214, %216, %cst_234 {dimension_numbers = #tpu.dot_dimension_numbers<[1], [0], [0], [1], [0, 0, 1, 1], [], []>} : vector<128x128xf32>, vector<128x128xf32>, vector<128x128xf32> -> vector<128x128xf32>
    %218 = arith.addf %212, %217 : vector<128x128xf32>
    %c8_235 = arith.constant 8 : index
    %c1_236 = arith.constant 1 : index
    %c0_237 = arith.constant 0 : index
    %219 = vector.load %arg5[%c8_235, %c1_236, %c0_237] : memref<18x18x128xf32, #tpu.memory_space<vmem>>, vector<8x16x128xf32>
    %220 = vector.shape_cast %219 : vector<8x16x128xf32> to vector<128x128xf32>
    %c1_238 = arith.constant 1 : index
    %c0_239 = arith.constant 0 : index
    %c0_240 = arith.constant 0 : index
    %221 = vector.load %arg3[%c1_238, %c0_239, %c0_240] : memref<9x128x128xf32, #tpu.memory_space<vmem>>, vector<1x128x128xf32>
    %222 = vector.shape_cast %221 : vector<1x128x128xf32> to vector<128x128xf32>
    %cst_241 = arith.constant dense<0.000000e+00> : vector<128x128xf32>
    %223 = tpu.matmul %220, %222, %cst_241 {dimension_numbers = #tpu.dot_dimension_numbers<[1], [0], [0], [1], [0, 0, 1, 1], [], []>} : vector<128x128xf32>, vector<128x128xf32>, vector<128x128xf32> -> vector<128x128xf32>
    %224 = arith.addf %218, %223 : vector<128x128xf32>
    %c8_242 = arith.constant 8 : index
    %c2_243 = arith.constant 2 : index
    %c0_244 = arith.constant 0 : index
    %225 = vector.load %arg5[%c8_242, %c2_243, %c0_244] : memref<18x18x128xf32, #tpu.memory_space<vmem>>, vector<8x16x128xf32>
    %226 = vector.shape_cast %225 : vector<8x16x128xf32> to vector<128x128xf32>
    %c2_245 = arith.constant 2 : index
    %c0_246 = arith.constant 0 : index
    %c0_247 = arith.constant 0 : index
    %227 = vector.load %arg3[%c2_245, %c0_246, %c0_247] : memref<9x128x128xf32, #tpu.memory_space<vmem>>, vector<1x128x128xf32>
    %228 = vector.shape_cast %227 : vector<1x128x128xf32> to vector<128x128xf32>
    %cst_248 = arith.constant dense<0.000000e+00> : vector<128x128xf32>
    %229 = tpu.matmul %226, %228, %cst_248 {dimension_numbers = #tpu.dot_dimension_numbers<[1], [0], [0], [1], [0, 0, 1, 1], [], []>} : vector<128x128xf32>, vector<128x128xf32>, vector<128x128xf32> -> vector<128x128xf32>
    %230 = arith.addf %224, %229 : vector<128x128xf32>
    %c9_249 = arith.constant 9 : index
    %c0_250 = arith.constant 0 : index
    %c0_251 = arith.constant 0 : index
    %231 = vector.load %arg5[%c9_249, %c0_250, %c0_251] : memref<18x18x128xf32, #tpu.memory_space<vmem>>, vector<8x16x128xf32>
    %232 = vector.shape_cast %231 : vector<8x16x128xf32> to vector<128x128xf32>
    %c3_252 = arith.constant 3 : index
    %c0_253 = arith.constant 0 : index
    %c0_254 = arith.constant 0 : index
    %233 = vector.load %arg3[%c3_252, %c0_253, %c0_254] : memref<9x128x128xf32, #tpu.memory_space<vmem>>, vector<1x128x128xf32>
    %234 = vector.shape_cast %233 : vector<1x128x128xf32> to vector<128x128xf32>
    %cst_255 = arith.constant dense<0.000000e+00> : vector<128x128xf32>
    %235 = tpu.matmul %232, %234, %cst_255 {dimension_numbers = #tpu.dot_dimension_numbers<[1], [0], [0], [1], [0, 0, 1, 1], [], []>} : vector<128x128xf32>, vector<128x128xf32>, vector<128x128xf32> -> vector<128x128xf32>
    %236 = arith.addf %230, %235 : vector<128x128xf32>
    %c9_256 = arith.constant 9 : index
    %c1_257 = arith.constant 1 : index
    %c0_258 = arith.constant 0 : index
    %237 = vector.load %arg5[%c9_256, %c1_257, %c0_258] : memref<18x18x128xf32, #tpu.memory_space<vmem>>, vector<8x16x128xf32>
    %238 = vector.shape_cast %237 : vector<8x16x128xf32> to vector<128x128xf32>
    %c4_259 = arith.constant 4 : index
    %c0_260 = arith.constant 0 : index
    %c0_261 = arith.constant 0 : index
    %239 = vector.load %arg3[%c4_259, %c0_260, %c0_261] : memref<9x128x128xf32, #tpu.memory_space<vmem>>, vector<1x128x128xf32>
    %240 = vector.shape_cast %239 : vector<1x128x128xf32> to vector<128x128xf32>
    %cst_262 = arith.constant dense<0.000000e+00> : vector<128x128xf32>
    %241 = tpu.matmul %238, %240, %cst_262 {dimension_numbers = #tpu.dot_dimension_numbers<[1], [0], [0], [1], [0, 0, 1, 1], [], []>} : vector<128x128xf32>, vector<128x128xf32>, vector<128x128xf32> -> vector<128x128xf32>
    %242 = arith.addf %236, %241 : vector<128x128xf32>
    %c9_263 = arith.constant 9 : index
    %c2_264 = arith.constant 2 : index
    %c0_265 = arith.constant 0 : index
    %243 = vector.load %arg5[%c9_263, %c2_264, %c0_265] : memref<18x18x128xf32, #tpu.memory_space<vmem>>, vector<8x16x128xf32>
    %244 = vector.shape_cast %243 : vector<8x16x128xf32> to vector<128x128xf32>
    %c5_266 = arith.constant 5 : index
    %c0_267 = arith.constant 0 : index
    %c0_268 = arith.constant 0 : index
    %245 = vector.load %arg3[%c5_266, %c0_267, %c0_268] : memref<9x128x128xf32, #tpu.memory_space<vmem>>, vector<1x128x128xf32>
    %246 = vector.shape_cast %245 : vector<1x128x128xf32> to vector<128x128xf32>
    %cst_269 = arith.constant dense<0.000000e+00> : vector<128x128xf32>
    %247 = tpu.matmul %244, %246, %cst_269 {dimension_numbers = #tpu.dot_dimension_numbers<[1], [0], [0], [1], [0, 0, 1, 1], [], []>} : vector<128x128xf32>, vector<128x128xf32>, vector<128x128xf32> -> vector<128x128xf32>
    %248 = arith.addf %242, %247 : vector<128x128xf32>
    %c10_270 = arith.constant 10 : index
    %c0_271 = arith.constant 0 : index
    %c0_272 = arith.constant 0 : index
    %249 = vector.load %arg5[%c10_270, %c0_271, %c0_272] : memref<18x18x128xf32, #tpu.memory_space<vmem>>, vector<8x16x128xf32>
    %250 = vector.shape_cast %249 : vector<8x16x128xf32> to vector<128x128xf32>
    %c6_273 = arith.constant 6 : index
    %c0_274 = arith.constant 0 : index
    %c0_275 = arith.constant 0 : index
    %251 = vector.load %arg3[%c6_273, %c0_274, %c0_275] : memref<9x128x128xf32, #tpu.memory_space<vmem>>, vector<1x128x128xf32>
    %252 = vector.shape_cast %251 : vector<1x128x128xf32> to vector<128x128xf32>
    %cst_276 = arith.constant dense<0.000000e+00> : vector<128x128xf32>
    %253 = tpu.matmul %250, %252, %cst_276 {dimension_numbers = #tpu.dot_dimension_numbers<[1], [0], [0], [1], [0, 0, 1, 1], [], []>} : vector<128x128xf32>, vector<128x128xf32>, vector<128x128xf32> -> vector<128x128xf32>
    %254 = arith.addf %248, %253 : vector<128x128xf32>
    %c10_277 = arith.constant 10 : index
    %c1_278 = arith.constant 1 : index
    %c0_279 = arith.constant 0 : index
    %255 = vector.load %arg5[%c10_277, %c1_278, %c0_279] : memref<18x18x128xf32, #tpu.memory_space<vmem>>, vector<8x16x128xf32>
    %256 = vector.shape_cast %255 : vector<8x16x128xf32> to vector<128x128xf32>
    %c7_280 = arith.constant 7 : index
    %c0_281 = arith.constant 0 : index
    %c0_282 = arith.constant 0 : index
    %257 = vector.load %arg3[%c7_280, %c0_281, %c0_282] : memref<9x128x128xf32, #tpu.memory_space<vmem>>, vector<1x128x128xf32>
    %258 = vector.shape_cast %257 : vector<1x128x128xf32> to vector<128x128xf32>
    %cst_283 = arith.constant dense<0.000000e+00> : vector<128x128xf32>
    %259 = tpu.matmul %256, %258, %cst_283 {dimension_numbers = #tpu.dot_dimension_numbers<[1], [0], [0], [1], [0, 0, 1, 1], [], []>} : vector<128x128xf32>, vector<128x128xf32>, vector<128x128xf32> -> vector<128x128xf32>
    %260 = arith.addf %254, %259 : vector<128x128xf32>
    %c10_284 = arith.constant 10 : index
    %c2_285 = arith.constant 2 : index
    %c0_286 = arith.constant 0 : index
    %261 = vector.load %arg5[%c10_284, %c2_285, %c0_286] : memref<18x18x128xf32, #tpu.memory_space<vmem>>, vector<8x16x128xf32>
    %262 = vector.shape_cast %261 : vector<8x16x128xf32> to vector<128x128xf32>
    %c8_287 = arith.constant 8 : index
    %c0_288 = arith.constant 0 : index
    %c0_289 = arith.constant 0 : index
    %263 = vector.load %arg3[%c8_287, %c0_288, %c0_289] : memref<9x128x128xf32, #tpu.memory_space<vmem>>, vector<1x128x128xf32>
    %264 = vector.shape_cast %263 : vector<1x128x128xf32> to vector<128x128xf32>
    %cst_290 = arith.constant dense<0.000000e+00> : vector<128x128xf32>
    %265 = tpu.matmul %262, %264, %cst_290 {dimension_numbers = #tpu.dot_dimension_numbers<[1], [0], [0], [1], [0, 0, 1, 1], [], []>} : vector<128x128xf32>, vector<128x128xf32>, vector<128x128xf32> -> vector<128x128xf32>
    %266 = arith.addf %260, %265 : vector<128x128xf32>
    %cst_291 = arith.constant 0.000000e+00 : f32
    %267 = vector.broadcast %cst_291 : f32 to vector<128x128xf32>
    %268 = arith.cmpf oge, %266, %267 : vector<128x128xf32>
    %cst_292 = arith.constant 1.000000e-01 : f32
    %269 = vector.broadcast %cst_292 : f32 to vector<128x128xf32>
    %270 = arith.mulf %269, %266 : vector<128x128xf32>
    %271 = arith.select %268, %266, %270 : vector<128x128xi1>, vector<128x128xf32>
    %272 = vector.shape_cast %271 : vector<128x128xf32> to vector<8x16x128xf32>
    %c0_293 = arith.constant 0 : index
    %c8_294 = arith.constant 8 : index
    %c0_295 = arith.constant 0 : index
    %c0_296 = arith.constant 0 : index
    %273 = vector.load %arg4[%c0_293, %c8_294, %c0_295, %c0_296] : memref<1x16x16x128xf32, #tpu.memory_space<vmem>>, vector<1x8x16x128xf32>
    %274 = vector.shape_cast %273 : vector<1x8x16x128xf32> to vector<8x16x128xf32>
    %275 = vector.shape_cast %272 : vector<8x16x128xf32> to vector<1x8x16x128xf32>
    tpu.vector_store %arg4[%c0_293, %c8_294, %c0_295, %c0_296], %275 {strides = array<i32>} : memref<1x16x16x128xf32, #tpu.memory_space<vmem>>, vector<1x8x16x128xf32>,
    return
  }
  func.func @transform_0(%arg0: i32) -> (i32, i32, i32, i32) {
    %c0_i32 = arith.constant 0 : i32
    %c0_i32_0 = arith.constant 0 : i32
    %c0_i32_1 = arith.constant 0 : i32
    %c0_i32_2 = arith.constant 0 : i32
    return %arg0, %c0_i32, %c0_i32_0, %c0_i32_1 : i32, i32, i32, i32
  }
  func.func @transform_1(%arg0: i32) -> (i32, i32, i32) {
    %c0_i32 = arith.constant 0 : i32
    %c0_i32_0 = arith.constant 0 : i32
    %c0_i32_1 = arith.constant 0 : i32
    %c0_i32_2 = arith.constant 0 : i32
    return %c0_i32, %c0_i32_0, %c0_i32_1 : i32, i32, i32
  }
  func.func @transform_2(%arg0: i32) -> (i32, i32, i32) {
    %c0_i32 = arith.constant 0 : i32
    %c0_i32_0 = arith.constant 0 : i32
    %c0_i32_1 = arith.constant 0 : i32
    %c0_i32_2 = arith.constant 0 : i32
    return %c0_i32, %c0_i32_0, %c0_i32_1 : i32, i32, i32
  }
  func.func @transform_3(%arg0: i32) -> (i32, i32, i32, i32) {
    %c0_i32 = arith.constant 0 : i32
    %c0_i32_0 = arith.constant 0 : i32
    %c0_i32_1 = arith.constant 0 : i32
    %c0_i32_2 = arith.constant 0 : i32
    return %arg0, %c0_i32, %c0_i32_0, %c0_i32_1 : i32, i32, i32, i32
  }
}

</mosaic_0001>

<bundles_post_ra>
// kernel: tpu_custom_call.1
= control target key start
LH: loop header
LB: loop body
LE: loop exit
PB: predicated region body
PF: predicated region fallthrough
CT: control target
= control target key end

     0   :  { %8 = vsyncpa [#allocation4], 0  ;;  %s14983_s0 = inlined_call_operand.vmem [shape: f32[2,18,18,128], index: 0, kind: input, shape index: {}]   ;;  %s14984_s1 = inlined_call_operand.vmem [shape: f32[9,128,128], index: 1, kind: input, shape index: {}]   ;;  %s14985_s2 = inlined_call_operand.hbm [shape: f32[9,128,128], index: 2, kind: input, shape index: {}]   ;;  %s14986_s3 = inlined_call_operand.hbm [shape: f32[2,16,16,128], index: 3, kind: output, shape index: {}]  }
   0x1   :  { %9 = vsyncpa [#allocation5], 0 }
   0x2   :  { %11 = vsyncpa [#allocation5 + $0x1], 0  ;;  %s12952_s12 = smov 0   ;;  %s12954_s13 = smov 0  }
   0x3   :  { %s12956_s14 = smov 0   ;;  %s12958_s15 = smov 0  }
   0x4 LB: > { %s12973_s16 = sadd.s32 4294967295, %s12923_s15   ;;  %s7414_s17 = sadd.s32 4294967294, %s12923_s15   ;;  %s12923_s15 = sphi %s12958_s15, %s15005_s15   ;;  %s12919_s14 = sphi %s12956_s14, %s15004_s14   ;;  %s12915_s13 = sphi %s12954_s13, %s15003_s13   ;;  %s12911_s12 = sphi %s12952_s12, %s15002_s12  }
   0x5   : > { %s12977_s18 = sadd.s32 1, %s12923_s15   ;;  %s92_s19 = sadd.s32 1, %s12919_s14 }
   0x6   : > { %s89_s20 = ssub.s32 %s12923_s15, %s12977_s18  ;;  %p102_p0 = scmp.ne.s32.totalorder %s12919_s14, %s12915_s13 }
   0x7   : > { %p90_p1 = scmp.eq.s32.totalorder %s89_s20, 0  ;;  %p103_p2 = scmp.eq.s32.totalorder %s12973_s16, 1 }
   0x8   : > { %p108_p3 = scmp.ne.s32.totalorder %s12915_s13, %s12911_s12  ;;  %p109_p4 = scmp.eq.s32.totalorder %s7414_s17, 1 }
   0x9   : > { %s12988_s21 = scalar_select %p90_p1, %s12919_s14, %s92_s19  }
   0xa   : > { %p12990_p5 = por %p103_p2, %p102_p0  ;;  %p12994_p6 = por %p109_p4, %p108_p3 }
   0xb   : > { %p7415_p7 = scmp.ge.s32.totalorder %s12923_s15, 1  ;;  %p116_p8 = scmp.lt.s32.totalorder %s12923_s15, 3 }
   0xc   : > { %s14991_s22 = scalar_select %p12990_p5, 1, 0 }
   0xd   : > { %s14992_s23 = scalar_select %p12994_p6, 1, 0 }
   0xe   : > { %p14987_p9 = scmp.eq.s32.totalorder %s12973_s16, 0  ;;  %p13001_p10 = pnand %p7415_p7, %p116_p8 }
   0xf   : > { %s12925_s25 = smov [#allocation3]   ;;  %s12829_s30 = scalar_lea.hbm %s14985_s2, 18432 }
  0x10   : > { %s14993_s24 = scalar_select %p13001_p10, 1, 0 }
  0x11   : > { %s131_s26 = sshll.u32 %s12925_s25, 4  ;;  %p12779_p11 = pneg %p13001_p10  ;;  %s132_s26 = int_to_ptr.vmem [resolvable:$true] %s131_s26 }
  0x12   : > { %p12830_p13 = scmp.ne.s32.totalorder %s14985_s2, %s12829_s30  ;;  %p12836_p3 = scmp.lt.u32.totalorder %s12829_s30, %s14985_s2 }
  0x13   : > { %p13009_p12 = pnand %p14987_p9, %p12779_p11 }
  0x15   : > { %p12831_p0 = pneg %p13009_p12 }
  0x17   : > { %p12832_p1 = pnand %p12831_p0, %p12830_p13 }
  0x19   : > { %p12833_p2 = pneg %p12832_p1 }
  0x1b   : > { %p12838_p4 = pnand %p12836_p3, %p12833_p2 }
  0x1d   : > { %12841 = shalt.err (!%p12838_p4)
}
  0x1e   : > { %s12842_s8 = scalar_lea.vmem %s132_s26, 18432  ;;  %p12850_p9 = scmp.lt.s32.totalorder %s132_s26, %s132_s26 }
  0x1f   : > { %p12843_p7 = scmp.ne.s32.totalorder %s132_s26, %s12842_s8  ;;  %p12851_p6 = scmp.lt.s32.totalorder %s12842_s8, %s12842_s8 }
  0x21   : > { %p12845_p8 = pnand %p12843_p7, %p12831_p0  ;;  %p12852_p5 = por %p12851_p6, %p12850_p9 }
  0x23   : > { %p12846_p11 = pneg %p12845_p8 }
  0x25   : > { %p12853_p10 = pnand %p12852_p5, %p12846_p11 }
  0x27   : > { %12856 = shalt.err (!%p12853_p10)
}
  0x28   : > { %s12926_s9 = smov 128   ;;  %s12927_s10 = smov 8  }
  0x29   : > { %12782 = dma.hbm_to_vmem [thread:$0]  (!%p13009_p12), %s14985_s2, 18432, %s132_s26, [#allocation4], %s12926_s9, %s12926_s9, %s12927_s10  }
  0x2a   : > { %p14995_p13 = scmp.ne.s32.totalorder %s14993_s24, 0 }
  0x2c   : > { %155 = sbr.rel (%p14995_p13) target bundleno = 1113 (0x459), region = 32 }
  0x33   : > { %p14996_p1 = scmp.eq.s32.totalorder %s12973_s16, 0 }
  0x35   : > { %12902 = dma.done.wait (%p14996_p1), [#allocation4], 18432   ;;  %p14997_p0 = pmov %p14996_p1 }
  0x36   : > { %p179_p5 = scmp.lt.s32.totalorder %s12973_s16, 1  ;;  %v7422_v0 = vld [vmem:[%s14984_s1 + $0x80] sm:$0xff]  ;;  %v7423_v1 = vld [vmem:[%s14984_s1 + $0x88] sm:$0xff]  ;;  %v7424_v2 = vld [vmem:[%s14984_s1 + $0x90] sm:$0xff]  ;;  %s7939_s26 = sshll.u32 %s12973_s16, 12 }
  0x37   : > { %12904 = vsyncadd (%p14997_p0), [#allocation4], 4294948864  ;;  %v11108_v3 = vpack.c.bf16 %v7423_v1, %v7422_v0  ;;  %v7425_v4 = vld [vmem:[%s14984_s1 + $0x98] sm:$0xff]  ;;  %v7426_v6 = vld [vmem:[%s14984_s1 + $0xa0] sm:$0xff]  ;;  %s14934_s4 = scalar_lea.hbm %s14986_s3, %s7939_s26  ;;  %p15000_p9 = scmp.ne.s32.totalorder %s14991_s22, 0 }
  0x38   : > { %s180_s19 = scalar_select %p179_p5, %s12973_s16, 1  ;;  %v11112_v5 = vpack.c.bf16 %v7425_v4, %v7424_v2  ;;  %v7427_v7 = vld [vmem:[%s14984_s1 + $0xa8] sm:$0xff]  ;;  %v7428_v11 = vld [vmem:[%s14984_s1 + $0xb0] sm:$0xff]  ;;  %v7429_v12 = vld [vmem:[%s14984_s1 + $0xb8] sm:$0xff] }
  0x39   : > { %11109 = vmatprep.subr.bf16.mxu0 %v11108_v3  ;;  %11397 = vmatprep.subr.bf16.mxu1 %v11108_v3  ;;  %v11116_v8 = vpack.c.bf16 %v7427_v7, %v7426_v6  ;;  %v11120_v13 = vpack.c.bf16 %v7429_v12, %v7428_v11  ;;  %v7430_v14 = vld [vmem:[%s14984_s1 + $0xc0] sm:$0xff]  ;;  %v7431_v15 = vld [vmem:[%s14984_s1 + $0xc8] sm:$0xff]  ;;  %v7432_v17 = vld [vmem:[%s14984_s1 + $0xd0] sm:$0xff]  ;;  %s12929_s6 = smov [#allocation6]  }
  0x3a   : > { %s12772_s20 = smul.u32 432, %s180_s19  ;;  %11111 = vmatpush3.bf16.msra.mxu0 %v11108_v3  ;;  %11399 = vmatpush3.bf16.msra.mxu1 %v11108_v3  ;;  %v11124_v16 = vpack.c.bf16 %v7431_v15, %v7430_v14  ;;  %v7433_v18 = vld [vmem:[%s14984_s1 + $0xd8] sm:$0xff]  ;;  %v7434_v20 = vld [vmem:[%s14984_s1 + $0xe0] sm:$0xff]  ;;  %v7435_v21 = vld [vmem:[%s14984_s1 + $0xe8] sm:$0xff]  ;;  %s12861_s7 = sshll.u32 %s12929_s6, 4  ;;  %s12862_s7 = int_to_ptr.vmem [resolvable:$false] %s12861_s7 }
  0x3b   : > { %11113 = vmatprep.subr.bf16.mxu0 %v11112_v5  ;;  %11401 = vmatprep.subr.bf16.mxu1 %v11112_v5  ;;  %v11128_v19 = vpack.c.bf16 %v7433_v18, %v7432_v17  ;;  %v11132_v22 = vpack.c.bf16 %v7435_v21, %v7434_v20  ;;  %v7436_v23 = vld [vmem:[%s14984_s1 + $0xf0] sm:$0xff]  ;;  %v7437_v24 = vld [vmem:[%s14984_s1 + $0xf8] sm:$0xff]  ;;  %v240_v26 = vld [vmem:[%s14984_s1] sm:$0xff]  ;;  %s12863_s8 = scalar_lea.vmem %s12862_s7, 8192 }
  0x3c   : > { %s13058_s11 = scalar_lea.vmem %s14983_s0, %s12772_s20  ;;  %v11136_v25 = vpack.c.bf16 %v7437_v24, %v7436_v23  ;;  %v241_v27 = vld [vmem:[%s14984_s1 + $0x8] sm:$0xff]  ;;  %v242_v29 = vld [vmem:[%s14984_s1 + $0x10] sm:$0xff]  ;;  %v243_v30 = vld [vmem:[%s14984_s1 + $0x18] sm:$0xff] }
  0x3d   : > { %v256_v9 = vld [vmem:[%s13058_s11 + $0x1] sm:$0xff]  ;;  %v11140_v28 = vpack.c.bf16 %v241_v27, %v240_v26  ;;  %v257_v31 = vld [vmem:[%s13058_s11 + $0x9] sm:$0xff]  ;;  %v258_v33 = vld [vmem:[%s13058_s11 + $0x19] sm:$0xff]  ;;  %v11144_v35 = vpack.c.bf16 %v243_v30, %v242_v29 }
  0x3e   : > { %v7662_v10 = vld [vmem:[%s13058_s11 + $0xc1] sm:$0xff]  ;;  %9124 = vmatprep.mubr.f32.mxu0 %v256_v9  ;;  %11115 = vmatpush3.bf16.msra.mxu0 %v11112_v5  ;;  %v7663_v32 = vld [vmem:[%s13058_s11 + $0xc9] sm:$0xff]  ;;  %v7664_v34 = vld [vmem:[%s13058_s11 + $0xd9] sm:$0xff] }
  0x3f   : > { %9628 = vmatprep.mubr.f32.mxu1 %v7662_v10  ;;  %11403 = vmatpush3.bf16.msra.mxu1 %v11112_v5  ;;  %v244_v36 = vld [vmem:[%s14984_s1 + $0x20] sm:$0xff]  ;;  %v245_v37 = vld [vmem:[%s14984_s1 + $0x28] sm:$0xff]  ;;  %v260_v40 = vld [vmem:[%s13058_s11 + $0x31] sm:$0xff] }
  0x40   : > { %11117 = vmatprep.subr.bf16.mxu0 %v11116_v8  ;;  %11405 = vmatprep.subr.bf16.mxu1 %v11116_v8  ;;  %v259_v38 = vld [vmem:[%s13058_s11 + $0x21] sm:$0xff]  ;;  %v7666_v41 = vld [vmem:[%s13058_s11 + $0xf1] sm:$0xff]  ;;  %v11148_v42 = vpack.c.bf16 %v245_v37, %v244_v36  ;;  %v261_v45 = vld [vmem:[%s13058_s11 + $0x39] sm:$0xff] }
  0x41   : > { %v7665_v39 = vld [vmem:[%s13058_s11 + $0xe1] sm:$0xff]  ;;  %v246_v43 = vld [vmem:[%s14984_s1 + $0x30] sm:$0xff]  ;;  %v247_v44 = vld [vmem:[%s14984_s1 + $0x38] sm:$0xff] }
  0x42   : > { %11119 = vmatpush3.bf16.msra.mxu0 %v11116_v8  ;;  %v7667_v46 = vld [vmem:[%s13058_s11 + $0xf9] sm:$0xff]  ;;  %v262_v47 = vld [vmem:[%s13058_s11 + $0x49] sm:$0xff]  ;;  %v11152_v49 = vpack.c.bf16 %v247_v44, %v246_v43  ;;  %v263_v52 = vld [vmem:[%s13058_s11 + $0x51] sm:$0xff] }
  0x43   : > { %11407 = vmatpush3.bf16.msra.mxu1 %v11116_v8  ;;  %11121 = vmatprep.subr.bf16.mxu0 %v11120_v13  ;;  %v7668_v48 = vld [vmem:[%s13058_s11 + $0x109] sm:$0xff]  ;;  %v248_v50 = vld [vmem:[%s14984_s1 + $0x40] sm:$0xff]  ;;  %v7669_v53 = vld [vmem:[%s13058_s11 + $0x111] sm:$0xff] }
  0x44   : > { %11409 = vmatprep.subr.bf16.mxu1 %v11120_v13  ;;  %v249_v51 = vld [vmem:[%s14984_s1 + $0x48] sm:$0xff]  ;;  %v250_v57 = vld [vmem:[%s14984_s1 + $0x50] sm:$0xff]  ;;  %v251_v58 = vld [vmem:[%s14984_s1 + $0x58] sm:$0xff] }
  0x45   : > { %v264_v54 = vld [vmem:[%s13058_s11 + $0x61] sm:$0xff]  ;;  %v11156_v56 = vpack.c.bf16 %v249_v51, %v248_v50  ;;  %v265_v59 = vld [vmem:[%s13058_s11 + $0x69] sm:$0xff]  ;;  %v266_v61 = vld [vmem:[%s13058_s11 + $0x79] sm:$0xff]  ;;  %v11160_v63 = vpack.c.bf16 %v251_v58, %v250_v57 }
  0x46   : > { %11123 = vmatpush3.bf16.msra.mxu0 %v11120_v13  ;;  %v7670_v55 = vld [vmem:[%s13058_s11 + $0x121] sm:$0xff]  ;;  %v7671_v60 = vld [vmem:[%s13058_s11 + $0x129] sm:$0xff]  ;;  %v7672_v62 = vld [vmem:[%s13058_s11 + $0x139] sm:$0xff] }
  0x47   : > { %11411 = vmatpush3.bf16.msra.mxu1 %v11120_v13  ;;  %11125 = vmatprep.subr.bf16.mxu0 %v11124_v16  ;;  %v252_v0 = vld [vmem:[%s14984_s1 + $0x60] sm:$0xff]  ;;  %v253_v1 = vld [vmem:[%s14984_s1 + $0x68] sm:$0xff]  ;;  %v268_v4 = vld [vmem:[%s13058_s11 + $0x91] sm:$0xff] }
  0x48   : > { %11413 = vmatprep.subr.bf16.mxu1 %v11124_v16  ;;  %v267_v2 = vld [vmem:[%s13058_s11 + $0x81] sm:$0xff]  ;;  %v7674_v5 = vld [vmem:[%s13058_s11 + $0x151] sm:$0xff]  ;;  %v11164_v6 = vpack.c.bf16 %v253_v1, %v252_v0  ;;  %v269_v9 = vld [vmem:[%s13058_s11 + $0x99] sm:$0xff] }
  0x49   : > { %v7673_v3 = vld [vmem:[%s13058_s11 + $0x141] sm:$0xff]  ;;  %v254_v7 = vld [vmem:[%s14984_s1 + $0x70] sm:$0xff]  ;;  %v255_v8 = vld [vmem:[%s14984_s1 + $0x78] sm:$0xff] }
  0x4a   : > { %11127 = vmatpush3.bf16.msra.mxu0 %v11124_v16  ;;  %v7675_v10 = vld [vmem:[%s13058_s11 + $0x159] sm:$0xff]  ;;  %v270_v11 = vld [vmem:[%s13058_s11 + $0xa9] sm:$0xff]  ;;  %v11168_v13 = vpack.c.bf16 %v255_v8, %v254_v7  ;;  %v7677_v17 = vld [vmem:[%s13058_s11 + $0x171] sm:$0xff] }
  0x4b   : > { %11415 = vmatpush3.bf16.msra.mxu1 %v11124_v16  ;;  %11129 = vmatprep.subr.bf16.mxu0 %v11128_v19  ;;  %v7676_v12 = vld [vmem:[%s13058_s11 + $0x169] sm:$0xff]  ;;  %v7438_v14 = vld [vmem:[%s14984_s1 + $0x100] sm:$0xff]  ;;  %v271_v16 = vld [vmem:[%s13058_s11 + $0xb1] sm:$0xff] }
  0x4c   : > { %11417 = vmatprep.subr.bf16.mxu1 %v11128_v19  ;;  %v7439_v15 = vld [vmem:[%s14984_s1 + $0x108] sm:$0xff]  ;;  %v224_v18 = vld [vmem:[%s13058_s11] sm:$0xff]  ;;  %v7440_v21 = vld [vmem:[%s14984_s1 + $0x110] sm:$0xff] }
  0x4d   : > { %v11172_v20 = vpack.c.bf16 %v7439_v15, %v7438_v14  ;;  %v225_v23 = vld [vmem:[%s13058_s11 + $0x8] sm:$0xff]  ;;  %v13195_v26 = vld [vmem:[%s13058_s11 + $0xd8] sm:$0xff]  ;;  %v13205_v30 = vld [vmem:[%s13058_s11 + $0x20] sm:$0xff] }
  0x4e   : > { %11131 = vmatpush3.bf16.msra.mxu0 %v11128_v19  ;;  %v13188_v24 = vld [vmem:[%s13058_s11 + $0xc8] sm:$0xff]  ;;  %v7445_v36 = vld [vmem:[%s14984_s1 + $0x138] sm:$0xff]  ;;  %v13249_v44 = vld [vmem:[%s13058_s11 + $0x50] sm:$0xff] }
  0x4f   : > { %11419 = vmatpush3.bf16.msra.mxu1 %v11128_v19  ;;  %11133 = vmatprep.subr.bf16.mxu0 %v11132_v22  ;;  %v13178_v19 = vld [vmem:[%s13058_s11 + $0xc0] sm:$0xff]  ;;  %v7443_v29 = vld [vmem:[%s14984_s1 + $0x128] sm:$0xff]  ;;  %v13227_v37 = vld [vmem:[%s13058_s11 + $0x38] sm:$0xff] }
  0x50   : > { %11421 = vmatprep.subr.bf16.mxu1 %v11132_v22  ;;  %v7447_v43 = vld [vmem:[%s14984_s1 + $0x148] sm:$0xff]  ;;  %v7449_v50 = vld [vmem:[%s14984_s1 + $0x158] sm:$0xff]  ;;  %v13293_v58 = vld [vmem:[%s13058_s11 + $0x80] sm:$0xff] }
  0x51   : > { %v13271_v51 = vld [vmem:[%s13058_s11 + $0x68] sm:$0xff]  ;;  %v7453_v0 = vld [vmem:[%s14984_s1 + $0x178] sm:$0xff]  ;;  %v13337_v8 = vld [vmem:[%s13058_s11 + $0xb0] sm:$0xff] }
  0x52   : > { %11135 = vmatpush3.bf16.msra.mxu0 %v11132_v22  ;;  %v7451_v57 = vld [vmem:[%s14984_s1 + $0x168] sm:$0xff]  ;;  %v13315_v1 = vld [vmem:[%s13058_s11 + $0x98] sm:$0xff] }
  0x53   : > { %11423 = vmatpush3.bf16.msra.mxu1 %v11132_v22  ;;  %11137 = vmatprep.subr.bf16.mxu0 %v11136_v25  ;;  %v7441_v22 = vld [vmem:[%s14984_s1 + $0x118] sm:$0xff]  ;;  %v7471_v7 = vld [vmem:[%s14984_s1 + $0x188] sm:$0xff] }
  0x54   : > { %11425 = vmatprep.subr.bf16.mxu1 %v11136_v25  ;;  %v11176_v27 = vpack.c.bf16 %v7441_v22, %v7440_v21  ;;  %v7473_v14 = vld [vmem:[%s14984_s1 + $0x198] sm:$0xff]  ;;  %v580_v15 = vld [vmem:[%s13058_s11 + $0xa] sm:$0xff]  ;;  %v7474_v21 = vld [vmem:[%s14984_s1 + $0x1a0] sm:$0xff] }
  0x55   : > { %v7475_v22 = vld [vmem:[%s14984_s1 + $0x1a8] sm:$0xff] }
  0x56   : > { %11139 = vmatpush3.bf16.msra.mxu0 %v11136_v25 }
  0x57   : > { %11427 = vmatpush3.bf16.msra.mxu1 %v11136_v25  ;;  %11141 = vmatprep.subr.bf16.mxu0 %v11140_v28  ;;  %v13192_v25 = vld [vmem:[%s13058_s11 + $0x18] sm:$0xff] }
  0x58   : > { %11429 = vmatprep.subr.bf16.mxu1 %v11140_v28 }
  0x59   : > { %9125 = vmatmul.mubr.f32.vlgmr.msra.gmra.mrb[0].mxu0 %v257_v31  ;;  %v13208_v31 = vld [vmem:[%s13058_s11 + $0xe0] sm:$0xff] }
  0x5a   : > { %9629 = vmatmul.mubr.f32.vlgmr.msra.gmra.mrb[0].mxu1 %v7663_v32  ;;  %11143 = vmatpush3.bf16.msra.mxu0 %v11140_v28  ;;  %v13213_v32 = vld [vmem:[%s13058_s11 + $0x30] sm:$0xff] }
  0x5b   : > { %11431 = vmatpush3.bf16.msra.mxu1 %v11140_v28  ;;  %9127 = vmatprep.mubr.f32.mxu0 %v258_v33  ;;  %v7442_v28 = vld [vmem:[%s14984_s1 + $0x120] sm:$0xff]  ;;  %v13216_v33 = vld [vmem:[%s13058_s11 + $0xf0] sm:$0xff] }
  0x5c   : > { %9631 = vmatprep.mubr.f32.mxu1 %v7664_v34  ;;  %11145 = vmatprep.subr.bf16.mxu0 %v11144_v35  ;;  %v11180_v34 = vpack.c.bf16 %v7443_v29, %v7442_v28  ;;  %v13377_v28 = vld [vmem:[%s13058_s11 + $0x32] sm:$0xff] }
  0x5d   : > { %11433 = vmatprep.subr.bf16.mxu1 %v11144_v35  ;;  %9128 = vmatmul.mubr.f32.gmra.mrb[2].mxu0 %v259_v38  ;;  %v13230_v38 = vld [vmem:[%s13058_s11 + $0xf8] sm:$0xff] }
  0x5e   : > { %9632 = vmatmul.mubr.f32.gmra.mrb[2].mxu1 %v7665_v39  ;;  %11147 = vmatpush3.bf16.msra.mxu0 %v11144_v35  ;;  %v13235_v39 = vld [vmem:[%s13058_s11 + $0x48] sm:$0xff]  ;;  %v13380_v29 = vld [vmem:[%s13058_s11 + $0xf2] sm:$0xff] }
  0x5f   : > { %11435 = vmatpush3.bf16.msra.mxu1 %v11144_v35  ;;  %9130 = vmatprep.mubr.f32.mxu0 %v260_v40  ;;  %v7444_v35 = vld [vmem:[%s14984_s1 + $0x130] sm:$0xff]  ;;  %v13238_v40 = vld [vmem:[%s13058_s11 + $0x108] sm:$0xff] }
  0x60   : > { %9634 = vmatprep.mubr.f32.mxu1 %v7666_v41  ;;  %11149 = vmatprep.subr.bf16.mxu0 %v11148_v42  ;;  %v11184_v41 = vpack.c.bf16 %v7445_v36, %v7444_v35  ;;  %v7476_v35 = vld [vmem:[%s14984_s1 + $0x1b0] sm:$0xff]  ;;  %v7477_v36 = vld [vmem:[%s14984_s1 + $0x1b8] sm:$0xff] }
  0x61   : > { %11437 = vmatprep.subr.bf16.mxu1 %v11148_v42  ;;  %9131 = vmatmul.mubr.f32.gmra.mrb[4].mxu0 %v261_v45  ;;  %v13252_v45 = vld [vmem:[%s13058_s11 + $0x110] sm:$0xff] }
  0x62   : > { %9635 = vmatmul.mubr.f32.gmra.mrb[4].mxu1 %v7667_v46  ;;  %11151 = vmatpush3.bf16.msra.mxu0 %v11148_v42  ;;  %v13257_v46 = vld [vmem:[%s13058_s11 + $0x60] sm:$0xff] }
  0x63   : > { %11439 = vmatpush3.bf16.msra.mxu1 %v11148_v42  ;;  %9133 = vmatprep.mubr.f32.mxu0 %v262_v47  ;;  %v7446_v42 = vld [vmem:[%s14984_s1 + $0x140] sm:$0xff] }
  0x64   : > { %9637 = vmatprep.mubr.f32.mxu1 %v7668_v48  ;;  %11153 = vmatprep.subr.bf16.mxu0 %v11152_v49  ;;  %v13260_v47 = vld [vmem:[%s13058_s11 + $0x120] sm:$0xff]  ;;  %v11188_v48 = vpack.c.bf16 %v7447_v43, %v7446_v42  ;;  %v13399_v43 = vld [vmem:[%s13058_s11 + $0x4a] sm:$0xff] }
  0x65   : > { %11441 = vmatprep.subr.bf16.mxu1 %v11152_v49  ;;  %9134 = vmatmul.mubr.f32.gmra.mrb[6].mxu0 %v263_v52  ;;  %v13274_v52 = vld [vmem:[%s13058_s11 + $0x128] sm:$0xff]  ;;  %v13394_v42 = vld [vmem:[%s13058_s11 + $0xfa] sm:$0xff] }
  0x66   : > { %9638 = vmatmul.mubr.f32.gmra.mrb[6].mxu1 %v7669_v53  ;;  %11155 = vmatpush3.bf16.msra.mxu0 %v11152_v49  ;;  %v13279_v53 = vld [vmem:[%s13058_s11 + $0x78] sm:$0xff] }
  0x67   : > { %11443 = vmatpush3.bf16.msra.mxu1 %v11152_v49  ;;  %9136 = vmatprep.mubr.f32.mxu0 %v264_v54  ;;  %v7448_v49 = vld [vmem:[%s14984_s1 + $0x150] sm:$0xff]  ;;  %v13282_v54 = vld [vmem:[%s13058_s11 + $0x138] sm:$0xff] }
  0x68   : > { %9640 = vmatprep.mubr.f32.mxu1 %v7670_v55  ;;  %11157 = vmatprep.subr.bf16.mxu0 %v11156_v56  ;;  %v11192_v55 = vpack.c.bf16 %v7449_v50, %v7448_v49  ;;  %v11216_v49 = vpack.c.bf16 %v7477_v36, %v7476_v35  ;;  %v7478_v50 = vld [vmem:[%s14984_s1 + $0x1c0] sm:$0xff]  ;;  %v7484_v35 = vld [vmem:[%s14984_s1 + $0x1f0] sm:$0xff]  ;;  %v7485_v36 = vld [vmem:[%s14984_s1 + $0x1f8] sm:$0xff] }
  0x69   : > { %11445 = vmatprep.subr.bf16.mxu1 %v11156_v56  ;;  %9137 = vmatmul.mubr.f32.gmra.mrb[8].mxu0 %v265_v59  ;;  %v13296_v59 = vld [vmem:[%s13058_s11 + $0x140] sm:$0xff] }
  0x6a   : > { %9641 = vmatmul.mubr.f32.gmra.mrb[8].mxu1 %v7671_v60  ;;  %11159 = vmatpush3.bf16.msra.mxu0 %v11156_v56  ;;  %v13301_v60 = vld [vmem:[%s13058_s11 + $0x90] sm:$0xff] }
  0x6b   : > { %11447 = vmatpush3.bf16.msra.mxu1 %v11156_v56  ;;  %9139 = vmatprep.mubr.f32.mxu0 %v266_v61  ;;  %v7450_v56 = vld [vmem:[%s14984_s1 + $0x160] sm:$0xff]  ;;  %v13304_v61 = vld [vmem:[%s13058_s11 + $0x150] sm:$0xff] }
  0x6c   : > { %9643 = vmatprep.mubr.f32.mxu1 %v7672_v62  ;;  %11161 = vmatprep.subr.bf16.mxu0 %v11160_v63  ;;  %v11196_v62 = vpack.c.bf16 %v7451_v57, %v7450_v56  ;;  %v13413_v56 = vld [vmem:[%s13058_s11 + $0x52] sm:$0xff] }
  0x6d   : > { %11449 = vmatprep.subr.bf16.mxu1 %v11160_v63  ;;  %9140 = vmatmul.mubr.f32.gmra.mrb[10].mxu0 %v267_v2  ;;  %v13318_v2 = vld [vmem:[%s13058_s11 + $0x158] sm:$0xff] }
  0x6e   : > { %9644 = vmatmul.mubr.f32.gmra.mrb[10].mxu1 %v7673_v3  ;;  %11163 = vmatpush3.bf16.msra.mxu0 %v11160_v63  ;;  %v13323_v3 = vld [vmem:[%s13058_s11 + $0xa8] sm:$0xff]  ;;  %v13416_v57 = vld [vmem:[%s13058_s11 + $0x112] sm:$0xff] }
  0x6f   : > { %11451 = vmatpush3.bf16.msra.mxu1 %v11160_v63  ;;  %9142 = vmatprep.mubr.f32.mxu0 %v268_v4  ;;  %v7452_v63 = vld [vmem:[%s14984_s1 + $0x170] sm:$0xff]  ;;  %v13326_v4 = vld [vmem:[%s13058_s11 + $0x168] sm:$0xff] }
  0x70   : > { %9646 = vmatprep.mubr.f32.mxu1 %v7674_v5  ;;  %11165 = vmatprep.subr.bf16.mxu0 %v11164_v6  ;;  %v11200_v5 = vpack.c.bf16 %v7453_v0, %v7452_v63  ;;  %v13424_v63 = vld [vmem:[%s13058_s11 + $0x122] sm:$0xff] }
  0x71   : > { %11453 = vmatprep.subr.bf16.mxu1 %v11164_v6  ;;  %9143 = vmatmul.mubr.f32.gmra.mrb[12].mxu0 %v269_v9  ;;  %v13340_v9 = vld [vmem:[%s13058_s11 + $0x170] sm:$0xff] }
  0x72   : > { %9647 = vmatmul.mubr.f32.gmra.mrb[12].mxu1 %v7675_v10  ;;  %11167 = vmatpush3.bf16.msra.mxu0 %v11164_v6  ;;  %v579_v10 = vld [vmem:[%s13058_s11 + $0x2] sm:$0xff] }
  0x73   : > { %11455 = vmatpush3.bf16.msra.mxu1 %v11164_v6  ;;  %9145 = vmatprep.mubr.f32.mxu0 %v270_v11  ;;  %v7470_v6 = vld [vmem:[%s14984_s1 + $0x180] sm:$0xff] }
  0x74   : > { %9649 = vmatprep.mubr.f32.mxu1 %v7676_v12  ;;  %11169 = vmatprep.subr.bf16.mxu0 %v11168_v13  ;;  %v7694_v11 = vld [vmem:[%s13058_s11 + $0xc2] sm:$0xff]  ;;  %v11204_v12 = vpack.c.bf16 %v7471_v7, %v7470_v6  ;;  %v7481_v6 = vld [vmem:[%s14984_s1 + $0x1d8] sm:$0xff]  ;;  %v13435_v7 = vld [vmem:[%s13058_s11 + $0x6a] sm:$0xff] }
  0x75   : > { %11457 = vmatprep.subr.bf16.mxu1 %v11168_v13  ;;  %9146 = vmatmul.mubr.f32.gmra.mrb[14].mxu0 %v271_v16  ;;  %v7695_v16 = vld [vmem:[%s13058_s11 + $0xca] sm:$0xff] }
  0x76   : > { %9650 = vmatmul.mubr.f32.gmra.mrb[14].mxu1 %v7677_v17  ;;  %11171 = vmatpush3.bf16.msra.mxu0 %v11168_v13  ;;  %v13357_v17 = vld [vmem:[%s13058_s11 + $0x1a] sm:$0xff] }
  0x77   : > { %11459 = vmatpush3.bf16.msra.mxu1 %v11168_v13  ;;  %9180 = vmatprep.mubr.f32.mxu0 %v224_v18  ;;  %v7472_v13 = vld [vmem:[%s14984_s1 + $0x190] sm:$0xff]  ;;  %v13360_v18 = vld [vmem:[%s13058_s11 + $0xda] sm:$0xff] }
  0x78   : > { %9684 = vmatprep.mubr.f32.mxu1 %v13178_v19  ;;  %11173 = vmatprep.subr.bf16.mxu0 %v11172_v20 }
  0x79   : > { %11461 = vmatprep.subr.bf16.mxu1 %v11172_v20  ;;  %9181 = vmatmul.mubr.f32.vlgmr.msra.gmra.mrb[0].mxu0 %v225_v23  ;;  %v13369_v23 = vld [vmem:[%s13058_s11 + $0x22] sm:$0xff] }
  0x7a   : > { %9685 = vmatmul.mubr.f32.vlgmr.msra.gmra.mrb[0].mxu1 %v13188_v24  ;;  %11175 = vmatpush3.bf16.msra.mxu0 %v11172_v20 }
  0x7b   : > { %11463 = vmatpush3.bf16.msra.mxu1 %v11172_v20  ;;  %9183 = vmatprep.mubr.f32.mxu0 %v13192_v25  ;;  %v11208_v20 = vpack.c.bf16 %v7473_v14, %v7472_v13  ;;  %v7482_v14 = vld [vmem:[%s14984_s1 + $0x1e0] sm:$0xff] }
  0x7c   : > { %9687 = vmatprep.mubr.f32.mxu1 %v13195_v26  ;;  %11177 = vmatprep.subr.bf16.mxu0 %v11176_v27 }
  0x7d   : > { %11465 = vmatprep.subr.bf16.mxu1 %v11176_v27  ;;  %9184 = vmatmul.mubr.f32.gmra.mrb[2].mxu0 %v13205_v30 }
  0x7e   : > { %9688 = vmatmul.mubr.f32.gmra.mrb[2].mxu1 %v13208_v31  ;;  %11179 = vmatpush3.bf16.msra.mxu0 %v11176_v27 }
  0x7f   : > { %11467 = vmatpush3.bf16.msra.mxu1 %v11176_v27  ;;  %9186 = vmatprep.mubr.f32.mxu0 %v13213_v32  ;;  %v13372_v27 = vld [vmem:[%s13058_s11 + $0xe2] sm:$0xff] }
  0x80   : > { %9690 = vmatprep.mubr.f32.mxu1 %v13216_v33  ;;  %11181 = vmatprep.subr.bf16.mxu0 %v11180_v34 }
  0x81   : > { %11469 = vmatprep.subr.bf16.mxu1 %v11180_v34  ;;  %9187 = vmatmul.mubr.f32.gmra.mrb[4].mxu0 %v13227_v37 }
  0x82   : > { %9691 = vmatmul.mubr.f32.gmra.mrb[4].mxu1 %v13230_v38  ;;  %11183 = vmatpush3.bf16.msra.mxu0 %v11180_v34 }
  0x83   : > { %11471 = vmatpush3.bf16.msra.mxu1 %v11180_v34  ;;  %9189 = vmatprep.mubr.f32.mxu0 %v13235_v39  ;;  %v11212_v34 = vpack.c.bf16 %v7475_v22, %v7474_v21  ;;  %v13465_v21 = vld [vmem:[%s13058_s11 + $0x92] sm:$0xff] }
  0x84   : > { %9693 = vmatprep.mubr.f32.mxu1 %v13238_v40  ;;  %11185 = vmatprep.subr.bf16.mxu0 %v11184_v41  ;;  %v13468_v22 = vld [vmem:[%s13058_s11 + $0x152] sm:$0xff] }
  0x85   : > { %11473 = vmatprep.subr.bf16.mxu1 %v11184_v41  ;;  %9190 = vmatmul.mubr.f32.gmra.mrb[6].mxu0 %v13249_v44 }
  0x86   : > { %9694 = vmatmul.mubr.f32.gmra.mrb[6].mxu1 %v13252_v45  ;;  %11187 = vmatpush3.bf16.msra.mxu0 %v11184_v41 }
  0x87   : > { %11475 = vmatpush3.bf16.msra.mxu1 %v11184_v41  ;;  %9192 = vmatprep.mubr.f32.mxu0 %v13257_v46  ;;  %v13391_v41 = vld [vmem:[%s13058_s11 + $0x3a] sm:$0xff] }
  0x88   : > { %9696 = vmatprep.mubr.f32.mxu1 %v13260_v47  ;;  %11189 = vmatprep.subr.bf16.mxu0 %v11188_v48 }
  0x89   : > { %11477 = vmatprep.subr.bf16.mxu1 %v11188_v48  ;;  %9193 = vmatmul.mubr.f32.gmra.mrb[8].mxu0 %v13271_v51 }
  0x8a   : > { %9697 = vmatmul.mubr.f32.gmra.mrb[8].mxu1 %v13274_v52  ;;  %11191 = vmatpush3.bf16.msra.mxu0 %v11188_v48 }
  0x8b   : > { %11479 = vmatpush3.bf16.msra.mxu1 %v11188_v48  ;;  %9195 = vmatprep.mubr.f32.mxu0 %v13279_v53  ;;  %v13402_v48 = vld [vmem:[%s13058_s11 + $0x10a] sm:$0xff] }
  0x8c   : > { %9699 = vmatprep.mubr.f32.mxu1 %v13282_v54  ;;  %11193 = vmatprep.subr.bf16.mxu0 %v11192_v55 }
  0x8d   : > { %11481 = vmatprep.subr.bf16.mxu1 %v11192_v55  ;;  %9196 = vmatmul.mubr.f32.gmra.mrb[10].mxu0 %v13293_v58 }
  0x8e   : > { %9700 = vmatmul.mubr.f32.gmra.mrb[10].mxu1 %v13296_v59  ;;  %11195 = vmatpush3.bf16.msra.mxu0 %v11192_v55 }
  0x8f   : > { %11483 = vmatpush3.bf16.msra.mxu1 %v11192_v55  ;;  %9198 = vmatprep.mubr.f32.mxu0 %v13301_v60  ;;  %v7479_v55 = vld [vmem:[%s14984_s1 + $0x1c8] sm:$0xff] }
  0x90   : > { %9702 = vmatprep.mubr.f32.mxu1 %v13304_v61  ;;  %11197 = vmatprep.subr.bf16.mxu0 %v11196_v62  ;;  %v11220_v0 = vpack.c.bf16 %v7479_v55, %v7478_v50  ;;  %v13482_v50 = vld [vmem:[%s13058_s11 + $0x15a] sm:$0xff]  ;;  %v13487_v55 = vld [vmem:[%s13058_s11 + $0xaa] sm:$0xff] }
  0x91   : > { %11485 = vmatprep.subr.bf16.mxu1 %v11196_v62  ;;  %9199 = vmatmul.mubr.f32.gmra.mrb[12].mxu0 %v13315_v1 }
  0x92   : > { %9703 = vmatmul.mubr.f32.gmra.mrb[12].mxu1 %v13318_v2  ;;  %11199 = vmatpush3.bf16.msra.mxu0 %v11196_v62 }
  0x93   : > { %11487 = vmatpush3.bf16.msra.mxu1 %v11196_v62  ;;  %9201 = vmatprep.mubr.f32.mxu0 %v13323_v3  ;;  %v13421_v62 = vld [vmem:[%s13058_s11 + $0x62] sm:$0xff] }
  0x94   : > { %9705 = vmatprep.mubr.f32.mxu1 %v13326_v4  ;;  %11201 = vmatprep.subr.bf16.mxu0 %v11200_v5 }
  0x95   : > { %11489 = vmatprep.subr.bf16.mxu1 %v11200_v5  ;;  %9202 = vmatmul.mubr.f32.gmra.mrb[14].mxu0 %v13337_v8 }
  0x96   : > { %9706 = vmatmul.mubr.f32.gmra.mrb[14].mxu1 %v13340_v9  ;;  %11203 = vmatpush3.bf16.msra.mxu0 %v11200_v5 }
  0x97   : > { %11491 = vmatpush3.bf16.msra.mxu1 %v11200_v5  ;;  %9236 = vmatprep.mubr.f32.mxu0 %v579_v10  ;;  %v7480_v5 = vld [vmem:[%s14984_s1 + $0x1d0] sm:$0xff] }
  0x98   : > { %9740 = vmatprep.mubr.f32.mxu1 %v7694_v11  ;;  %11205 = vmatprep.subr.bf16.mxu0 %v11204_v12  ;;  %v13438_v10 = vld [vmem:[%s13058_s11 + $0x12a] sm:$0xff]  ;;  %v13443_v11 = vld [vmem:[%s13058_s11 + $0x7a] sm:$0xff]  ;;  %v11224_v13 = vpack.c.bf16 %v7481_v6, %v7480_v5  ;;  %v11232_v5 = vpack.c.bf16 %v7485_v36, %v7484_v35 }
  0x99   : > { %11493 = vmatprep.subr.bf16.mxu1 %v11204_v12  ;;  %9237 = vmatmul.mubr.f32.vlgmr.msra.gmra.mrb[0].mxu0 %v580_v15  ;;  %v7483_v15 = vld [vmem:[%s14984_s1 + $0x1e8] sm:$0xff]  ;;  %v7502_v6 = vld [vmem:[%s14984_s1 + $0x200] sm:$0xff]  ;;  %v7504_v36 = vld [vmem:[%s14984_s1 + $0x210] sm:$0xff] }
  0x9a   : > { %9741 = vmatmul.mubr.f32.vlgmr.msra.gmra.mrb[0].mxu1 %v7695_v16  ;;  %11207 = vmatpush3.bf16.msra.mxu0 %v11204_v12  ;;  %v13457_v16 = vld [vmem:[%s13058_s11 + $0x82] sm:$0xff] }
  0x9b   : > { %11495 = vmatpush3.bf16.msra.mxu1 %v11204_v12  ;;  %9239 = vmatprep.mubr.f32.mxu0 %v13357_v17  ;;  %v13446_v12 = vld [vmem:[%s13058_s11 + $0x13a] sm:$0xff] }
  0x9c   : > { %9743 = vmatprep.mubr.f32.mxu1 %v13360_v18  ;;  %11209 = vmatprep.subr.bf16.mxu0 %v11208_v20 }
  0x9d   : > { %11497 = vmatprep.subr.bf16.mxu1 %v11208_v20  ;;  %9240 = vmatmul.mubr.f32.gmra.mrb[2].mxu0 %v13369_v23 }
  0x9e   : > { %9744 = vmatmul.mubr.f32.gmra.mrb[2].mxu1 %v13372_v27  ;;  %11211 = vmatpush3.bf16.msra.mxu0 %v11208_v20 }
  0x9f   : > { %11499 = vmatpush3.bf16.msra.mxu1 %v11208_v20  ;;  %9242 = vmatprep.mubr.f32.mxu0 %v13377_v28  ;;  %v13460_v20 = vld [vmem:[%s13058_s11 + $0x142] sm:$0xff] }
  0xa0   : > { %9746 = vmatprep.mubr.f32.mxu1 %v13380_v29  ;;  %11213 = vmatprep.subr.bf16.mxu0 %v11212_v34 }
  0xa1   : > { %11501 = vmatprep.subr.bf16.mxu1 %v11212_v34  ;;  %9243 = vmatmul.mubr.f32.gmra.mrb[4].mxu0 %v13391_v41 }
  0xa2   : > { %9747 = vmatmul.mubr.f32.gmra.mrb[4].mxu1 %v13394_v42  ;;  %11215 = vmatpush3.bf16.msra.mxu0 %v11212_v34 }
  0xa3   : > { %11503 = vmatpush3.bf16.msra.mxu1 %v11212_v34  ;;  %9245 = vmatprep.mubr.f32.mxu0 %v13399_v43  ;;  %v11228_v34 = vpack.c.bf16 %v7483_v15, %v7482_v14  ;;  %v13501_v14 = vld [vmem:[%s13058_s11 + $0xb2] sm:$0xff] }
  0xa4   : > { %9749 = vmatprep.mubr.f32.mxu1 %v13402_v48  ;;  %11217 = vmatprep.subr.bf16.mxu0 %v11216_v49  ;;  %v13504_v15 = vld [vmem:[%s13058_s11 + $0x172] sm:$0xff] }
  0xa5   : > { %11505 = vmatprep.subr.bf16.mxu1 %v11216_v49  ;;  %9246 = vmatmul.mubr.f32.gmra.mrb[6].mxu0 %v13413_v56  ;;  %14998 = vst [vmem:[#allocation9_spill] sm:$0xff] %v13504_v15 }
  0xa6   : > { %9750 = vmatmul.mubr.f32.gmra.mrb[6].mxu1 %v13416_v57  ;;  %11219 = vmatpush3.bf16.msra.mxu0 %v11216_v49 }
  0xa7   : > { %11507 = vmatpush3.bf16.msra.mxu1 %v11216_v49  ;;  %9248 = vmatprep.mubr.f32.mxu0 %v13421_v62  ;;  %v13479_v49 = vld [vmem:[%s13058_s11 + $0x9a] sm:$0xff] }
  0xa8   : > { %9752 = vmatprep.mubr.f32.mxu1 %v13424_v63  ;;  %11221 = vmatprep.subr.bf16.mxu0 %v11220_v0 }
  0xa9   : > { %11509 = vmatprep.subr.bf16.mxu1 %v11220_v0  ;;  %9249 = vmatmul.mubr.f32.gmra.mrb[8].mxu0 %v13435_v7 }
  0xaa   : > { %9753 = vmatmul.mubr.f32.gmra.mrb[8].mxu1 %v13438_v10  ;;  %11223 = vmatpush3.bf16.msra.mxu0 %v11220_v0 }
  0xab   : > { %11511 = vmatpush3.bf16.msra.mxu1 %v11220_v0  ;;  %9251 = vmatprep.mubr.f32.mxu0 %v13443_v11  ;;  %v13490_v0 = vld [vmem:[%s13058_s11 + $0x16a] sm:$0xff] }
  0xac   : > { %9755 = vmatprep.mubr.f32.mxu1 %v13446_v12  ;;  %11225 = vmatprep.subr.bf16.mxu0 %v11224_v13 }
  0xad   : > { %11513 = vmatprep.subr.bf16.mxu1 %v11224_v13  ;;  %9252 = vmatmul.mubr.f32.gmra.mrb[10].mxu0 %v13457_v16 }
  0xae   : > { %9756 = vmatmul.mubr.f32.gmra.mrb[10].mxu1 %v13460_v20  ;;  %11227 = vmatpush3.bf16.msra.mxu0 %v11224_v13 }
  0xaf   : > { %11515 = vmatpush3.bf16.msra.mxu1 %v11224_v13  ;;  %9254 = vmatprep.mubr.f32.mxu0 %v13465_v21  ;;  %v7503_v13 = vld [vmem:[%s14984_s1 + $0x208] sm:$0xff] }
  0xb0   : > { %9758 = vmatprep.mubr.f32.mxu1 %v13468_v22  ;;  %11229 = vmatprep.subr.bf16.mxu0 %v11228_v34  ;;  %v11236_v35 = vpack.c.bf16 %v7503_v13, %v7502_v6  ;;  %v7506_v13 = vld [vmem:[%s14984_s1 + $0x220] sm:$0xff] }
  0xb1   : > { %11517 = vmatprep.subr.bf16.mxu1 %v11228_v34  ;;  %9255 = vmatmul.mubr.f32.gmra.mrb[12].mxu0 %v13479_v49 }
  0xb2   : > { %9759 = vmatmul.mubr.f32.gmra.mrb[12].mxu1 %v13482_v50  ;;  %11231 = vmatpush3.bf16.msra.mxu0 %v11228_v34 }
  0xb3   : > { %11519 = vmatpush3.bf16.msra.mxu1 %v11228_v34  ;;  %9257 = vmatprep.mubr.f32.mxu0 %v13487_v55  ;;  %v7505_v34 = vld [vmem:[%s14984_s1 + $0x218] sm:$0xff] }
  0xb4   : > { %9761 = vmatprep.mubr.f32.mxu1 %v13490_v0  ;;  %11233 = vmatprep.subr.bf16.mxu0 %v11232_v5  ;;  %v11240_v6 = vpack.c.bf16 %v7505_v34, %v7504_v36  ;;  %v13622_v36 = vld [vmem:[%s13058_s11 + $0xf9] sm:$0xff]  ;;  %v13627_v34 = vld [vmem:[%s13058_s11 + $0x49] sm:$0xff] }
  0xb5   : > { %11521 = vmatprep.subr.bf16.mxu1 %v11232_v5  ;;  %9258 = vmatmul.mubr.f32.gmra.mrb[14].mxu0 %v13501_v14 }
  0xb6   : > { %9762 = vmatmul.mubr.f32.gmra.mrb[14].mxu1 %v13504_v15  ;;  %11235 = vmatpush3.bf16.msra.mxu0 %v11232_v5  ;;  %v7507_v15 = vld [vmem:[%s14984_s1 + $0x228] sm:$0xff] }
  0xb7   : > { %11523 = vmatpush3.bf16.msra.mxu1 %v11232_v5  ;;  %9292 = vmatprep.mubr.f32.mxu0 %v13192_v25  ;;  %v11244_v25 = vpack.c.bf16 %v7507_v15, %v7506_v13  ;;  %v7538_v5 = vld [vmem:[%s14984_s1 + $0x2a0] sm:$0xff]  ;;  %v7539_v15 = vld [vmem:[%s14984_s1 + $0x2a8] sm:$0xff] }
  0xb8   : > { %9796 = vmatprep.mubr.f32.mxu1 %v13195_v26  ;;  %11237 = vmatprep.subr.bf16.mxu0 %v11236_v35  ;;  %v7508_v26 = vld [vmem:[%s14984_s1 + $0x230] sm:$0xff]  ;;  %v11276_v13 = vpack.c.bf16 %v7539_v15, %v7538_v5 }
  0xb9   : > { %11525 = vmatprep.subr.bf16.mxu1 %v11236_v35  ;;  %9293 = vmatmul.mubr.f32.vlgmr.msra.gmra.mrb[0].mxu0 %v13205_v30  ;;  %v7509_v30 = vld [vmem:[%s14984_s1 + $0x238] sm:$0xff]  ;;  %v13718_v5 = vld [vmem:[%s13058_s11 + $0x169] sm:$0xff] }
  0xba   : > { %9797 = vmatmul.mubr.f32.vlgmr.msra.gmra.mrb[0].mxu1 %v13208_v31  ;;  %11239 = vmatpush3.bf16.msra.mxu0 %v11236_v35  ;;  %v11248_v31 = vpack.c.bf16 %v7509_v30, %v7508_v26  ;;  %v7541_v26 = vld [vmem:[%s14984_s1 + $0x2b8] sm:$0xff] }
  0xbb   : > { %11527 = vmatpush3.bf16.msra.mxu1 %v11236_v35  ;;  %9295 = vmatprep.mubr.f32.mxu0 %v13213_v32  ;;  %v7510_v32 = vld [vmem:[%s14984_s1 + $0x240] sm:$0xff]  ;;  %v13641_v30 = vld [vmem:[%s13058_s11 + $0x51] sm:$0xff] }
  0xbc   : > { %9799 = vmatprep.mubr.f32.mxu1 %v13216_v33  ;;  %11241 = vmatprep.subr.bf16.mxu0 %v11240_v6  ;;  %v7511_v33 = vld [vmem:[%s14984_s1 + $0x248] sm:$0xff]  ;;  %v13619_v35 = vld [vmem:[%s13058_s11 + $0x39] sm:$0xff] }
  0xbd   : > { %11529 = vmatprep.subr.bf16.mxu1 %v11240_v6  ;;  %9296 = vmatmul.mubr.f32.gmra.mrb[2].mxu0 %v13227_v37  ;;  %v11252_v37 = vpack.c.bf16 %v7511_v33, %v7510_v32  ;;  %v13649_v32 = vld [vmem:[%s13058_s11 + $0x61] sm:$0xff] }
  0xbe   : > { %9800 = vmatmul.mubr.f32.gmra.mrb[2].mxu1 %v13230_v38  ;;  %11243 = vmatpush3.bf16.msra.mxu0 %v11240_v6  ;;  %v7512_v38 = vld [vmem:[%s14984_s1 + $0x250] sm:$0xff]  ;;  %v13652_v33 = vld [vmem:[%s13058_s11 + $0x121] sm:$0xff] }
  0xbf   : > { %11531 = vmatpush3.bf16.msra.mxu1 %v11240_v6  ;;  %9298 = vmatprep.mubr.f32.mxu0 %v13235_v39  ;;  %v7513_v39 = vld [vmem:[%s14984_s1 + $0x258] sm:$0xff]  ;;  %v13630_v6 = vld [vmem:[%s13058_s11 + $0x109] sm:$0xff] }
  0xc0   : > { %9802 = vmatprep.mubr.f32.mxu1 %v13238_v40  ;;  %11245 = vmatprep.subr.bf16.mxu0 %v11244_v25  ;;  %v11256_v40 = vpack.c.bf16 %v7513_v39, %v7512_v38  ;;  %v7542_v38 = vld [vmem:[%s14984_s1 + $0x2c0] sm:$0xff]  ;;  %v7543_v39 = vld [vmem:[%s14984_s1 + $0x2c8] sm:$0xff] }
  0xc1   : > { %11533 = vmatprep.subr.bf16.mxu1 %v11244_v25  ;;  %9299 = vmatmul.mubr.f32.gmra.mrb[4].mxu0 %v13249_v44  ;;  %v7514_v44 = vld [vmem:[%s14984_s1 + $0x260] sm:$0xff] }
  0xc2   : > { %9803 = vmatmul.mubr.f32.gmra.mrb[4].mxu1 %v13252_v45  ;;  %11247 = vmatpush3.bf16.msra.mxu0 %v11244_v25  ;;  %v7515_v45 = vld [vmem:[%s14984_s1 + $0x268] sm:$0xff] }
  0xc3   : > { %11535 = vmatpush3.bf16.msra.mxu1 %v11244_v25  ;;  %9301 = vmatprep.mubr.f32.mxu0 %v13257_v46  ;;  %v11260_v46 = vpack.c.bf16 %v7515_v45, %v7514_v44  ;;  %v7540_v25 = vld [vmem:[%s14984_s1 + $0x2b0] sm:$0xff]  ;;  %v13671_v45 = vld [vmem:[%s13058_s11 + $0x79] sm:$0xff] }
  0xc4   : > { %9805 = vmatprep.mubr.f32.mxu1 %v13260_v47  ;;  %11249 = vmatprep.subr.bf16.mxu0 %v11248_v31  ;;  %v7516_v47 = vld [vmem:[%s14984_s1 + $0x270] sm:$0xff] }
  0xc5   : > { %11537 = vmatprep.subr.bf16.mxu1 %v11248_v31  ;;  %9302 = vmatmul.mubr.f32.gmra.mrb[6].mxu0 %v13271_v51  ;;  %v7517_v51 = vld [vmem:[%s14984_s1 + $0x278] sm:$0xff]  ;;  %v13666_v44 = vld [vmem:[%s13058_s11 + $0x129] sm:$0xff] }
  0xc6   : > { %9806 = vmatmul.mubr.f32.gmra.mrb[6].mxu1 %v13274_v52  ;;  %11251 = vmatpush3.bf16.msra.mxu0 %v11248_v31  ;;  %v13579_v52 = vld [vmem:[%s13058_s11 + $0x180] sm:$0xff] }
  0xc7   : > { %11539 = vmatpush3.bf16.msra.mxu1 %v11248_v31  ;;  %9304 = vmatprep.mubr.f32.mxu0 %v13279_v53  ;;  %v11264_v53 = vpack.c.bf16 %v7517_v51, %v7516_v47  ;;  %v13644_v31 = vld [vmem:[%s13058_s11 + $0x111] sm:$0xff]  ;;  %v11284_v47 = vpack.c.bf16 %v7543_v39, %v7542_v38  ;;  %v13737_v38 = vld [vmem:[%s13058_s11 + $0xc1] sm:$0xff] }
  0xc8   : > { %9808 = vmatprep.mubr.f32.mxu1 %v13282_v54  ;;  %11253 = vmatprep.subr.bf16.mxu0 %v11252_v37  ;;  %v7534_v54 = vld [vmem:[%s14984_s1 + $0x280] sm:$0xff]  ;;  %v7544_v51 = vld [vmem:[%s14984_s1 + $0x2d0] sm:$0xff] }
  0xc9   : > { %11541 = vmatprep.subr.bf16.mxu1 %v11252_v37  ;;  %9305 = vmatmul.mubr.f32.gmra.mrb[8].mxu0 %v13293_v58  ;;  %v7535_v58 = vld [vmem:[%s14984_s1 + $0x288] sm:$0xff] }
  0xca   : > { %9809 = vmatmul.mubr.f32.gmra.mrb[8].mxu1 %v13296_v59  ;;  %11255 = vmatpush3.bf16.msra.mxu0 %v11252_v37  ;;  %v13590_v59 = vld [vmem:[%s13058_s11 + $0x188] sm:$0xff] }
  0xcb   : > { %11543 = vmatpush3.bf16.msra.mxu1 %v11252_v37  ;;  %9307 = vmatprep.mubr.f32.mxu0 %v13301_v60  ;;  %v7486_v60 = vld [vmem:[%s13058_s11 + $0x19] sm:$0xff]  ;;  %v11280_v37 = vpack.c.bf16 %v7541_v26, %v7540_v25  ;;  %v13729_v26 = vld [vmem:[%s13058_s11 + $0xb1] sm:$0xff]  ;;  %v13740_v39 = vld [vmem:[%s13058_s11 + $0x181] sm:$0xff] }
  0xcc   : > { %9811 = vmatprep.mubr.f32.mxu1 %v13304_v61  ;;  %11257 = vmatprep.subr.bf16.mxu0 %v11256_v40  ;;  %v7758_v61 = vld [vmem:[%s13058_s11 + $0xd9] sm:$0xff] }
  0xcd   : > { %11545 = vmatprep.subr.bf16.mxu1 %v11256_v40  ;;  %9308 = vmatmul.mubr.f32.gmra.mrb[10].mxu0 %v13315_v1  ;;  %v11268_v1 = vpack.c.bf16 %v7535_v58, %v7534_v54  ;;  %v13685_v54 = vld [vmem:[%s13058_s11 + $0x81] sm:$0xff]  ;;  %v7549_v25 = vld [vmem:[%s14984_s1 + $0x2f8] sm:$0xff] }
  0xce   : > { %9812 = vmatmul.mubr.f32.gmra.mrb[10].mxu1 %v13318_v2  ;;  %11259 = vmatpush3.bf16.msra.mxu0 %v11256_v40  ;;  %v7536_v2 = vld [vmem:[%s14984_s1 + $0x290] sm:$0xff]  ;;  %v13688_v58 = vld [vmem:[%s13058_s11 + $0x141] sm:$0xff] }
  0xcf   : > { %11547 = vmatpush3.bf16.msra.mxu1 %v11256_v40  ;;  %9310 = vmatprep.mubr.f32.mxu0 %v13323_v3  ;;  %v7487_v3 = vld [vmem:[%s13058_s11 + $0x21] sm:$0xff]  ;;  %v13663_v40 = vld [vmem:[%s13058_s11 + $0x69] sm:$0xff] }
  0xd0   : > { %9814 = vmatprep.mubr.f32.mxu1 %v13326_v4  ;;  %11261 = vmatprep.subr.bf16.mxu0 %v11260_v46  ;;  %v7759_v4 = vld [vmem:[%s13058_s11 + $0xe1] sm:$0xff] }
  0xd1   : > { %11549 = vmatprep.subr.bf16.mxu1 %v11260_v46  ;;  %9311 = vmatmul.mubr.f32.gmra.mrb[12].mxu0 %v13337_v8  ;;  %v13610_v8 = vld [vmem:[%s13058_s11 + $0xf1] sm:$0xff] }
  0xd2   : > { %9815 = vmatmul.mubr.f32.gmra.mrb[12].mxu1 %v13340_v9  ;;  %11263 = vmatpush3.bf16.msra.mxu0 %v11260_v46 }
  0xd3   : > { %11551 = vmatpush3.bf16.msra.mxu1 %v11260_v46  ;;  %9313 = vmatprep.mubr.f32.mxu0 %v13178_v19  ;;  %v7537_v19 = vld [vmem:[%s14984_s1 + $0x298] sm:$0xff] }
  0xd4   : > { %9817 = vmatprep.mubr.f32.mxu1 %v13579_v52  ;;  %11265 = vmatprep.subr.bf16.mxu0 %v11264_v53  ;;  %v11272_v9 = vpack.c.bf16 %v7537_v19, %v7536_v2  ;;  %v13674_v46 = vld [vmem:[%s13058_s11 + $0x139] sm:$0xff]  ;;  %v7547_v19 = vld [vmem:[%s14984_s1 + $0x2e8] sm:$0xff] }
  0xd5   : > { %11553 = vmatprep.subr.bf16.mxu1 %v11264_v53  ;;  %9314 = vmatmul.mubr.f32.gmra.mrb[14].mxu0 %v13188_v24  ;;  %v13607_v24 = vld [vmem:[%s13058_s11 + $0x31] sm:$0xff]  ;;  %v7546_v2 = vld [vmem:[%s14984_s1 + $0x2e0] sm:$0xff] }
  0xd6   : > { %9818 = vmatmul.mubr.f32.gmra.mrb[14].mxu1 %v13590_v59  ;;  %11267 = vmatpush3.bf16.msra.mxu0 %v11264_v53  ;;  %v11292_v15 = vpack.c.bf16 %v7547_v19, %v7546_v2  ;;  %v13754_v2 = vld [vmem:[%s13058_s11 + $0x189] sm:$0xff] }
  0xd7   : > { %11555 = vmatpush3.bf16.msra.mxu1 %v11264_v53  ;;  %9348 = vmatprep.mubr.f32.mxu0 %v7486_v60  ;;  %v7545_v53 = vld [vmem:[%s14984_s1 + $0x2d8] sm:$0xff] }
  0xd8   : > { %9852 = vmatprep.mubr.f32.mxu1 %v7758_v61  ;;  %11269 = vmatprep.subr.bf16.mxu0 %v11268_v1  ;;  %v13693_v60 = vld [vmem:[%s13058_s11 + $0x91] sm:$0xff] }
  0xd9   : > { %11557 = vmatprep.subr.bf16.mxu1 %v11268_v1  ;;  %9349 = vmatmul.mubr.f32.vlgmr.msra.gmra.mrb[0].mxu0 %v7487_v3  ;;  %v13696_v61 = vld [vmem:[%s13058_s11 + $0x151] sm:$0xff]  ;;  %v13707_v3 = vld [vmem:[%s13058_s11 + $0x99] sm:$0xff] }
  0xda   : > { %9853 = vmatmul.mubr.f32.vlgmr.msra.gmra.mrb[0].mxu1 %v7759_v4  ;;  %11271 = vmatpush3.bf16.msra.mxu0 %v11268_v1  ;;  %v13710_v4 = vld [vmem:[%s13058_s11 + $0x159] sm:$0xff] }
  0xdb   : > { %11559 = vmatpush3.bf16.msra.mxu1 %v11268_v1  ;;  %9351 = vmatprep.mubr.f32.mxu0 %v13607_v24  ;;  %v11288_v1 = vpack.c.bf16 %v7545_v53, %v7544_v51  ;;  %v7566_v51 = vld [vmem:[%s14984_s1 + $0x300] sm:$0xff]  ;;  %v7567_v53 = vld [vmem:[%s14984_s1 + $0x308] sm:$0xff] }
  0xdc   : > { %9855 = vmatprep.mubr.f32.mxu1 %v13610_v8  ;;  %11273 = vmatprep.subr.bf16.mxu0 %v11272_v9  ;;  %v11300_v19 = vpack.c.bf16 %v7567_v53, %v7566_v51  ;;  %v7570_v51 = vld [vmem:[%s14984_s1 + $0x320] sm:$0xff]  ;;  %v7571_v53 = vld [vmem:[%s14984_s1 + $0x328] sm:$0xff] }
  0xdd   : > { %11561 = vmatprep.subr.bf16.mxu1 %v11272_v9  ;;  %9352 = vmatmul.mubr.f32.gmra.mrb[2].mxu0 %v13619_v35 }
  0xde   : > { %9856 = vmatmul.mubr.f32.gmra.mrb[2].mxu1 %v13622_v36  ;;  %11275 = vmatpush3.bf16.msra.mxu0 %v11272_v9 }
  0xdf   : > { %11563 = vmatpush3.bf16.msra.mxu1 %v11272_v9  ;;  %9354 = vmatprep.mubr.f32.mxu0 %v13627_v34  ;;  %v13715_v9 = vld [vmem:[%s13058_s11 + $0xa9] sm:$0xff] }
  0xe0   : > { %9858 = vmatprep.mubr.f32.mxu1 %v13630_v6  ;;  %11277 = vmatprep.subr.bf16.mxu0 %v11276_v13 }
  0xe1   : > { %11565 = vmatprep.subr.bf16.mxu1 %v11276_v13  ;;  %9355 = vmatmul.mubr.f32.gmra.mrb[4].mxu0 %v13641_v30 }
  0xe2   : > { %9859 = vmatmul.mubr.f32.gmra.mrb[4].mxu1 %v13644_v31  ;;  %11279 = vmatpush3.bf16.msra.mxu0 %v11276_v13 }
  0xe3   : > { %11567 = vmatpush3.bf16.msra.mxu1 %v11276_v13  ;;  %9357 = vmatprep.mubr.f32.mxu0 %v13649_v32  ;;  %v7548_v13 = vld [vmem:[%s14984_s1 + $0x2f0] sm:$0xff] }
  0xe4   : > { %9861 = vmatprep.mubr.f32.mxu1 %v13652_v33  ;;  %11281 = vmatprep.subr.bf16.mxu0 %v11280_v37 }
  0xe5   : > { %11569 = vmatprep.subr.bf16.mxu1 %v11280_v37  ;;  %9358 = vmatmul.mubr.f32.gmra.mrb[6].mxu0 %v13663_v40 }
  0xe6   : > { %9862 = vmatmul.mubr.f32.gmra.mrb[6].mxu1 %v13666_v44  ;;  %11283 = vmatpush3.bf16.msra.mxu0 %v11280_v37 }
  0xe7   : > { %11571 = vmatpush3.bf16.msra.mxu1 %v11280_v37  ;;  %9360 = vmatprep.mubr.f32.mxu0 %v13671_v45  ;;  %v13732_v37 = vld [vmem:[%s13058_s11 + $0x171] sm:$0xff] }
  0xe8   : > { %9864 = vmatprep.mubr.f32.mxu1 %v13674_v46  ;;  %11285 = vmatprep.subr.bf16.mxu0 %v11284_v47 }
  0xe9   : > { %11573 = vmatprep.subr.bf16.mxu1 %v11284_v47  ;;  %9361 = vmatmul.mubr.f32.gmra.mrb[8].mxu0 %v13685_v54 }
  0xea   : > { %9865 = vmatmul.mubr.f32.gmra.mrb[8].mxu1 %v13688_v58  ;;  %11287 = vmatpush3.bf16.msra.mxu0 %v11284_v47 }
  0xeb   : > { %11575 = vmatpush3.bf16.msra.mxu1 %v11284_v47  ;;  %9363 = vmatprep.mubr.f32.mxu0 %v13693_v60  ;;  %v11296_v47 = vpack.c.bf16 %v7549_v25, %v7548_v13  ;;  %v7568_v13 = vld [vmem:[%s14984_s1 + $0x310] sm:$0xff] }
  0xec   : > { %9867 = vmatprep.mubr.f32.mxu1 %v13696_v61  ;;  %11289 = vmatprep.subr.bf16.mxu0 %v11288_v1 }
  0xed   : > { %11577 = vmatprep.subr.bf16.mxu1 %v11288_v1  ;;  %9364 = vmatmul.mubr.f32.gmra.mrb[10].mxu0 %v13707_v3 }
  0xee   : > { %9868 = vmatmul.mubr.f32.gmra.mrb[10].mxu1 %v13710_v4  ;;  %11291 = vmatpush3.bf16.msra.mxu0 %v11288_v1 }
  0xef   : > { %11579 = vmatpush3.bf16.msra.mxu1 %v11288_v1  ;;  %9366 = vmatprep.mubr.f32.mxu0 %v13715_v9  ;;  %v13751_v1 = vld [vmem:[%s13058_s11 + $0xc9] sm:$0xff] }
  0xf0   : > { %9870 = vmatprep.mubr.f32.mxu1 %v13718_v5  ;;  %11293 = vmatprep.subr.bf16.mxu0 %v11292_v15 }
  0xf1   : > { %11581 = vmatprep.subr.bf16.mxu1 %v11292_v15  ;;  %9367 = vmatmul.mubr.f32.gmra.mrb[12].mxu0 %v13729_v26 }
  0xf2   : > { %9871 = vmatmul.mubr.f32.gmra.mrb[12].mxu1 %v13732_v37  ;;  %11295 = vmatpush3.bf16.msra.mxu0 %v11292_v15 }
  0xf3   : > { %11583 = vmatpush3.bf16.msra.mxu1 %v11292_v15  ;;  %9369 = vmatprep.mubr.f32.mxu0 %v13737_v38  ;;  %v7569_v15 = vld [vmem:[%s14984_s1 + $0x318] sm:$0xff] }
  0xf4   : > { %9873 = vmatprep.mubr.f32.mxu1 %v13740_v39  ;;  %11297 = vmatprep.subr.bf16.mxu0 %v11296_v47  ;;  %v11304_v25 = vpack.c.bf16 %v7569_v15, %v7568_v13  ;;  %v7823_v13 = vld [vmem:[%s13058_s11 + $0xf8] sm:$0xff]  ;;  %v7552_v15 = vld [vmem:[%s13058_s11 + $0x48] sm:$0xff] }
  0xf5   : > { %11585 = vmatprep.subr.bf16.mxu1 %v11296_v47  ;;  %9370 = vmatmul.mubr.f32.gmra.mrb[14].mxu0 %v13751_v1 }
  0xf6   : > { %9874 = vmatmul.mubr.f32.gmra.mrb[14].mxu1 %v13754_v2  ;;  %11299 = vmatpush3.bf16.msra.mxu0 %v11296_v47 }
  0xf7   : > { %11587 = vmatpush3.bf16.msra.mxu1 %v11296_v47  ;;  %9404 = vmatprep.mubr.f32.mxu0 %v13357_v17  ;;  %v11308_v17 = vpack.c.bf16 %v7571_v53, %v7570_v51  ;;  %v7601_v47 = vld [vmem:[%s14984_s1 + $0x398] sm:$0xff]  ;;  %v7602_v53 = vld [vmem:[%s14984_s1 + $0x3a0] sm:$0xff] }
  0xf8   : > { %9908 = vmatprep.mubr.f32.mxu1 %v13360_v18  ;;  %11301 = vmatprep.subr.bf16.mxu0 %v11300_v19  ;;  %v7572_v18 = vld [vmem:[%s14984_s1 + $0x330] sm:$0xff] }
  0xf9   : > { %11589 = vmatprep.subr.bf16.mxu1 %v11300_v19  ;;  %9405 = vmatmul.mubr.f32.vlgmr.msra.gmra.mrb[0].mxu0 %v13369_v23  ;;  %v7573_v23 = vld [vmem:[%s14984_s1 + $0x338] sm:$0xff] }
  0xfa   : > { %9909 = vmatmul.mubr.f32.vlgmr.msra.gmra.mrb[0].mxu1 %v13372_v27  ;;  %11303 = vmatpush3.bf16.msra.mxu0 %v11300_v19  ;;  %v11312_v27 = vpack.c.bf16 %v7573_v23, %v7572_v18  ;;  %v7553_v18 = vld [vmem:[%s13058_s11 + $0x50] sm:$0xff] }
  0xfb   : > { %11591 = vmatpush3.bf16.msra.mxu1 %v11300_v19  ;;  %9407 = vmatprep.mubr.f32.mxu0 %v13377_v28  ;;  %v7574_v28 = vld [vmem:[%s14984_s1 + $0x340] sm:$0xff]  ;;  %v7551_v19 = vld [vmem:[%s13058_s11 + $0x38] sm:$0xff]  ;;  %v7825_v23 = vld [vmem:[%s13058_s11 + $0x110] sm:$0xff] }
  0xfc   : > { %9911 = vmatprep.mubr.f32.mxu1 %v13380_v29  ;;  %11305 = vmatprep.subr.bf16.mxu0 %v11304_v25  ;;  %v7575_v29 = vld [vmem:[%s14984_s1 + $0x348] sm:$0xff] }
  0xfd   : > { %11593 = vmatprep.subr.bf16.mxu1 %v11304_v25  ;;  %9408 = vmatmul.mubr.f32.gmra.mrb[2].mxu0 %v13391_v41  ;;  %v11316_v41 = vpack.c.bf16 %v7575_v29, %v7574_v28  ;;  %v7826_v28 = vld [vmem:[%s13058_s11 + $0x120] sm:$0xff] }
  0xfe   : > { %9912 = vmatmul.mubr.f32.gmra.mrb[2].mxu1 %v13394_v42  ;;  %11307 = vmatpush3.bf16.msra.mxu0 %v11304_v25  ;;  %v7576_v42 = vld [vmem:[%s14984_s1 + $0x350] sm:$0xff] }
  0xff   : > { %11595 = vmatpush3.bf16.msra.mxu1 %v11304_v25  ;;  %9410 = vmatprep.mubr.f32.mxu0 %v13399_v43  ;;  %v7577_v43 = vld [vmem:[%s14984_s1 + $0x358] sm:$0xff]  ;;  %v7824_v25 = vld [vmem:[%s13058_s11 + $0x108] sm:$0xff] }
 0x100   : > { %9914 = vmatprep.mubr.f32.mxu1 %v13402_v48  ;;  %11309 = vmatprep.subr.bf16.mxu0 %v11308_v17  ;;  %v11320_v48 = vpack.c.bf16 %v7577_v43, %v7576_v42  ;;  %v7605_v42 = vld [vmem:[%s14984_s1 + $0x3b8] sm:$0xff]  ;;  %v7555_v43 = vld [vmem:[%s13058_s11 + $0x68] sm:$0xff] }
 0x101   : > { %11597 = vmatprep.subr.bf16.mxu1 %v11308_v17  ;;  %9411 = vmatmul.mubr.f32.gmra.mrb[4].mxu0 %v13413_v56  ;;  %v7578_v56 = vld [vmem:[%s14984_s1 + $0x360] sm:$0xff] }
 0x102   : > { %9915 = vmatmul.mubr.f32.gmra.mrb[4].mxu1 %v13416_v57  ;;  %11311 = vmatpush3.bf16.msra.mxu0 %v11308_v17  ;;  %v7579_v57 = vld [vmem:[%s14984_s1 + $0x368] sm:$0xff] }
 0x103   : > { %11599 = vmatpush3.bf16.msra.mxu1 %v11308_v17  ;;  %9413 = vmatprep.mubr.f32.mxu0 %v13421_v62  ;;  %v11324_v62 = vpack.c.bf16 %v7579_v57, %v7578_v56  ;;  %v7603_v17 = vld [vmem:[%s14984_s1 + $0x3a8] sm:$0xff]  ;;  %v7556_v56 = vld [vmem:[%s13058_s11 + $0x78] sm:$0xff] }
 0x104   : > { %9917 = vmatprep.mubr.f32.mxu1 %v13424_v63  ;;  %11313 = vmatprep.subr.bf16.mxu0 %v11312_v27  ;;  %v7580_v63 = vld [vmem:[%s14984_s1 + $0x370] sm:$0xff]  ;;  %v11340_v29 = vpack.c.bf16 %v7603_v17, %v7602_v53  ;;  %v7828_v57 = vld [vmem:[%s13058_s11 + $0x138] sm:$0xff] }
 0x105   : > { %11601 = vmatprep.subr.bf16.mxu1 %v11312_v27  ;;  %9414 = vmatmul.mubr.f32.gmra.mrb[6].mxu0 %v13435_v7  ;;  %v7581_v7 = vld [vmem:[%s14984_s1 + $0x378] sm:$0xff]  ;;  %v7561_v53 = vld [vmem:[%s13058_s11 + $0xb0] sm:$0xff] }
 0x106   : > { %9918 = vmatmul.mubr.f32.gmra.mrb[6].mxu1 %v13438_v10  ;;  %11315 = vmatpush3.bf16.msra.mxu0 %v11312_v27  ;;  %v13829_v10 = vld [vmem:[%s13058_s11 + $0xc2] sm:$0xff]  ;;  %v7833_v17 = vld [vmem:[%s13058_s11 + $0x170] sm:$0xff] }
 0x107   : > { %11603 = vmatpush3.bf16.msra.mxu1 %v11312_v27  ;;  %9416 = vmatprep.mubr.f32.mxu0 %v13443_v11  ;;  %v13832_v11 = vld [vmem:[%s13058_s11 + $0x182] sm:$0xff] }
 0x108   : > { %9920 = vmatprep.mubr.f32.mxu1 %v13446_v12  ;;  %11317 = vmatprep.subr.bf16.mxu0 %v11316_v41  ;;  %v11328_v12 = vpack.c.bf16 %v7581_v7, %v7580_v63  ;;  %v7554_v27 = vld [vmem:[%s13058_s11 + $0x60] sm:$0xff]  ;;  %v7607_v7 = vld [vmem:[%s14984_s1 + $0x3c8] sm:$0xff] }
 0x109   : > { %11605 = vmatprep.subr.bf16.mxu1 %v11316_v41  ;;  %9417 = vmatmul.mubr.f32.gmra.mrb[8].mxu0 %v13457_v16  ;;  %v14999_v16 = vld [vmem:[#allocation9_spill] sm:$0xff]  ;;  %v7606_v63 = vld [vmem:[%s14984_s1 + $0x3c0] sm:$0xff] }
 0x10a   : > { %9921 = vmatmul.mubr.f32.gmra.mrb[8].mxu1 %v13460_v20  ;;  %11319 = vmatpush3.bf16.msra.mxu0 %v11316_v41  ;;  %v7598_v20 = vld [vmem:[%s14984_s1 + $0x380] sm:$0xff] }
 0x10b   : > { %11607 = vmatpush3.bf16.msra.mxu1 %v11316_v41  ;;  %9419 = vmatprep.mubr.f32.mxu0 %v13465_v21  ;;  %v7599_v21 = vld [vmem:[%s14984_s1 + $0x388] sm:$0xff]  ;;  %v7604_v41 = vld [vmem:[%s14984_s1 + $0x3b0] sm:$0xff] }
 0x10c   : > { %9923 = vmatprep.mubr.f32.mxu1 %v13468_v22  ;;  %11321 = vmatprep.subr.bf16.mxu0 %v11320_v48  ;;  %v13843_v22 = vld [vmem:[%s13058_s11 + $0xca] sm:$0xff] }
 0x10d   : > { %11609 = vmatprep.subr.bf16.mxu1 %v11320_v48  ;;  %9420 = vmatmul.mubr.f32.gmra.mrb[10].mxu0 %v13479_v49  ;;  %v13846_v49 = vld [vmem:[%s13058_s11 + $0x18a] sm:$0xff] }
 0x10e   : > { %9924 = vmatmul.mubr.f32.gmra.mrb[10].mxu1 %v13482_v50  ;;  %11323 = vmatpush3.bf16.msra.mxu0 %v11320_v48  ;;  %v7550_v50 = vld [vmem:[%s13058_s11 + $0x30] sm:$0xff] }
 0x10f   : > { %11611 = vmatpush3.bf16.msra.mxu1 %v11320_v48  ;;  %9422 = vmatprep.mubr.f32.mxu0 %v13487_v55  ;;  %v7822_v55 = vld [vmem:[%s13058_s11 + $0xf0] sm:$0xff]  ;;  %v7827_v48 = vld [vmem:[%s13058_s11 + $0x128] sm:$0xff] }
 0x110   : > { %9926 = vmatprep.mubr.f32.mxu1 %v13490_v0  ;;  %11325 = vmatprep.subr.bf16.mxu0 %v11324_v62  ;;  %v11332_v0 = vpack.c.bf16 %v7599_v21, %v7598_v20  ;;  %v7558_v20 = vld [vmem:[%s13058_s11 + $0x90] sm:$0xff] }
 0x111   : > { %11613 = vmatprep.subr.bf16.mxu1 %v11324_v62  ;;  %9423 = vmatmul.mubr.f32.gmra.mrb[12].mxu0 %v13501_v14  ;;  %v7600_v14 = vld [vmem:[%s14984_s1 + $0x390] sm:$0xff] }
 0x112   : > { %9927 = vmatmul.mubr.f32.gmra.mrb[12].mxu1 %v14999_v16  ;;  %11327 = vmatpush3.bf16.msra.mxu0 %v11324_v62  ;;  %v11336_v51 = vpack.c.bf16 %v7601_v47, %v7600_v14  ;;  %v7829_v16 = vld [vmem:[%s13058_s11 + $0x140] sm:$0xff]  ;;  %v7830_v21 = vld [vmem:[%s13058_s11 + $0x150] sm:$0xff]  ;;  %v7559_v14 = vld [vmem:[%s13058_s11 + $0x98] sm:$0xff] }
 0x113   : > { %11615 = vmatpush3.bf16.msra.mxu1 %v11324_v62  ;;  %9425 = vmatprep.mubr.f32.mxu0 %v13829_v10  ;;  %v11344_v62 = vpack.c.bf16 %v7605_v42, %v7604_v41  ;;  %v7831_v47 = vld [vmem:[%s13058_s11 + $0x158] sm:$0xff] }
 0x114   : > { %9929 = vmatprep.mubr.f32.mxu1 %v13832_v11  ;;  %11329 = vmatprep.subr.bf16.mxu0 %v11328_v12  ;;  %v7564_v41 = vld [vmem:[%s13058_s11 + $0xd8] sm:$0xff] }
 0x115   : > { %11617 = vmatprep.subr.bf16.mxu1 %v11328_v12  ;;  %9426 = vmatmul.mubr.f32.gmra.mrb[14].mxu0 %v13843_v22  ;;  %v7836_v42 = vld [vmem:[%s13058_s11 + $0x198] sm:$0xff] }
 0x116   : > { %9930 = vmatmul.mubr.f32.gmra.mrb[14].mxu1 %v13846_v49  ;;  %11331 = vmatpush3.bf16.msra.mxu0 %v11328_v12 }
 0x117   : > { %11619 = vmatpush3.bf16.msra.mxu1 %v11328_v12  ;;  %9460 = vmatprep.mubr.f32.mxu0 %v7550_v50  ;;  %v7557_v12 = vld [vmem:[%s13058_s11 + $0x80] sm:$0xff]  ;;  %v11348_v50 = vpack.c.bf16 %v7607_v7, %v7606_v63  ;;  %v7633_v63 = vld [vmem:[%s14984_s1 + $0x418] sm:$0xff] }
 0x118   : > { %9964 = vmatprep.mubr.f32.mxu1 %v7822_v55  ;;  %11333 = vmatprep.subr.bf16.mxu0 %v11332_v0  ;;  %v7608_v55 = vld [vmem:[%s14984_s1 + $0x3d0] sm:$0xff] }
 0x119   : > { %11621 = vmatprep.subr.bf16.mxu1 %v11332_v0  ;;  %9461 = vmatmul.mubr.f32.vlgmr.msra.gmra.mrb[0].mxu0 %v7551_v19  ;;  %v7560_v19 = vld [vmem:[%s13058_s11 + $0xa8] sm:$0xff] }
 0x11a   : > { %9965 = vmatmul.mubr.f32.vlgmr.msra.gmra.mrb[0].mxu1 %v7823_v13  ;;  %11335 = vmatpush3.bf16.msra.mxu0 %v11332_v0  ;;  %v7832_v13 = vld [vmem:[%s13058_s11 + $0x168] sm:$0xff] }
 0x11b   : > { %11623 = vmatpush3.bf16.msra.mxu1 %v11332_v0  ;;  %9463 = vmatprep.mubr.f32.mxu0 %v7552_v15  ;;  %v7609_v0 = vld [vmem:[%s14984_s1 + $0x3d8] sm:$0xff] }
 0x11c   : > { %9967 = vmatprep.mubr.f32.mxu1 %v7824_v25  ;;  %11337 = vmatprep.subr.bf16.mxu0 %v11336_v51  ;;  %v11352_v15 = vpack.c.bf16 %v7609_v0, %v7608_v55  ;;  %v7610_v25 = vld [vmem:[%s14984_s1 + $0x3e0] sm:$0xff]  ;;  %v3829_v0 = vld [vmem:[#allocation3 + $0xa0] sm:$0xff] }
 0x11d   : > { %11625 = vmatprep.subr.bf16.mxu1 %v11336_v51  ;;  %9464 = vmatmul.mubr.f32.gmra.mrb[2].mxu0 %v7553_v18  ;;  %v7562_v18 = vld [vmem:[%s13058_s11 + $0xc0] sm:$0xff] }
 0x11e   : > { %9968 = vmatmul.mubr.f32.gmra.mrb[2].mxu1 %v7825_v23  ;;  %11339 = vmatpush3.bf16.msra.mxu0 %v11336_v51 }
 0x11f   : > { %11627 = vmatpush3.bf16.msra.mxu1 %v11336_v51  ;;  %9466 = vmatprep.mubr.f32.mxu0 %v7554_v27  ;;  %v7611_v51 = vld [vmem:[%s14984_s1 + $0x3e8] sm:$0xff]  ;;  %v7612_v27 = vld [vmem:[%s14984_s1 + $0x3f0] sm:$0xff] }
 0x120   : > { %9970 = vmatprep.mubr.f32.mxu1 %v7826_v28  ;;  %11341 = vmatprep.subr.bf16.mxu0 %v11340_v29  ;;  %v11356_v23 = vpack.c.bf16 %v7611_v51, %v7610_v25  ;;  %v7613_v28 = vld [vmem:[%s14984_s1 + $0x3f8] sm:$0xff]  ;;  %v3831_v51 = vld [vmem:[#allocation3 + $0xb0] sm:$0xff] }
 0x121   : > { %11629 = vmatprep.subr.bf16.mxu1 %v11340_v29  ;;  %9467 = vmatmul.mubr.f32.gmra.mrb[4].mxu0 %v7555_v43  ;;  %v11360_v43 = vpack.c.bf16 %v7613_v28, %v7612_v27  ;;  %v7892_v27 = vld [vmem:[%s13058_s11 + $0x13a] sm:$0xff] }
 0x122   : > { %9971 = vmatmul.mubr.f32.gmra.mrb[4].mxu1 %v7827_v48  ;;  %11343 = vmatpush3.bf16.msra.mxu0 %v11340_v29  ;;  %v7630_v48 = vld [vmem:[%s14984_s1 + $0x400] sm:$0xff] }
 0x123   : > { %11631 = vmatpush3.bf16.msra.mxu1 %v11340_v29  ;;  %9469 = vmatprep.mubr.f32.mxu0 %v7556_v56  ;;  %v7563_v29 = vld [vmem:[%s13058_s11 + $0xc8] sm:$0xff] }
 0x124   : > { %9973 = vmatprep.mubr.f32.mxu1 %v7828_v57  ;;  %11345 = vmatprep.subr.bf16.mxu0 %v11344_v62  ;;  %v7631_v56 = vld [vmem:[%s14984_s1 + $0x408] sm:$0xff]  ;;  %v7565_v57 = vld [vmem:[%s13058_s11 + $0xe0] sm:$0xff] }
 0x125   : > { %11633 = vmatprep.subr.bf16.mxu1 %v11344_v62  ;;  %9470 = vmatmul.mubr.f32.gmra.mrb[6].mxu0 %v7557_v12  ;;  %v7634_v12 = vld [vmem:[%s14984_s1 + $0x420] sm:$0xff] }
 0x126   : > { %9974 = vmatmul.mubr.f32.gmra.mrb[6].mxu1 %v7829_v16  ;;  %11347 = vmatpush3.bf16.msra.mxu0 %v11344_v62  ;;  %v7635_v16 = vld [vmem:[%s14984_s1 + $0x428] sm:$0xff] }
 0x127   : > { %11635 = vmatpush3.bf16.msra.mxu1 %v11344_v62  ;;  %9472 = vmatprep.mubr.f32.mxu0 %v7558_v20  ;;  %v11364_v62 = vpack.c.bf16 %v7631_v56, %v7630_v48  ;;  %v7887_v20 = vld [vmem:[%s13058_s11 + $0xfa] sm:$0xff]  ;;  %v7622_v48 = vld [vmem:[%s13058_s11 + $0x92] sm:$0xff] }
 0x128   : > { %9976 = vmatprep.mubr.f32.mxu1 %v7830_v21  ;;  %11349 = vmatprep.subr.bf16.mxu0 %v11348_v50  ;;  %v7616_v21 = vld [vmem:[%s13058_s11 + $0x4a] sm:$0xff]  ;;  %v7894_v56 = vld [vmem:[%s13058_s11 + $0x152] sm:$0xff] }
 0x129   : > { %11637 = vmatprep.subr.bf16.mxu1 %v11348_v50  ;;  %9473 = vmatmul.mubr.f32.gmra.mrb[8].mxu0 %v7559_v14  ;;  %v3830_v14 = vld [vmem:[#allocation3 + $0xa8] sm:$0xff] }
 0x12a   : > { %9977 = vmatmul.mubr.f32.gmra.mrb[8].mxu1 %v7831_v47  ;;  %11351 = vmatpush3.bf16.msra.mxu0 %v11348_v50  ;;  %v7617_v47 = vld [vmem:[%s13058_s11 + $0x52] sm:$0xff]  ;;  %v11692_v25 = vpack.c.bf16 %v3830_v14, %v3829_v0  ;;  %v3806_v0 = vld [vmem:[#allocation3 + $0x70] sm:$0xff]  ;;  %v3807_v14 = vld [vmem:[#allocation3 + $0x78] sm:$0xff] }
 0x12b   : > { %11639 = vmatpush3.bf16.msra.mxu1 %v11348_v50  ;;  %9475 = vmatprep.mubr.f32.mxu0 %v7560_v19  ;;  %v7888_v50 = vld [vmem:[%s13058_s11 + $0x10a] sm:$0xff]  ;;  %v7889_v19 = vld [vmem:[%s13058_s11 + $0x112] sm:$0xff] }
 0x12c   : > { %9979 = vmatprep.mubr.f32.mxu1 %v7832_v13  ;;  %11353 = vmatprep.subr.bf16.mxu0 %v11352_v15  ;;  %v7618_v13 = vld [vmem:[%s13058_s11 + $0x62] sm:$0xff] }
 0x12d   : > { %11641 = vmatprep.subr.bf16.mxu1 %v11352_v15  ;;  %9476 = vmatmul.mubr.f32.gmra.mrb[10].mxu0 %v7561_v53  ;;  %v3832_v53 = vld [vmem:[#allocation3 + $0xb8] sm:$0xff] }
 0x12e   : > { %9980 = vmatmul.mubr.f32.gmra.mrb[10].mxu1 %v7833_v17  ;;  %11355 = vmatpush3.bf16.msra.mxu0 %v11352_v15  ;;  %v7619_v17 = vld [vmem:[%s13058_s11 + $0x6a] sm:$0xff]  ;;  %v11696_v28 = vpack.c.bf16 %v3832_v53, %v3831_v51 }
 0x12f   : > { %11643 = vmatpush3.bf16.msra.mxu1 %v11352_v15  ;;  %9478 = vmatprep.mubr.f32.mxu0 %v7562_v18  ;;  %v7890_v15 = vld [vmem:[%s13058_s11 + $0x122] sm:$0xff]  ;;  %v7891_v18 = vld [vmem:[%s13058_s11 + $0x12a] sm:$0xff] }
 0x130   : > { %9982 = vmatprep.mubr.f32.mxu1 %v13579_v52  ;;  %11357 = vmatprep.subr.bf16.mxu0 %v11356_v23  ;;  %v7837_v52 = vld [vmem:[%s13058_s11 + $0x1a0] sm:$0xff] }
 0x131   : > { %11645 = vmatprep.subr.bf16.mxu1 %v11356_v23  ;;  %9479 = vmatmul.mubr.f32.gmra.mrb[12].mxu0 %v7563_v29  ;;  %v3833_v29 = vld [vmem:[#allocation3 + $0xc0] sm:$0xff] }
 0x132   : > { %9983 = vmatmul.mubr.f32.gmra.mrb[12].mxu1 %v13590_v59  ;;  %11359 = vmatpush3.bf16.msra.mxu0 %v11356_v23  ;;  %v7632_v59 = vld [vmem:[%s14984_s1 + $0x410] sm:$0xff] }
 0x133   : > { %11647 = vmatpush3.bf16.msra.mxu1 %v11356_v23  ;;  %9481 = vmatprep.mubr.f32.mxu0 %v7564_v41  ;;  %v11368_v7 = vpack.c.bf16 %v7633_v63, %v7632_v59  ;;  %v7620_v23 = vld [vmem:[%s13058_s11 + $0x7a] sm:$0xff] }
 0x134   : > { %9985 = vmatprep.mubr.f32.mxu1 %v7836_v42  ;;  %11361 = vmatprep.subr.bf16.mxu0 %v11360_v43  ;;  %v3834_v41 = vld [vmem:[#allocation3 + $0xc8] sm:$0xff]  ;;  %v7621_v42 = vld [vmem:[%s13058_s11 + $0x82] sm:$0xff] }
 0x135   : > { %11649 = vmatprep.subr.bf16.mxu1 %v11360_v43  ;;  %9482 = vmatmul.mubr.f32.gmra.mrb[14].mxu0 %v7565_v57  ;;  %v11700_v57 = vpack.c.bf16 %v3834_v41, %v3833_v29  ;;  %v7623_v59 = vld [vmem:[%s13058_s11 + $0x9a] sm:$0xff] }
 0x136   : > { %9986 = vmatmul.mubr.f32.gmra.mrb[14].mxu1 %v7837_v52  ;;  %11363 = vmatpush3.bf16.msra.mxu0 %v11360_v43  ;;  %v3835_v52 = vld [vmem:[#allocation3 + $0xd0] sm:$0xff] }
 0x137   : > { %11651 = vmatpush3.bf16.msra.mxu1 %v11360_v43  ;;  %9516 = vmatprep.mubr.f32.mxu0 %v13607_v24  ;;  %v11372_v24 = vpack.c.bf16 %v7635_v16, %v7634_v12  ;;  %v7893_v43 = vld [vmem:[%s13058_s11 + $0x142] sm:$0xff]  ;;  %v7895_v63 = vld [vmem:[%s13058_s11 + $0x15a] sm:$0xff]  ;;  %v7896_v12 = vld [vmem:[%s13058_s11 + $0x16a] sm:$0xff] }
 0x138   : > { %10020 = vmatprep.mubr.f32.mxu1 %v13610_v8  ;;  %11365 = vmatprep.subr.bf16.mxu0 %v11364_v62  ;;  %v7636_v8 = vld [vmem:[%s14984_s1 + $0x430] sm:$0xff] }
 0x139   : > { %11653 = vmatprep.subr.bf16.mxu1 %v11364_v62  ;;  %9517 = vmatmul.mubr.f32.vlgmr.msra.gmra.mrb[0].mxu0 %v13619_v35  ;;  %v7637_v35 = vld [vmem:[%s14984_s1 + $0x438] sm:$0xff] }
 0x13a   : > { %10021 = vmatmul.mubr.f32.vlgmr.msra.gmra.mrb[0].mxu1 %v13622_v36  ;;  %11367 = vmatpush3.bf16.msra.mxu0 %v11364_v62  ;;  %v11376_v36 = vpack.c.bf16 %v7637_v35, %v7636_v8  ;;  %v7897_v8 = vld [vmem:[%s13058_s11 + $0x172] sm:$0xff]  ;;  %v7628_v35 = vld [vmem:[%s13058_s11 + $0xda] sm:$0xff] }
 0x13b   : > { %11655 = vmatpush3.bf16.msra.mxu1 %v11364_v62  ;;  %9519 = vmatprep.mubr.f32.mxu0 %v13627_v34  ;;  %v7638_v34 = vld [vmem:[%s14984_s1 + $0x440] sm:$0xff]  ;;  %v3836_v62 = vld [vmem:[#allocation3 + $0xd8] sm:$0xff] }
 0x13c   : > { %10023 = vmatprep.mubr.f32.mxu1 %v13630_v6  ;;  %11369 = vmatprep.subr.bf16.mxu0 %v11368_v7  ;;  %v7639_v6 = vld [vmem:[%s14984_s1 + $0x448] sm:$0xff]  ;;  %v11704_v16 = vpack.c.bf16 %v3836_v62, %v3835_v52 }
 0x13d   : > { %11657 = vmatprep.subr.bf16.mxu1 %v11368_v7  ;;  %9520 = vmatmul.mubr.f32.gmra.mrb[2].mxu0 %v13641_v30  ;;  %v11380_v30 = vpack.c.bf16 %v7639_v6, %v7638_v34  ;;  %v7629_v34 = vld [vmem:[%s13058_s11 + $0xe2] sm:$0xff] }
 0x13e   : > { %10024 = vmatmul.mubr.f32.gmra.mrb[2].mxu1 %v13644_v31  ;;  %11371 = vmatpush3.bf16.msra.mxu0 %v11368_v7  ;;  %v7640_v31 = vld [vmem:[%s14984_s1 + $0x450] sm:$0xff]  ;;  %v7901_v6 = vld [vmem:[%s13058_s11 + $0x1a2] sm:$0xff] }
 0x13f   : > { %11659 = vmatpush3.bf16.msra.mxu1 %v11368_v7  ;;  %9522 = vmatprep.mubr.f32.mxu0 %v13649_v32  ;;  %v7641_v32 = vld [vmem:[%s14984_s1 + $0x458] sm:$0xff]  ;;  %v7624_v7 = vld [vmem:[%s13058_s11 + $0xaa] sm:$0xff] }
 0x140   : > { %10026 = vmatprep.mubr.f32.mxu1 %v13652_v33  ;;  %11373 = vmatprep.subr.bf16.mxu0 %v11372_v24  ;;  %v11384_v33 = vpack.c.bf16 %v7641_v32, %v7640_v31  ;;  %v3838_v31 = vld [vmem:[#allocation3 + $0xe8] sm:$0xff] }
 0x141   : > { %11661 = vmatprep.subr.bf16.mxu1 %v11372_v24  ;;  %9523 = vmatmul.mubr.f32.gmra.mrb[4].mxu0 %v13663_v40  ;;  %v7642_v40 = vld [vmem:[%s14984_s1 + $0x460] sm:$0xff] }
 0x142   : > { %10027 = vmatmul.mubr.f32.gmra.mrb[4].mxu1 %v13666_v44  ;;  %11375 = vmatpush3.bf16.msra.mxu0 %v11372_v24  ;;  %v7643_v44 = vld [vmem:[%s14984_s1 + $0x468] sm:$0xff] }
 0x143   : > { %11663 = vmatpush3.bf16.msra.mxu1 %v11372_v24  ;;  %9525 = vmatprep.mubr.f32.mxu0 %v13671_v45  ;;  %v11388_v45 = vpack.c.bf16 %v7643_v44, %v7642_v40  ;;  %v7625_v24 = vld [vmem:[%s13058_s11 + $0xb2] sm:$0xff] }
 0x144   : > { %10029 = vmatprep.mubr.f32.mxu1 %v13674_v46  ;;  %11377 = vmatprep.subr.bf16.mxu0 %v11376_v36  ;;  %v7644_v46 = vld [vmem:[%s14984_s1 + $0x470] sm:$0xff]  ;;  %v3793_v40 = vld [vmem:[#allocation3 + $0x8] sm:$0xff] }
 0x145   : > { %11665 = vmatprep.subr.bf16.mxu1 %v11376_v36  ;;  %9526 = vmatmul.mubr.f32.gmra.mrb[6].mxu0 %v13685_v54  ;;  %v7645_v54 = vld [vmem:[%s14984_s1 + $0x478] sm:$0xff] }
 0x146   : > { %10030 = vmatmul.mubr.f32.gmra.mrb[6].mxu1 %v13688_v58  ;;  %11379 = vmatpush3.bf16.msra.mxu0 %v11376_v36  ;;  %v7596_v58 = vld [vmem:[%s13058_s11 + $0xd9] sm:$0xff] }
 0x147   : > { %11667 = vmatpush3.bf16.msra.mxu1 %v11376_v36  ;;  %9528 = vmatprep.mubr.f32.mxu0 %v13693_v60  ;;  %v7868_v60 = vld [vmem:[%s13058_s11 + $0x199] sm:$0xff] }
 0x148   : > { %10032 = vmatprep.mubr.f32.mxu1 %v13696_v61  ;;  %11381 = vmatprep.subr.bf16.mxu0 %v11380_v30  ;;  %v11392_v61 = vpack.c.bf16 %v7645_v54, %v7644_v46  ;;  %v7900_v36 = vld [vmem:[%s13058_s11 + $0x19a] sm:$0xff] }
 0x149   : > { %11669 = vmatprep.subr.bf16.mxu1 %v11380_v30  ;;  %9529 = vmatmul.mubr.f32.gmra.mrb[8].mxu0 %v13707_v3  ;;  %v3825_v3 = vld [vmem:[#allocation3 + $0x80] sm:$0xff]  ;;  %v3794_v54 = vld [vmem:[#allocation3 + $0x10] sm:$0xff] }
 0x14a   : > { %10033 = vmatmul.mubr.f32.gmra.mrb[8].mxu1 %v13710_v4  ;;  %11383 = vmatpush3.bf16.msra.mxu0 %v11380_v30  ;;  %v3826_v4 = vld [vmem:[#allocation3 + $0x88] sm:$0xff] }
 0x14b   : > { %11671 = vmatpush3.bf16.msra.mxu1 %v11380_v30  ;;  %9531 = vmatprep.mubr.f32.mxu0 %v13715_v9  ;;  %v7597_v9 = vld [vmem:[%s13058_s11 + $0xe1] sm:$0xff]  ;;  %v3837_v30 = vld [vmem:[#allocation3 + $0xe0] sm:$0xff] }
 0x14c   : > { %10035 = vmatprep.mubr.f32.mxu1 %v13718_v5  ;;  %11385 = vmatprep.subr.bf16.mxu0 %v11384_v33  ;;  %v7869_v5 = vld [vmem:[%s13058_s11 + $0x1a1] sm:$0xff]  ;;  %v11708_v32 = vpack.c.bf16 %v3838_v31, %v3837_v30 }
 0x14d   : > { %11673 = vmatprep.subr.bf16.mxu1 %v11384_v33  ;;  %9532 = vmatmul.mubr.f32.gmra.mrb[10].mxu0 %v13729_v26  ;;  %v7614_v26 = vld [vmem:[%s13058_s11 + $0x32] sm:$0xff] }
 0x14e   : > { %10036 = vmatmul.mubr.f32.gmra.mrb[10].mxu1 %v13732_v37  ;;  %11387 = vmatpush3.bf16.msra.mxu0 %v11384_v33  ;;  %v7886_v37 = vld [vmem:[%s13058_s11 + $0xf2] sm:$0xff] }
 0x14f   : > { %11675 = vmatpush3.bf16.msra.mxu1 %v11384_v33  ;;  %9534 = vmatprep.mubr.f32.mxu0 %v13737_v38  ;;  %v11684_v38 = vpack.c.bf16 %v3826_v4, %v3825_v3  ;;  %v3792_v33 = vld [vmem:[#allocation3] sm:$0xff]  ;;  %v3797_v3 = vld [vmem:[#allocation3 + $0x28] sm:$0xff] }
 0x150   : > { %10038 = vmatprep.mubr.f32.mxu1 %v13740_v39  ;;  %11389 = vmatprep.subr.bf16.mxu0 %v11388_v45  ;;  %v3827_v39 = vld [vmem:[#allocation3 + $0x90] sm:$0xff] }
 0x151   : > { %11677 = vmatprep.subr.bf16.mxu1 %v11388_v45  ;;  %9535 = vmatmul.mubr.f32.gmra.mrb[12].mxu0 %v13751_v1  ;;  %v3828_v1 = vld [vmem:[#allocation3 + $0x98] sm:$0xff] }
 0x152   : > { %10039 = vmatmul.mubr.f32.gmra.mrb[12].mxu1 %v13754_v2  ;;  %11391 = vmatpush3.bf16.msra.mxu0 %v11388_v45  ;;  %v7615_v2 = vld [vmem:[%s13058_s11 + $0x3a] sm:$0xff]  ;;  %v11688_v55 = vpack.c.bf16 %v3828_v1, %v3827_v39  ;;  %s176_s11 = sand.u32 1, %s12915_s13  }
 0x153   : > { %11679 = vmatpush3.bf16.msra.mxu1 %v11388_v45  ;;  %9537 = vmatprep.mubr.f32.mxu0 %v7596_v58  ;;  %v14076_v45 = vpack.c.bf16 %v3793_v40, %v3792_v33  ;;  %v3795_v58 = vld [vmem:[#allocation3 + $0x18] sm:$0xff]  ;;  %v3802_v1 = vld [vmem:[#allocation3 + $0x50] sm:$0xff]  ;;  %s7420_s20 = sshll.u32 %s176_s11, 8  ;;  %s14942_s16 = scalar_lea.sflag [#allocation5], %s176_s11 }
 0x154   : > { %10041 = vmatprep.mubr.f32.mxu1 %v7868_v60  ;;  %11393 = vmatprep.subr.bf16.mxu0 %v11392_v61  ;;  %v14081_v60 = vpack.c.bf16 %v3795_v58, %v3794_v54  ;;  %s14897_s28 = scalar_lea.vmem [#allocation6], %s7420_s20 }
 0x155   : > { %11681 = vmatprep.subr.bf16.mxu1 %v11392_v61  ;;  %9538 = vmatmul.mubr.f32.gmra.mrb[14].mxu0 %v7597_v9  ;;  %v3798_v9 = vld [vmem:[#allocation3 + $0x30] sm:$0xff]  ;;  %s7340_s24 = sshll.u32 %s14897_s28, 4  ;;  %s14936_s24 = int_to_ptr.vmem [resolvable:$true] %s7340_s24 }
 0x156   : > { %10042 = vmatmul.mubr.f32.gmra.mrb[14].mxu1 %v7869_v5  ;;  %11395 = vmatpush3.bf16.msra.mxu0 %v11392_v61  ;;  %v3799_v5 = vld [vmem:[#allocation3 + $0x38] sm:$0xff]  ;;  %s12857_s5 = scalar_lea.vmem %s14936_s24, 4096  ;;  %p12864_p2 = scmp.lt.s32.totalorder %s14936_s24, %s12862_s7 }
 0x157   : > { %11683 = vmatpush3.bf16.msra.mxu1 %v11392_v61  ;;  %9572 = vmatprep.mubr.f32.mxu0 %v7614_v26  ;;  %v3796_v61 = vld [vmem:[#allocation3 + $0x20] sm:$0xff]  ;;  %v14089_v26 = vpack.c.bf16 %v3799_v5, %v3798_v9  ;;  %p12858_p6 = scmp.ne.s32.totalorder %s14936_s24, %s12857_s5  ;;  %p12865_p3 = scmp.lt.s32.totalorder %s12863_s8, %s12857_s5 }
 0x158   : > { %10076 = vmatprep.mubr.f32.mxu1 %v7886_v37  ;;  %11685 = vmatprep.subr.bf16.mxu0 %v11684_v38  ;;  %v14085_v4 = vpack.c.bf16 %v3797_v3, %v3796_v61  ;;  %v3800_v37 = vld [vmem:[#allocation3 + $0x40] sm:$0xff] }
 0x159   : > { %11973 = vmatprep.subr.bf16.mxu1 %v11684_v38  ;;  %9573 = vmatmul.mubr.f32.vlgmr.msra.gmra.mrb[0].mxu0 %v7615_v2  ;;  %v3803_v2 = vld [vmem:[#allocation3 + $0x58] sm:$0xff]  ;;  %p12859_p10 = pnand %p12858_p6, %p15000_p9  ;;  %p12866_p4 = por %p12865_p3, %p12864_p2 }
 0x15a   : > { %10077 = vmatmul.mubr.f32.vlgmr.msra.gmra.mrb[0].mxu1 %v7887_v20  ;;  %9575 = vmatprep.mubr.f32.mxu0 %v7616_v21  ;;  %v14097_v20 = vpack.c.bf16 %v3803_v2, %v3802_v1  ;;  %v3804_v21 = vld [vmem:[#allocation3 + $0x60] sm:$0xff] }
 0x15b   : > { %10079 = vmatprep.mubr.f32.mxu1 %v7888_v50  ;;  %11687 = vmatpush3.bf16.msra.mxu0 %v11684_v38  ;;  %v3805_v50 = vld [vmem:[#allocation3 + $0x68] sm:$0xff]  ;;  %p12860_p12 = pneg %p12859_p10 }
 0x15c   : > { %11975 = vmatpush3.bf16.msra.mxu1 %v11684_v38  ;;  %11689 = vmatprep.subr.bf16.mxu0 %v11688_v55  ;;  %v3801_v38 = vld [vmem:[#allocation3 + $0x48] sm:$0xff] }
 0x15d   : > { %11977 = vmatprep.subr.bf16.mxu1 %v11688_v55  ;;  %9576 = vmatmul.mubr.f32.gmra.mrb[2].mxu0 %v7617_v47  ;;  %v14093_v39 = vpack.c.bf16 %v3801_v38, %v3800_v37  ;;  %v14105_v47 = vpack.c.bf16 %v3807_v14, %v3806_v0  ;;  %p12867_p7 = pnand %p12866_p4, %p12860_p12 }
 0x15e   : > { %10080 = vmatmul.mubr.f32.gmra.mrb[2].mxu1 %v7889_v19  ;;  %9578 = vmatprep.mubr.f32.mxu0 %v7618_v13  ;;  %v4148_v19 = vld [vmem:[#allocation3 + $0x100] sm:$0xff]  ;;  %v4149_v13 = vld [vmem:[#allocation3 + $0x108] sm:$0xff] }
 0x15f   : > { %10082 = vmatprep.mubr.f32.mxu1 %v7890_v15  ;;  %11691 = vmatpush3.bf16.msra.mxu0 %v11688_v55  ;;  %v14109_v15 = vpack.c.bf16 %v4149_v13, %v4148_v19 }
 0x160   : > { %11979 = vmatpush3.bf16.msra.mxu1 %v11688_v55  ;;  %11693 = vmatprep.subr.bf16.mxu0 %v11692_v25  ;;  %v14101_v55 = vpack.c.bf16 %v3805_v50, %v3804_v21 }
 0x161   : > { %11981 = vmatprep.subr.bf16.mxu1 %v11692_v25  ;;  %9579 = vmatmul.mubr.f32.gmra.mrb[4].mxu0 %v7619_v17 }
 0x162   : > { %10083 = vmatmul.mubr.f32.gmra.mrb[4].mxu1 %v7891_v18  ;;  %9581 = vmatprep.mubr.f32.mxu0 %v7620_v23 }
 0x163   : > { %10085 = vmatprep.mubr.f32.mxu1 %v7892_v27  ;;  %11695 = vmatpush3.bf16.msra.mxu0 %v11692_v25 }
 0x164   : > { %11983 = vmatpush3.bf16.msra.mxu1 %v11692_v25  ;;  %11697 = vmatprep.subr.bf16.mxu0 %v11696_v28 }
 0x165   : > { %11985 = vmatprep.subr.bf16.mxu1 %v11696_v28  ;;  %9582 = vmatmul.mubr.f32.gmra.mrb[6].mxu0 %v7621_v42 }
 0x166   : > { %10086 = vmatmul.mubr.f32.gmra.mrb[6].mxu1 %v7893_v43  ;;  %9584 = vmatprep.mubr.f32.mxu0 %v7622_v48 }
 0x167   : > { %10088 = vmatprep.mubr.f32.mxu1 %v7894_v56  ;;  %11699 = vmatpush3.bf16.msra.mxu0 %v11696_v28 }
 0x168   : > { %11987 = vmatpush3.bf16.msra.mxu1 %v11696_v28  ;;  %11701 = vmatprep.subr.bf16.mxu0 %v11700_v57 }
 0x169   : > { %11989 = vmatprep.subr.bf16.mxu1 %v11700_v57  ;;  %9585 = vmatmul.mubr.f32.gmra.mrb[8].mxu0 %v7623_v59 }
 0x16a   : > { %10089 = vmatmul.mubr.f32.gmra.mrb[8].mxu1 %v7895_v63  ;;  %9587 = vmatprep.mubr.f32.mxu0 %v7624_v7 }
 0x16b   : > { %10091 = vmatprep.mubr.f32.mxu1 %v7896_v12  ;;  %11703 = vmatpush3.bf16.msra.mxu0 %v11700_v57 }
 0x16c   : > { %11991 = vmatpush3.bf16.msra.mxu1 %v11700_v57  ;;  %11705 = vmatprep.subr.bf16.mxu0 %v11704_v16 }
 0x16d   : > { %11993 = vmatprep.subr.bf16.mxu1 %v11704_v16  ;;  %9588 = vmatmul.mubr.f32.gmra.mrb[10].mxu0 %v7625_v24 }
 0x16e   : > { %10092 = vmatmul.mubr.f32.gmra.mrb[10].mxu1 %v7897_v8  ;;  %9590 = vmatprep.mubr.f32.mxu0 %v13829_v10  ;;  %v12928_v10 = vmov 0.0  }
 0x16f   : > { %10094 = vmatprep.mubr.f32.mxu1 %v13832_v11  ;;  %11707 = vmatpush3.bf16.msra.mxu0 %v11704_v16  ;;  %184 = vst [vmem:[#allocation2] sm:$0xff] %v12928_v10  ;;  %185 = vst [vmem:[#allocation2 + $0x8] sm:$0xff] %v12928_v10  ;;  %v3839_v11 = vld [vmem:[#allocation3 + $0xf0] sm:$0xff] }
 0x170   : > { %11995 = vmatpush3.bf16.msra.mxu1 %v11704_v16  ;;  %186 = vst [vmem:[#allocation2 + $0x10] sm:$0x3] %v12928_v10  ;;  %188 = vst [vmem:[#allocation2 + $0x198] sm:$0xff] %v12928_v10  ;;  %11709 = vmatprep.subr.bf16.mxu0 %v11708_v32 }
 0x171   : > { %9591 = vmatmul.mubr.f32.gmra.mrb[12].mxu0 %v13843_v22  ;;  %189 = vst [vmem:[#allocation2 + $0x1a0] sm:$0xff] %v12928_v10  ;;  %190 = vst [vmem:[#allocation2 + $0x1a8] sm:$0x3] %v12928_v10  ;;  %11997 = vmatprep.subr.bf16.mxu1 %v11708_v32  ;;  %v3840_v22 = vld [vmem:[#allocation3 + $0xf8] sm:$0xff] }
 0x172   : > { %10095 = vmatmul.mubr.f32.gmra.mrb[12].mxu1 %v13846_v49  ;;  %9593 = vmatprep.mubr.f32.mxu0 %v7628_v35  ;;  %192 = vst [vmem:[#allocation2 + $0x18] sm:$0x1] %v12928_v10  ;;  %193 = vst [vmem:[#allocation2 + $0x30] sm:$0x1] %v12928_v10  ;;  %v11712_v49 = vpack.c.bf16 %v3840_v22, %v3839_v11 }
 0x173   : > { %10097 = vmatprep.mubr.f32.mxu1 %v7900_v36  ;;  %194 = vst [vmem:[#allocation2 + $0x48] sm:$0x1] %v12928_v10  ;;  %195 = vst [vmem:[#allocation2 + $0x60] sm:$0x1] %v12928_v10  ;;  %11711 = vmatpush3.bf16.msra.mxu0 %v11708_v32 }
 0x174   : > { %196 = vst [vmem:[#allocation2 + $0x78] sm:$0x1] %v12928_v10  ;;  %197 = vst [vmem:[#allocation2 + $0x90] sm:$0x1] %v12928_v10  ;;  %11999 = vmatpush3.bf16.msra.mxu1 %v11708_v32  ;;  %11713 = vmatprep.subr.bf16.mxu0 %v11712_v49 }
 0x175   : > { %9594 = vmatmul.mubr.f32.gmra.mrb[14].mxu0 %v7629_v34  ;;  %198 = vst [vmem:[#allocation2 + $0xa8] sm:$0x1] %v12928_v10  ;;  %199 = vst [vmem:[#allocation2 + $0xc0] sm:$0x1] %v12928_v10  ;;  %12001 = vmatprep.subr.bf16.mxu1 %v11712_v49 }
 0x176   : > { %10098 = vmatmul.mubr.f32.gmra.mrb[14].mxu1 %v7901_v6  ;;  %200 = vst [vmem:[#allocation2 + $0xd8] sm:$0x1] %v12928_v10  ;;  %201 = vst [vmem:[#allocation2 + $0xf0] sm:$0x1] %v12928_v10  ;;  %v3808_v44 = vld [vmem:[#allocation2 + $0x1] sm:$0xff] }
 0x177   : > { %202 = vst [vmem:[#allocation2 + $0x108] sm:$0x1] %v12928_v10  ;;  %203 = vst [vmem:[#allocation2 + $0x120] sm:$0x1] %v12928_v10  ;;  %11715 = vmatpush3.bf16.msra.mxu0 %v11712_v49  ;;  %10132 = vmatprep.mubr.f32.mxu0 %v3808_v44  ;;  %v3809_v46 = vld [vmem:[#allocation2 + $0x9] sm:$0xff] }
 0x178   : > { %204 = vst [vmem:[#allocation2 + $0x138] sm:$0x1] %v12928_v10  ;;  %205 = vst [vmem:[#allocation2 + $0x150] sm:$0x1] %v12928_v10  ;;  %12003 = vmatpush3.bf16.msra.mxu1 %v11712_v49  ;;  %11717 = vmatprep.subr.bf16.mxu0 %v14076_v45 }
 0x179   : > { %206 = vst [vmem:[#allocation2 + $0x168] sm:$0x1] %v12928_v10  ;;  %207 = vst [vmem:[#allocation2 + $0x180] sm:$0x1] %v12928_v10  ;;  %12005 = vmatprep.subr.bf16.mxu1 %v14076_v45 }
 0x17a   : > { %208 = vst [vmem:[#allocation2 + $0x29] sm:$0x1] %v12928_v10  ;;  %209 = vst [vmem:[#allocation2 + $0x41] sm:$0x1] %v12928_v10  ;;  %10133 = vmatmul.mubr.f32.vlgmr.msra.gmra.mrb[16].mxu0 %v3809_v46 }
 0x17b   : > { %210 = vst [vmem:[#allocation2 + $0x59] sm:$0x1] %v12928_v10  ;;  %211 = vst [vmem:[#allocation2 + $0x71] sm:$0x1] %v12928_v10  ;;  %11719 = vmatpush3.bf16.msra.mxu0 %v14076_v45 }
 0x17c   : > { %212 = vst [vmem:[#allocation2 + $0x89] sm:$0x1] %v12928_v10  ;;  %213 = vst [vmem:[#allocation2 + $0xa1] sm:$0x1] %v12928_v10  ;;  %11721 = vmatprep.subr.bf16.mxu0 %v14081_v60 }
 0x17d   : > { %214 = vst [vmem:[#allocation2 + $0xb9] sm:$0x1] %v12928_v10  ;;  %215 = vst [vmem:[#allocation2 + $0xd1] sm:$0x1] %v12928_v10 }
 0x17e   : > { %216 = vst [vmem:[#allocation2 + $0xe9] sm:$0x1] %v12928_v10  ;;  %217 = vst [vmem:[#allocation2 + $0x101] sm:$0x1] %v12928_v10 }
 0x17f   : > { %218 = vst [vmem:[#allocation2 + $0x119] sm:$0x1] %v12928_v10  ;;  %219 = vst [vmem:[#allocation2 + $0x131] sm:$0x1] %v12928_v10  ;;  %11723 = vmatpush3.bf16.msra.mxu0 %v14081_v60 }
 0x180   : > { %220 = vst [vmem:[#allocation2 + $0x149] sm:$0x1] %v12928_v10  ;;  %221 = vst [vmem:[#allocation2 + $0x161] sm:$0x1] %v12928_v10  ;;  %11725 = vmatprep.subr.bf16.mxu0 %v14085_v4 }
 0x181   : > { %222 = vst [vmem:[#allocation2 + $0x179] sm:$0x1] %v12928_v10  ;;  %223 = vst [vmem:[#allocation2 + $0x191] sm:$0x1] %v12928_v10 }
 0x183   : > { %11727 = vmatpush3.bf16.msra.mxu0 %v14085_v4 }
 0x184   : > { %11729 = vmatprep.subr.bf16.mxu0 %v14089_v26 }
 0x187   : > { %11731 = vmatpush3.bf16.msra.mxu0 %v14089_v26 }
 0x188   : > { %11733 = vmatprep.subr.bf16.mxu0 %v14093_v39 }
 0x18b   : > { %11735 = vmatpush3.bf16.msra.mxu0 %v14093_v39 }
 0x18c   : > { %11737 = vmatprep.subr.bf16.mxu0 %v14097_v20 }
 0x18f   : > { %11739 = vmatpush3.bf16.msra.mxu0 %v14097_v20 }
 0x190   : > { %11741 = vmatprep.subr.bf16.mxu0 %v14101_v55 }
 0x193   : > { %11743 = vmatpush3.bf16.msra.mxu0 %v14101_v55 }
 0x194   : > { %11745 = vmatprep.subr.bf16.mxu0 %v14105_v47 }
 0x197   : > { %11747 = vmatpush3.bf16.msra.mxu0 %v14105_v47 }
 0x198   : > { %11749 = vmatprep.subr.bf16.mxu0 %v14109_v15 }
 0x22c   : > { %v9574_v25 = vpop.f32.mrb[0].mxu0 }
 0x22d   : > { %v10078_v51 = vpop.f32.mrb[0].mxu1  ;;  %vm1940_vm0 = vcmp.ge.f32.partialorder %v9574_v25, 0.0  ;;  %v1956_v53 = vmul.f32 0.1, %v9574_v25  ;;  %v1844_v18 = vpop.f32.mrb[1].mxu0 }
 0x22e   : > { %vm3712_vm1 = vcmp.ge.f32.partialorder %v10078_v51, 0.0  ;;  %v3728_v17 = vmul.f32 0.1, %v10078_v51  ;;  %v3616_v23 = vpop.f32.mrb[1].mxu1  ;;  %vm1939_vm2 = vcmp.ge.f32.partialorder %v1844_v18, 0.0 }
 0x22f   : > { %v1972_v27 = vsel %vm1940_vm0, %v9574_v25, %v1956_v53  ;;  %v1955_v29 = vmul.f32 0.1, %v1844_v18  ;;  %vm3711_vm3 = vcmp.ge.f32.partialorder %v3616_v23, 0.0  ;;  %v3727_v41 = vmul.f32 0.1, %v3616_v23 }
 0x230   : > { %v14112_v28 = vsel %vm3712_vm1, %v10078_v51, %v3728_v17  ;;  %1988 = vst [vmem:[#allocation2 + $0x21] sm:$0xff] %v1972_v27  ;;  %v9577_v42 = vpop.f32.mrb[2].mxu0 }
 0x231   : > { %3761 = vst [vmem:[#allocation2 + $0xe1] sm:$0xff] %v14112_v28  ;;  %v10081_v43 = vpop.f32.mrb[2].mxu1  ;;  %v1971_v48 = vsel %vm1939_vm2, %v1844_v18, %v1955_v29  ;;  %vm1942_vm4 = vcmp.ge.f32.partialorder %v9577_v42, 0.0  ;;  %v1958_v56 = vmul.f32 0.1, %v9577_v42  ;;  %v1854_v57 = vpop.f32.mrb[3].mxu0  ;;  %v14115_v62 = vsel %vm3711_vm3, %v3616_v23, %v3727_v41 }
 0x232   : > { %vm3714_vm5 = vcmp.ge.f32.partialorder %v10081_v43, 0.0  ;;  %v3626_v52 = vpop.f32.mrb[3].mxu1  ;;  %1987 = vst [vmem:[#allocation2 + $0x19] sm:$0xff] %v1971_v48  ;;  %v3730_v59 = vmul.f32 0.1, %v10081_v43  ;;  %vm1941_vm6 = vcmp.ge.f32.partialorder %v1854_v57, 0.0  ;;  %10135 = vmatprep.mubr.f32.mxu0 %v1971_v48 }
 0x233   : > { %v1957_v63 = vmul.f32 0.1, %v1854_v57  ;;  %3760 = vst [vmem:[#allocation2 + $0xd9] sm:$0xff] %v14115_v62  ;;  %v1974_v7 = vsel %vm1942_vm4, %v9577_v42, %v1958_v56  ;;  %vm3713_vm7 = vcmp.ge.f32.partialorder %v3626_v52, 0.0  ;;  %v3729_v12 = vmul.f32 0.1, %v3626_v52  ;;  %10136 = vmatmul.mubr.f32.gmra.mrb[18].mxu0 %v1972_v27 }
 0x234   : > { %1990 = vst [vmem:[#allocation2 + $0x39] sm:$0xff] %v1974_v7  ;;  %v14118_v16 = vsel %vm3714_vm5, %v10081_v43, %v3730_v59  ;;  %v9580_v8 = vpop.f32.mrb[4].mxu0 }
 0x235   : > { %v1973_v24 = vsel %vm1941_vm6, %v1854_v57, %v1957_v63  ;;  %v10084_v35 = vpop.f32.mrb[4].mxu1  ;;  %3763 = vst [vmem:[#allocation2 + $0xf9] sm:$0xff] %v14118_v16  ;;  %v14121_v36 = vsel %vm3713_vm7, %v3626_v52, %v3729_v12  ;;  %vm1944_vm8 = vcmp.ge.f32.partialorder %v9580_v8, 0.0  ;;  %v1960_v34 = vmul.f32 0.1, %v9580_v8  ;;  %v1864_v6 = vpop.f32.mrb[5].mxu0 }
 0x236   : > { %1989 = vst [vmem:[#allocation2 + $0x31] sm:$0xff] %v1973_v24  ;;  %vm3716_vm9 = vcmp.ge.f32.partialorder %v10084_v35, 0.0  ;;  %v3636_v30 = vpop.f32.mrb[5].mxu1  ;;  %10138 = vmatprep.mubr.f32.mxu0 %v1973_v24  ;;  %3762 = vst [vmem:[#allocation2 + $0xf1] sm:$0xff] %v14121_v36  ;;  %v3732_v31 = vmul.f32 0.1, %v10084_v35 }
 0x237   : > { %vm1943_vm10 = vcmp.ge.f32.partialorder %v1864_v6, 0.0  ;;  %v1959_v32 = vmul.f32 0.1, %v1864_v6  ;;  %vm3715_vm11 = vcmp.ge.f32.partialorder %v3636_v30, 0.0  ;;  %v1976_v11 = vsel %vm1944_vm8, %v9580_v8, %v1960_v34  ;;  %10139 = vmatmul.mubr.f32.gmra.mrb[20].mxu0 %v1974_v7 }
 0x238   : > { %v3731_v22 = vmul.f32 0.1, %v3636_v30  ;;  %1992 = vst [vmem:[#allocation2 + $0x51] sm:$0xff] %v1976_v11  ;;  %v14124_v49 = vsel %vm3716_vm9, %v10084_v35, %v3732_v31  ;;  %v9583_v40 = vpop.f32.mrb[6].mxu0 }
 0x239   : > { %v1975_v33 = vsel %vm1943_vm10, %v1864_v6, %v1959_v32  ;;  %v10087_v44 = vpop.f32.mrb[6].mxu1  ;;  %3765 = vst [vmem:[#allocation2 + $0x111] sm:$0xff] %v14124_v49  ;;  %vm1946_vm12 = vcmp.ge.f32.partialorder %v9583_v40, 0.0  ;;  %v1962_v54 = vmul.f32 0.1, %v9583_v40  ;;  %v1874_v58 = vpop.f32.mrb[7].mxu0 }
 0x23a   : > { %1991 = vst [vmem:[#allocation2 + $0x49] sm:$0xff] %v1975_v33  ;;  %v14127_v46 = vsel %vm3715_vm11, %v3636_v30, %v3731_v22  ;;  %vm3718_vm13 = vcmp.ge.f32.partialorder %v10087_v44, 0.0  ;;  %v3646_v61 = vpop.f32.mrb[7].mxu1  ;;  %10141 = vmatprep.mubr.f32.mxu0 %v1975_v33  ;;  %v3734_v3 = vmul.f32 0.1, %v10087_v44  ;;  %vm1945_vm14 = vcmp.ge.f32.partialorder %v1874_v58, 0.0 }
 0x23b   : > { %3764 = vst [vmem:[#allocation2 + $0x109] sm:$0xff] %v14127_v46  ;;  %v1961_v9 = vmul.f32 0.1, %v1874_v58  ;;  %vm3717_vm15 = vcmp.ge.f32.partialorder %v3646_v61, 0.0  ;;  %v1978_v5 = vsel %vm1946_vm12, %v9583_v40, %v1962_v54  ;;  %v3733_v37 = vmul.f32 0.1, %v3646_v61  ;;  %10142 = vmatmul.mubr.f32.gmra.mrb[22].mxu0 %v1976_v11 }
 0x23c   : > { %1994 = vst [vmem:[#allocation2 + $0x69] sm:$0xff] %v1978_v5  ;;  %v14130_v38 = vsel %vm3718_vm13, %v10087_v44, %v3734_v3  ;;  %v9586_v2 = vpop.f32.mrb[8].mxu0  ;;  %v4150_v44 = vld [vmem:[#allocation3 + $0x110] sm:$0xff]  ;;  %v4151_v54 = vld [vmem:[#allocation3 + $0x118] sm:$0xff] }
 0x23d   : > { %v1977_v1 = vsel %vm1945_vm14, %v1874_v58, %v1961_v9  ;;  %v10090_v21 = vpop.f32.mrb[8].mxu1  ;;  %3767 = vst [vmem:[#allocation2 + $0x129] sm:$0xff] %v14130_v38  ;;  %v14133_v50 = vsel %vm3717_vm15, %v3646_v61, %v3733_v37  ;;  %vm1948_vm0 = vcmp.ge.f32.partialorder %v9586_v2, 0.0  ;;  %v1964_v0 = vmul.f32 0.1, %v9586_v2  ;;  %v1884_v14 = vpop.f32.mrb[9].mxu0 }
 0x23e   : > { %1993 = vst [vmem:[#allocation2 + $0x61] sm:$0xff] %v1977_v1  ;;  %vm3720_vm1 = vcmp.ge.f32.partialorder %v10090_v21, 0.0  ;;  %v3656_v19 = vpop.f32.mrb[9].mxu1  ;;  %10144 = vmatprep.mubr.f32.mxu0 %v1977_v1  ;;  %3766 = vst [vmem:[#allocation2 + $0x121] sm:$0xff] %v14133_v50  ;;  %v3736_v13 = vmul.f32 0.1, %v10090_v21 }
 0x23f   : > { %vm1947_vm2 = vcmp.ge.f32.partialorder %v1884_v14, 0.0  ;;  %v1963_v25 = vmul.f32 0.1, %v1884_v14  ;;  %vm3719_vm3 = vcmp.ge.f32.partialorder %v3656_v19, 0.0  ;;  %v1980_v51 = vsel %vm1948_vm0, %v9586_v2, %v1964_v0  ;;  %10145 = vmatmul.mubr.f32.gmra.mrb[24].mxu0 %v1978_v5 }
 0x240   : > { %v3735_v53 = vmul.f32 0.1, %v3656_v19  ;;  %1996 = vst [vmem:[#allocation2 + $0x81] sm:$0xff] %v1980_v51  ;;  %v14136_v17 = vsel %vm3720_vm1, %v10090_v21, %v3736_v13  ;;  %v9589_v23 = vpop.f32.mrb[10].mxu0  ;;  %v4152_v13 = vld [vmem:[#allocation3 + $0x120] sm:$0xff] }
 0x241   : > { %v1979_v18 = vsel %vm1947_vm2, %v1884_v14, %v1963_v25  ;;  %v10093_v27 = vpop.f32.mrb[10].mxu1  ;;  %3769 = vst [vmem:[#allocation2 + $0x141] sm:$0xff] %v14136_v17  ;;  %vm1950_vm4 = vcmp.ge.f32.partialorder %v9589_v23, 0.0  ;;  %v1966_v41 = vmul.f32 0.1, %v9589_v23  ;;  %v1894_v42 = vpop.f32.mrb[11].mxu0 }
 0x242   : > { %1995 = vst [vmem:[#allocation2 + $0x79] sm:$0xff] %v1979_v18  ;;  %v14139_v29 = vsel %vm3719_vm3, %v3656_v19, %v3735_v53  ;;  %vm3722_vm5 = vcmp.ge.f32.partialorder %v10093_v27, 0.0  ;;  %v3666_v43 = vpop.f32.mrb[11].mxu1  ;;  %10147 = vmatprep.mubr.f32.mxu0 %v1979_v18  ;;  %v3738_v48 = vmul.f32 0.1, %v10093_v27  ;;  %vm1949_vm6 = vcmp.ge.f32.partialorder %v1894_v42, 0.0 }
 0x243   : > { %3768 = vst [vmem:[#allocation2 + $0x139] sm:$0xff] %v14139_v29  ;;  %v1965_v56 = vmul.f32 0.1, %v1894_v42  ;;  %vm3721_vm7 = vcmp.ge.f32.partialorder %v3666_v43, 0.0  ;;  %v1982_v57 = vsel %vm1950_vm4, %v9589_v23, %v1966_v41  ;;  %v3737_v52 = vmul.f32 0.1, %v3666_v43  ;;  %10148 = vmatmul.mubr.f32.gmra.mrb[26].mxu0 %v1980_v51 }
 0x244   : > { %1998 = vst [vmem:[#allocation2 + $0x99] sm:$0xff] %v1982_v57  ;;  %v14142_v59 = vsel %vm3722_vm5, %v10093_v27, %v3738_v48  ;;  %v9592_v7 = vpop.f32.mrb[12].mxu0  ;;  %v14155_v19 = vpack.c.bf16 %v4151_v54, %v4150_v44  ;;  %v4153_v25 = vld [vmem:[#allocation3 + $0x128] sm:$0xff]  ;;  %v14167_v18 = vld [vmem:[#allocation2 + $0x20] sm:$0xff]  ;;  %v4155_v23 = vld [vmem:[#allocation3 + $0x138] sm:$0xff] }
 0x245   : > { %v1981_v63 = vsel %vm1949_vm6, %v1894_v42, %v1965_v56  ;;  %v10096_v12 = vpop.f32.mrb[12].mxu1  ;;  %3771 = vst [vmem:[#allocation2 + $0x159] sm:$0xff] %v14142_v59  ;;  %v14145_v24 = vsel %vm3721_vm7, %v3666_v43, %v3737_v52  ;;  %vm1952_vm8 = vcmp.ge.f32.partialorder %v9592_v7, 0.0  ;;  %v1968_v8 = vmul.f32 0.1, %v9592_v7  ;;  %v1904_v35 = vpop.f32.mrb[13].mxu0 }
 0x246   : > { %1997 = vst [vmem:[#allocation2 + $0x91] sm:$0xff] %v1981_v63  ;;  %vm3724_vm9 = vcmp.ge.f32.partialorder %v10096_v12, 0.0  ;;  %v3676_v34 = vpop.f32.mrb[13].mxu1  ;;  %10150 = vmatprep.mubr.f32.mxu0 %v1981_v63  ;;  %3770 = vst [vmem:[#allocation2 + $0x151] sm:$0xff] %v14145_v24  ;;  %v3740_v6 = vmul.f32 0.1, %v10096_v12  ;;  %v14165_v53 = vpack.c.bf16 %v4153_v25, %v4152_v13 }
 0x247   : > { %vm1951_vm10 = vcmp.ge.f32.partialorder %v1904_v35, 0.0  ;;  %v1967_v30 = vmul.f32 0.1, %v1904_v35  ;;  %vm3723_vm11 = vcmp.ge.f32.partialorder %v3676_v34, 0.0  ;;  %v1984_v31 = vsel %vm1952_vm8, %v9592_v7, %v1968_v8  ;;  %10151 = vmatmul.mubr.f32.gmra.mrb[28].mxu0 %v1982_v57  ;;  %v14158_v51 = vld [vmem:[#allocation2 + $0x18] sm:$0xff]  ;;  %v4156_v27 = vld [vmem:[#allocation3 + $0x140] sm:$0xff] }
 0x248   : > { %v3739_v32 = vmul.f32 0.1, %v3676_v34  ;;  %2000 = vst [vmem:[#allocation2 + $0xb1] sm:$0xff] %v1984_v31  ;;  %v14148_v11 = vsel %vm3724_vm9, %v10096_v12, %v3740_v6  ;;  %v9595_v33 = vpop.f32.mrb[14].mxu0  ;;  %v4157_v41 = vld [vmem:[#allocation3 + $0x148] sm:$0xff]  ;;  %v4158_v42 = vld [vmem:[#allocation3 + $0x150] sm:$0xff] }
 0x249   : > { %v1983_v22 = vsel %vm1951_vm10, %v1904_v35, %v1967_v30  ;;  %v10099_v40 = vpop.f32.mrb[14].mxu1  ;;  %3773 = vst [vmem:[#allocation2 + $0x171] sm:$0xff] %v14148_v11  ;;  %vm1954_vm12 = vcmp.ge.f32.partialorder %v9595_v33, 0.0  ;;  %v1970_v61 = vmul.f32 0.1, %v9595_v33  ;;  %v1914_v3 = vpop.f32.mrb[15].mxu0 }
 0x24a   : > { %1999 = vst [vmem:[#allocation2 + $0xa9] sm:$0xff] %v1983_v22  ;;  %v14151_v58 = vsel %vm3723_vm11, %v3676_v34, %v3739_v32  ;;  %vm3726_vm13 = vcmp.ge.f32.partialorder %v10099_v40, 0.0  ;;  %v3686_v9 = vpop.f32.mrb[15].mxu1  ;;  %10153 = vmatprep.mubr.f32.mxu0 %v1983_v22  ;;  %v3742_v5 = vmul.f32 0.1, %v10099_v40  ;;  %vm1953_vm14 = vcmp.ge.f32.partialorder %v1914_v3, 0.0 }
 0x24b   : > { %3772 = vst [vmem:[#allocation2 + $0x169] sm:$0xff] %v14151_v58  ;;  %v1969_v37 = vmul.f32 0.1, %v1914_v3  ;;  %vm3725_vm15 = vcmp.ge.f32.partialorder %v3686_v9, 0.0  ;;  %v1986_v1 = vsel %vm1954_vm12, %v9595_v33, %v1970_v61  ;;  %v3741_v2 = vmul.f32 0.1, %v3686_v9  ;;  %10154 = vmatmul.mubr.f32.gmra.mrb[30].mxu0 %v1984_v31 }
 0x24c   : > { %2002 = vst [vmem:[#allocation2 + $0xc9] sm:$0xff] %v1986_v1  ;;  %v3758_v21 = vsel %vm3726_vm13, %v10099_v40, %v3742_v5  ;;  %10188 = vmatprep.mubr.f32.mxu0 %v12928_v10  ;;  %v4159_v43 = vld [vmem:[#allocation3 + $0x158] sm:$0xff]  ;;  %v4160_v48 = vld [vmem:[#allocation3 + $0x160] sm:$0xff]  ;;  %v4161_v56 = vld [vmem:[#allocation3 + $0x168] sm:$0xff] }
 0x24d   : > { %v1985_v0 = vsel %vm1953_vm14, %v1914_v3, %v1969_v37  ;;  %3775 = vst [vmem:[#allocation2 + $0x189] sm:$0xff] %v3758_v21  ;;  %v3757_v14 = vsel %vm3725_vm15, %v3686_v9, %v3741_v2  ;;  %v4162_v57 = vld [vmem:[#allocation3 + $0x170] sm:$0xff]  ;;  %v4163_v52 = vld [vmem:[#allocation3 + $0x178] sm:$0xff]  ;;  %v4342_v63 = vld [vmem:[#allocation3 + $0x180] sm:$0xff] }
 0x24e   : > { %2001 = vst [vmem:[#allocation2 + $0xc1] sm:$0xff] %v1985_v0  ;;  %10636 = vmatprep.mubr.f32.mxu1 %v1985_v0  ;;  %3774 = vst [vmem:[#allocation2 + $0x181] sm:$0xff] %v3757_v14  ;;  %v4343_v7 = vld [vmem:[#allocation3 + $0x188] sm:$0xff]  ;;  %v4344_v35 = vld [vmem:[#allocation3 + $0x190] sm:$0xff] }
 0x24f   : > { %10637 = vmatmul.mubr.f32.vlgmr.msra.gmra.mrb[16].mxu1 %v1986_v1  ;;  %10189 = vmatmul.mubr.f32.vlgmr.msra.gmra.mrb[16].mxu0 %v12928_v10  ;;  %v4154_v10 = vld [vmem:[#allocation3 + $0x130] sm:$0xff]  ;;  %v4345_v34 = vld [vmem:[#allocation3 + $0x198] sm:$0xff]  ;;  %v4346_v30 = vld [vmem:[#allocation3 + $0x1a0] sm:$0xff] }
 0x250   : > { %10639 = vmatprep.mubr.f32.mxu1 %v14115_v62  ;;  %10191 = vmatprep.mubr.f32.mxu0 %v14158_v51  ;;  %v14172_v62 = vld [vmem:[#allocation2 + $0x30] sm:$0xff]  ;;  %v14263_v6 = vpack.c.bf16 %v4345_v34, %v4344_v35  ;;  %v14267_v32 = vld [vmem:[#allocation2 + $0x1a] sm:$0xff]  ;;  %v14307_v2 = vld [vmem:[#allocation2 + $0x108] sm:$0xff] }
 0x251   : > { %11751 = vmatpush3.bf16.msra.mxu0 %v14109_v15  ;;  %12007 = vmatpush3.bf16.msra.mxu1 %v14076_v45  ;;  %v14179_v45 = vpack.c.bf16 %v4155_v23, %v4154_v10  ;;  %v14242_v12 = vld [vmem:[#allocation2 + $0xa8] sm:$0xff]  ;;  %v14271_v22 = vld [vmem:[#allocation2 + $0xd8] sm:$0xff]  ;;  %v4348_v40 = vld [vmem:[#allocation3 + $0x1b0] sm:$0xff] }
 0x252   : > { %11753 = vmatprep.subr.bf16.mxu0 %v14155_v19  ;;  %12009 = vmatprep.subr.bf16.mxu1 %v14081_v60  ;;  %v14282_v44 = vld [vmem:[#allocation2 + $0xe0] sm:$0xff]  ;;  %v14285_v54 = vld [vmem:[#allocation2 + $0x32] sm:$0xff]  ;;  %v14303_v37 = vld [vmem:[#allocation2 + $0x4a] sm:$0xff] }
 0x253   : > { %10640 = vmatmul.mubr.f32.gmra.mrb[18].mxu1 %v14112_v28  ;;  %10192 = vmatmul.mubr.f32.gmra.mrb[18].mxu0 %v14167_v18  ;;  %v14181_v28 = vld [vmem:[#allocation2 + $0x38] sm:$0xff]  ;;  %v4350_v9 = vld [vmem:[#allocation3 + $0x1c0] sm:$0xff]  ;;  %v4352_v14 = vld [vmem:[#allocation3 + $0x1d0] sm:$0xff] }
 0x254   : > { %10642 = vmatprep.mubr.f32.mxu1 %v14121_v36  ;;  %10194 = vmatprep.mubr.f32.mxu0 %v14172_v62  ;;  %v14186_v36 = vld [vmem:[#allocation2 + $0x48] sm:$0xff]  ;;  %v14294_v61 = vld [vmem:[#allocation2 + $0x3a] sm:$0xff]  ;;  %v14312_v21 = vld [vmem:[#allocation2 + $0x52] sm:$0xff] }
 0x255   : > { %11755 = vmatpush3.bf16.msra.mxu0 %v14155_v19  ;;  %12011 = vmatpush3.bf16.msra.mxu1 %v14081_v60  ;;  %v14193_v60 = vpack.c.bf16 %v4157_v41, %v4156_v27  ;;  %v14255_v8 = vld [vmem:[#allocation2 + $0xc0] sm:$0xff]  ;;  %v14265_v31 = vld [vmem:[#allocation2 + $0xc8] sm:$0xff]  ;;  %v14300_v5 = vld [vmem:[#allocation2 + $0xf8] sm:$0xff] }
 0x256   : > { %11757 = vmatprep.subr.bf16.mxu0 %v14165_v53  ;;  %12013 = vmatprep.subr.bf16.mxu1 %v14085_v4  ;;  %v4351_v1 = vld [vmem:[#allocation3 + $0x1c8] sm:$0xff]  ;;  %v14321_v13 = vld [vmem:[#allocation2 + $0x62] sm:$0xff]  ;;  %v14330_v10 = vld [vmem:[#allocation2 + $0x6a] sm:$0xff] }
 0x257   : > { %10643 = vmatmul.mubr.f32.gmra.mrb[20].mxu1 %v14118_v16  ;;  %10195 = vmatmul.mubr.f32.gmra.mrb[20].mxu0 %v14181_v28  ;;  %v14195_v16 = vld [vmem:[#allocation2 + $0x50] sm:$0xff]  ;;  %v14315_v0 = vpack.c.bf16 %v4351_v1, %v4350_v9  ;;  %v4353_v25 = vld [vmem:[#allocation3 + $0x1d8] sm:$0xff] }
 0x258   : > { %10645 = vmatprep.mubr.f32.mxu1 %v14127_v46  ;;  %10197 = vmatprep.mubr.f32.mxu0 %v14186_v36  ;;  %v14200_v46 = vld [vmem:[#allocation2 + $0x60] sm:$0xff]  ;;  %v14333_v23 = vpack.c.bf16 %v4353_v25, %v4352_v14  ;;  %v4354_v27 = vld [vmem:[#allocation3 + $0x1e0] sm:$0xff]  ;;  %v14336_v41 = vld [vmem:[#allocation2 + $0x128] sm:$0xff] }
 0x259   : > { %11759 = vmatpush3.bf16.msra.mxu0 %v14165_v53  ;;  %12015 = vmatpush3.bf16.msra.mxu1 %v14085_v4  ;;  %v14207_v4 = vpack.c.bf16 %v4159_v43, %v4158_v42  ;;  %v14339_v42 = vld [vmem:[#allocation2 + $0x7a] sm:$0xff]  ;;  %v4536_v34 = vld [vmem:[#allocation3 + $0x200] sm:$0xff]  ;;  %v14395_v1 = vld [vmem:[#allocation2 + $0xc2] sm:$0xff] }
 0x25a   : > { %11761 = vmatprep.subr.bf16.mxu0 %v14179_v45  ;;  %12017 = vmatprep.subr.bf16.mxu1 %v14089_v26  ;;  %v4355_v43 = vld [vmem:[#allocation3 + $0x1e8] sm:$0xff]  ;;  %v14390_v9 = vld [vmem:[#allocation2 + $0x170] sm:$0xff]  ;;  %v4538_v14 = vld [vmem:[#allocation3 + $0x210] sm:$0xff] }
 0x25b   : > { %10646 = vmatmul.mubr.f32.gmra.mrb[22].mxu1 %v14124_v49  ;;  %10198 = vmatmul.mubr.f32.gmra.mrb[22].mxu0 %v14195_v16  ;;  %v14209_v49 = vld [vmem:[#allocation2 + $0x68] sm:$0xff] }
 0x25c   : > { %10648 = vmatprep.mubr.f32.mxu1 %v14133_v50  ;;  %10200 = vmatprep.mubr.f32.mxu0 %v14200_v46  ;;  %v14214_v50 = vld [vmem:[#allocation2 + $0x78] sm:$0xff] }
 0x25d   : > { %11763 = vmatpush3.bf16.msra.mxu0 %v14179_v45  ;;  %12019 = vmatpush3.bf16.msra.mxu1 %v14089_v26  ;;  %v14221_v26 = vpack.c.bf16 %v4161_v56, %v4160_v48  ;;  %v14348_v48 = vld [vmem:[#allocation2 + $0x82] sm:$0xff]  ;;  %v14351_v56 = vpack.c.bf16 %v4355_v43, %v4354_v27  ;;  %v14405_v27 = vld [vmem:[#allocation2 + $0xca] sm:$0xff]  ;;  %v4541_v43 = vld [vmem:[#allocation3 + $0x228] sm:$0xff] }
 0x25e   : > { %11765 = vmatprep.subr.bf16.mxu0 %v14193_v60  ;;  %12021 = vmatprep.subr.bf16.mxu1 %v14093_v39 }
 0x25f   : > { %10649 = vmatmul.mubr.f32.gmra.mrb[24].mxu1 %v14130_v38  ;;  %10201 = vmatmul.mubr.f32.gmra.mrb[24].mxu0 %v14209_v49  ;;  %v14223_v38 = vld [vmem:[#allocation2 + $0x80] sm:$0xff] }
 0x260   : > { %10651 = vmatprep.mubr.f32.mxu1 %v14139_v29  ;;  %10203 = vmatprep.mubr.f32.mxu0 %v14214_v50  ;;  %v14228_v29 = vld [vmem:[#allocation2 + $0x90] sm:$0xff] }
 0x261   : > { %11767 = vmatpush3.bf16.msra.mxu0 %v14193_v60  ;;  %12023 = vmatpush3.bf16.msra.mxu1 %v14093_v39  ;;  %v14235_v39 = vpack.c.bf16 %v4163_v52, %v4162_v57  ;;  %v4356_v57 = vld [vmem:[#allocation3 + $0x1f0] sm:$0xff] }
 0x262   : > { %11769 = vmatprep.subr.bf16.mxu0 %v14207_v4  ;;  %12025 = vmatprep.subr.bf16.mxu1 %v14097_v20  ;;  %v14354_v52 = vld [vmem:[#allocation2 + $0x140] sm:$0xff] }
 0x263   : > { %10652 = vmatmul.mubr.f32.gmra.mrb[26].mxu1 %v14136_v17  ;;  %10204 = vmatmul.mubr.f32.gmra.mrb[26].mxu0 %v14223_v38  ;;  %v14237_v17 = vld [vmem:[#allocation2 + $0x98] sm:$0xff] }
 0x264   : > { %10654 = vmatprep.mubr.f32.mxu1 %v14145_v24  ;;  %10206 = vmatprep.mubr.f32.mxu0 %v14228_v29  ;;  %v14251_v24 = vld [vmem:[#allocation2 + $0xb0] sm:$0xff] }
 0x265   : > { %11771 = vmatpush3.bf16.msra.mxu0 %v14207_v4  ;;  %12027 = vmatpush3.bf16.msra.mxu1 %v14097_v20  ;;  %v4131_v20 = vld [vmem:[#allocation2 + $0x2] sm:$0xff] }
 0x266   : > { %11773 = vmatprep.subr.bf16.mxu0 %v14221_v26  ;;  %12029 = vmatprep.subr.bf16.mxu1 %v14101_v55 }
 0x267   : > { %10655 = vmatmul.mubr.f32.gmra.mrb[28].mxu1 %v14142_v59  ;;  %10207 = vmatmul.mubr.f32.gmra.mrb[28].mxu0 %v14237_v17  ;;  %v14249_v59 = vpack.c.bf16 %v4343_v7, %v4342_v63  ;;  %v14357_v63 = vld [vmem:[#allocation2 + $0x92] sm:$0xff]  ;;  %v4357_v7 = vld [vmem:[#allocation3 + $0x1f8] sm:$0xff] }
 0x268   : > { %10657 = vmatprep.mubr.f32.mxu1 %v14151_v58  ;;  %10209 = vmatprep.mubr.f32.mxu0 %v14242_v12  ;;  %v4349_v58 = vld [vmem:[#allocation3 + $0x1b8] sm:$0xff]  ;;  %v14369_v35 = vpack.c.bf16 %v4357_v7, %v4356_v57  ;;  %v14409_v57 = vld [vmem:[#allocation2 + $0xda] sm:$0xff] }
 0x269   : > { %11775 = vmatpush3.bf16.msra.mxu0 %v14221_v26  ;;  %12031 = vmatpush3.bf16.msra.mxu1 %v14101_v55  ;;  %v4132_v55 = vld [vmem:[#allocation2 + $0xa] sm:$0xff]  ;;  %v14297_v3 = vpack.c.bf16 %v4349_v58, %v4348_v40  ;;  %v14384_v40 = vld [vmem:[#allocation2 + $0xb2] sm:$0xff]  ;;  %v4542_v7 = vld [vmem:[#allocation3 + $0x230] sm:$0xff] }
 0x26a   : > { %11777 = vmatprep.subr.bf16.mxu0 %v14235_v39  ;;  %12033 = vmatprep.subr.bf16.mxu1 %v14105_v47 }
 0x26b   : > { %10658 = vmatmul.mubr.f32.gmra.mrb[30].mxu1 %v14148_v11  ;;  %10210 = vmatmul.mubr.f32.gmra.mrb[30].mxu0 %v14251_v24  ;;  %v4347_v11 = vld [vmem:[#allocation3 + $0x1a8] sm:$0xff] }
 0x26c   : > { %10692 = vmatprep.mubr.f32.mxu1 %v14255_v8  ;;  %10244 = vmatprep.mubr.f32.mxu0 %v4131_v20  ;;  %v14279_v33 = vpack.c.bf16 %v4347_v11, %v4346_v30  ;;  %v14366_v20 = vld [vmem:[#allocation2 + $0x9a] sm:$0xff]  ;;  %v14375_v30 = vld [vmem:[#allocation2 + $0xaa] sm:$0xff] }
 0x26d   : > { %11779 = vmatpush3.bf16.msra.mxu0 %v14235_v39  ;;  %12035 = vmatpush3.bf16.msra.mxu1 %v14105_v47  ;;  %v14276_v47 = vld [vmem:[#allocation2 + $0x22] sm:$0xff]  ;;  %v4537_v11 = vld [vmem:[#allocation3 + $0x208] sm:$0xff] }
 0x26e   : > { %11781 = vmatprep.subr.bf16.mxu0 %v14249_v59  ;;  %12037 = vmatprep.subr.bf16.mxu1 %v14109_v15  ;;  %v14387_v58 = vpack.c.bf16 %v4537_v11, %v4536_v34  ;;  %v14423_v34 = vld [vmem:[#allocation2 + $0xf2] sm:$0xff] }
 0x26f   : > { %v4544_v11 = vld [vmem:[#allocation3 + $0x240] sm:$0xff] }
 0x270   : > { %10245 = vmatmul.mubr.f32.vlgmr.msra.gmra.mrb[16].mxu0 %v4132_v55  ;;  %10693 = vmatmul.mubr.f32.vlgmr.msra.gmra.mrb[16].mxu1 %v14265_v31  ;;  %v14372_v55 = vld [vmem:[#allocation2 + $0x158] sm:$0xff] }
 0x271   : > { %10247 = vmatprep.mubr.f32.mxu0 %v14267_v32  ;;  %11783 = vmatpush3.bf16.msra.mxu0 %v14249_v59 }
 0x272   : > { %10695 = vmatprep.mubr.f32.mxu1 %v14271_v22  ;;  %12039 = vmatpush3.bf16.msra.mxu1 %v14109_v15  ;;  %v14289_v15 = vld [vmem:[#allocation2 + $0xf0] sm:$0xff] }
 0x273   : > { %11785 = vmatprep.subr.bf16.mxu0 %v14263_v6  ;;  %12041 = vmatprep.subr.bf16.mxu1 %v14155_v19 }
 0x274   : > { %10248 = vmatmul.mubr.f32.gmra.mrb[18].mxu0 %v14276_v47  ;;  %10696 = vmatmul.mubr.f32.gmra.mrb[18].mxu1 %v14282_v44 }
 0x275   : > { %10250 = vmatprep.mubr.f32.mxu0 %v14285_v54  ;;  %11787 = vmatpush3.bf16.msra.mxu0 %v14263_v6 }
 0x276   : > { %10698 = vmatprep.mubr.f32.mxu1 %v14289_v15  ;;  %12043 = vmatpush3.bf16.msra.mxu1 %v14155_v19  ;;  %v14318_v19 = vld [vmem:[#allocation2 + $0x110] sm:$0xff] }
 0x277   : > { %11789 = vmatprep.subr.bf16.mxu0 %v14279_v33  ;;  %12045 = vmatprep.subr.bf16.mxu1 %v14165_v53 }
 0x278   : > { %10251 = vmatmul.mubr.f32.gmra.mrb[20].mxu0 %v14294_v61  ;;  %10699 = vmatmul.mubr.f32.gmra.mrb[20].mxu1 %v14300_v5 }
 0x279   : > { %10253 = vmatprep.mubr.f32.mxu0 %v14303_v37  ;;  %11791 = vmatpush3.bf16.msra.mxu0 %v14279_v33 }
 0x27a   : > { %10701 = vmatprep.mubr.f32.mxu1 %v14307_v2  ;;  %12047 = vmatpush3.bf16.msra.mxu1 %v14165_v53  ;;  %v14325_v53 = vld [vmem:[#allocation2 + $0x120] sm:$0xff] }
 0x27b   : > { %11793 = vmatprep.subr.bf16.mxu0 %v14297_v3  ;;  %12049 = vmatprep.subr.bf16.mxu1 %v14179_v45 }
 0x27c   : > { %10254 = vmatmul.mubr.f32.gmra.mrb[22].mxu0 %v14312_v21  ;;  %10702 = vmatmul.mubr.f32.gmra.mrb[22].mxu1 %v14318_v19 }
 0x27d   : > { %10256 = vmatprep.mubr.f32.mxu0 %v14321_v13  ;;  %11795 = vmatpush3.bf16.msra.mxu0 %v14297_v3 }
 0x27e   : > { %10704 = vmatprep.mubr.f32.mxu1 %v14325_v53  ;;  %12051 = vmatpush3.bf16.msra.mxu1 %v14179_v45  ;;  %v14343_v45 = vld [vmem:[#allocation2 + $0x138] sm:$0xff] }
 0x27f   : > { %11797 = vmatprep.subr.bf16.mxu0 %v14315_v0  ;;  %12053 = vmatprep.subr.bf16.mxu1 %v14193_v60 }
 0x280   : > { %10257 = vmatmul.mubr.f32.gmra.mrb[24].mxu0 %v14330_v10  ;;  %10705 = vmatmul.mubr.f32.gmra.mrb[24].mxu1 %v14336_v41 }
 0x281   : > { %10259 = vmatprep.mubr.f32.mxu0 %v14339_v42  ;;  %11799 = vmatpush3.bf16.msra.mxu0 %v14315_v0 }
 0x282   : > { %10707 = vmatprep.mubr.f32.mxu1 %v14343_v45  ;;  %12055 = vmatpush3.bf16.msra.mxu1 %v14193_v60  ;;  %v14361_v60 = vld [vmem:[#allocation2 + $0x150] sm:$0xff] }
 0x283   : > { %11801 = vmatprep.subr.bf16.mxu0 %v14333_v23  ;;  %12057 = vmatprep.subr.bf16.mxu1 %v14207_v4 }
 0x284   : > { %10260 = vmatmul.mubr.f32.gmra.mrb[26].mxu0 %v14348_v48  ;;  %10708 = vmatmul.mubr.f32.gmra.mrb[26].mxu1 %v14354_v52 }
 0x285   : > { %10262 = vmatprep.mubr.f32.mxu0 %v14357_v63  ;;  %11803 = vmatpush3.bf16.msra.mxu0 %v14333_v23 }
 0x286   : > { %10710 = vmatprep.mubr.f32.mxu1 %v14361_v60  ;;  %12059 = vmatpush3.bf16.msra.mxu1 %v14207_v4  ;;  %v14379_v4 = vld [vmem:[#allocation2 + $0x168] sm:$0xff] }
 0x287   : > { %11805 = vmatprep.subr.bf16.mxu0 %v14351_v56  ;;  %12061 = vmatprep.subr.bf16.mxu1 %v14221_v26 }
 0x288   : > { %10263 = vmatmul.mubr.f32.gmra.mrb[28].mxu0 %v14366_v20  ;;  %10711 = vmatmul.mubr.f32.gmra.mrb[28].mxu1 %v14372_v55 }
 0x289   : > { %10265 = vmatprep.mubr.f32.mxu0 %v14375_v30  ;;  %11807 = vmatpush3.bf16.msra.mxu0 %v14351_v56 }
 0x28a   : > { %10713 = vmatprep.mubr.f32.mxu1 %v14379_v4  ;;  %12063 = vmatpush3.bf16.msra.mxu1 %v14221_v26  ;;  %v4539_v26 = vld [vmem:[#allocation3 + $0x218] sm:$0xff] }
 0x28b   : > { %11809 = vmatprep.subr.bf16.mxu0 %v14369_v35  ;;  %12065 = vmatprep.subr.bf16.mxu1 %v14235_v39  ;;  %v14402_v25 = vpack.c.bf16 %v4539_v26, %v4538_v14  ;;  %v14437_v14 = vld [vmem:[#allocation2 + $0x10a] sm:$0xff]  ;;  %v4546_v26 = vld [vmem:[#allocation3 + $0x250] sm:$0xff] }
 0x28c   : > { %10266 = vmatmul.mubr.f32.gmra.mrb[30].mxu0 %v14384_v40  ;;  %10714 = vmatmul.mubr.f32.gmra.mrb[30].mxu1 %v14390_v9 }
 0x28d   : > { %10300 = vmatprep.mubr.f32.mxu0 %v14158_v51  ;;  %11811 = vmatpush3.bf16.msra.mxu0 %v14369_v35  ;;  %v4540_v51 = vld [vmem:[#allocation3 + $0x220] sm:$0xff] }
 0x28e   : > { %10748 = vmatprep.mubr.f32.mxu1 %v14395_v1  ;;  %12067 = vmatpush3.bf16.msra.mxu1 %v14235_v39  ;;  %v14415_v39 = vpack.c.bf16 %v4541_v43, %v4540_v51  ;;  %v14451_v51 = vld [vmem:[#allocation2 + $0x122] sm:$0xff]  ;;  %v4548_v43 = vld [vmem:[#allocation3 + $0x260] sm:$0xff] }
 0x28f   : > { %11813 = vmatprep.subr.bf16.mxu0 %v14387_v58  ;;  %12069 = vmatprep.subr.bf16.mxu1 %v14249_v59 }
 0x290   : > { %10301 = vmatmul.mubr.f32.vlgmr.msra.gmra.mrb[16].mxu0 %v14167_v18  ;;  %v14418_v18 = vld [vmem:[#allocation2 + $0xe2] sm:$0xff] }
 0x291   : > { %10749 = vmatmul.mubr.f32.vlgmr.msra.gmra.mrb[16].mxu1 %v14405_v27  ;;  %10303 = vmatprep.mubr.f32.mxu0 %v14172_v62  ;;  %v4543_v62 = vld [vmem:[#allocation3 + $0x238] sm:$0xff] }
 0x292   : > { %11815 = vmatpush3.bf16.msra.mxu0 %v14387_v58  ;;  %10751 = vmatprep.mubr.f32.mxu1 %v14409_v57 }
 0x293   : > { %12071 = vmatpush3.bf16.msra.mxu1 %v14249_v59  ;;  %11817 = vmatprep.subr.bf16.mxu0 %v14402_v25  ;;  %v14432_v59 = vld [vmem:[#allocation2 + $0xfa] sm:$0xff] }
 0x294   : > { %10304 = vmatmul.mubr.f32.gmra.mrb[18].mxu0 %v14181_v28  ;;  %12073 = vmatprep.subr.bf16.mxu1 %v14263_v6  ;;  %v14429_v28 = vpack.c.bf16 %v4543_v62, %v4542_v7  ;;  %v14465_v7 = vld [vmem:[#allocation2 + $0x13a] sm:$0xff] }
 0x295   : > { %10752 = vmatmul.mubr.f32.gmra.mrb[18].mxu1 %v14418_v18  ;;  %10306 = vmatprep.mubr.f32.mxu0 %v14186_v36  ;;  %v4545_v36 = vld [vmem:[#allocation3 + $0x248] sm:$0xff]  ;;  %v4550_v62 = vld [vmem:[#allocation3 + $0x270] sm:$0xff] }
 0x296   : > { %11819 = vmatpush3.bf16.msra.mxu0 %v14402_v25  ;;  %10754 = vmatprep.mubr.f32.mxu1 %v14423_v34 }
 0x297   : > { %12075 = vmatpush3.bf16.msra.mxu1 %v14263_v6  ;;  %11821 = vmatprep.subr.bf16.mxu0 %v14415_v39  ;;  %v14446_v6 = vld [vmem:[#allocation2 + $0x112] sm:$0xff] }
 0x298   : > { %10307 = vmatmul.mubr.f32.gmra.mrb[20].mxu0 %v14195_v16  ;;  %12077 = vmatprep.subr.bf16.mxu1 %v14279_v33  ;;  %v14443_v16 = vpack.c.bf16 %v4545_v36, %v4544_v11  ;;  %v14479_v11 = vld [vmem:[#allocation2 + $0x152] sm:$0xff] }
 0x299   : > { %10755 = vmatmul.mubr.f32.gmra.mrb[20].mxu1 %v14432_v59  ;;  %10309 = vmatprep.mubr.f32.mxu0 %v14200_v46  ;;  %v4547_v46 = vld [vmem:[#allocation3 + $0x258] sm:$0xff]  ;;  %v4730_v36 = vld [vmem:[#allocation3 + $0x280] sm:$0xff] }
 0x29a   : > { %11823 = vmatpush3.bf16.msra.mxu0 %v14415_v39  ;;  %10757 = vmatprep.mubr.f32.mxu1 %v14437_v14 }
 0x29b   : > { %12079 = vmatpush3.bf16.msra.mxu1 %v14279_v33  ;;  %11825 = vmatprep.subr.bf16.mxu0 %v14429_v28  ;;  %v14460_v33 = vld [vmem:[#allocation2 + $0x12a] sm:$0xff] }
 0x29c   : > { %10310 = vmatmul.mubr.f32.gmra.mrb[22].mxu0 %v14209_v49  ;;  %12081 = vmatprep.subr.bf16.mxu1 %v14297_v3  ;;  %v14457_v49 = vpack.c.bf16 %v4547_v46, %v4546_v26  ;;  %v14493_v26 = vld [vmem:[#allocation2 + $0x16a] sm:$0xff]  ;;  %v4519_v46 = vld [vmem:[#allocation2 + $0x19] sm:$0xff] }
 0x29d   : > { %10758 = vmatmul.mubr.f32.gmra.mrb[22].mxu1 %v14446_v6  ;;  %10312 = vmatprep.mubr.f32.mxu0 %v14214_v50  ;;  %v4549_v50 = vld [vmem:[#allocation3 + $0x268] sm:$0xff] }
 0x29e   : > { %11827 = vmatpush3.bf16.msra.mxu0 %v14429_v28  ;;  %10760 = vmatprep.mubr.f32.mxu1 %v14451_v51 }
 0x29f   : > { %12083 = vmatpush3.bf16.msra.mxu1 %v14297_v3  ;;  %11829 = vmatprep.subr.bf16.mxu0 %v14443_v16  ;;  %v14474_v3 = vld [vmem:[#allocation2 + $0x142] sm:$0xff] }
 0x2a0   : > { %10313 = vmatmul.mubr.f32.gmra.mrb[24].mxu0 %v14223_v38  ;;  %12085 = vmatprep.subr.bf16.mxu1 %v14315_v0  ;;  %v14471_v38 = vpack.c.bf16 %v4549_v50, %v4548_v43  ;;  %v4733_v43 = vld [vmem:[#allocation3 + $0x298] sm:$0xff]  ;;  %v14513_v50 = vld [vmem:[#allocation2 + $0x31] sm:$0xff] }
 0x2a1   : > { %10761 = vmatmul.mubr.f32.gmra.mrb[24].mxu1 %v14460_v33  ;;  %10315 = vmatprep.mubr.f32.mxu0 %v14228_v29  ;;  %v4551_v29 = vld [vmem:[#allocation3 + $0x278] sm:$0xff] }
 0x2a2   : > { %11831 = vmatpush3.bf16.msra.mxu0 %v14443_v16  ;;  %10763 = vmatprep.mubr.f32.mxu1 %v14465_v7 }
 0x2a3   : > { %12087 = vmatpush3.bf16.msra.mxu1 %v14315_v0  ;;  %11833 = vmatprep.subr.bf16.mxu0 %v14457_v49  ;;  %v14488_v0 = vld [vmem:[#allocation2 + $0x15a] sm:$0xff] }
 0x2a4   : > { %10316 = vmatmul.mubr.f32.gmra.mrb[26].mxu0 %v14237_v17  ;;  %12089 = vmatprep.subr.bf16.mxu1 %v14333_v23  ;;  %v14485_v17 = vpack.c.bf16 %v4551_v29, %v4550_v62  ;;  %v4734_v62 = vld [vmem:[#allocation3 + $0x2a0] sm:$0xff]  ;;  %v4735_v29 = vld [vmem:[#allocation3 + $0x2a8] sm:$0xff] }
 0x2a5   : > { %10764 = vmatmul.mubr.f32.gmra.mrb[26].mxu1 %v14474_v3  ;;  %10318 = vmatprep.mubr.f32.mxu0 %v14242_v12  ;;  %v4731_v12 = vld [vmem:[#allocation3 + $0x288] sm:$0xff] }
 0x2a6   : > { %11835 = vmatpush3.bf16.msra.mxu0 %v14457_v49  ;;  %10766 = vmatprep.mubr.f32.mxu1 %v14479_v11 }
 0x2a7   : > { %12091 = vmatpush3.bf16.msra.mxu1 %v14333_v23  ;;  %11837 = vmatprep.subr.bf16.mxu0 %v14471_v38  ;;  %v14502_v23 = vld [vmem:[#allocation2 + $0x172] sm:$0xff] }
 0x2a8   : > { %10319 = vmatmul.mubr.f32.gmra.mrb[28].mxu0 %v14251_v24  ;;  %12093 = vmatprep.subr.bf16.mxu1 %v14351_v56  ;;  %v14499_v24 = vpack.c.bf16 %v4731_v12, %v4730_v36  ;;  %v14527_v36 = vld [vmem:[#allocation2 + $0x49] sm:$0xff] }
 0x2a9   : > { %10767 = vmatmul.mubr.f32.gmra.mrb[28].mxu1 %v14488_v0  ;;  %10321 = vmatprep.mubr.f32.mxu0 %v14255_v8  ;;  %v4732_v8 = vld [vmem:[#allocation3 + $0x290] sm:$0xff]  ;;  %v4737_v12 = vld [vmem:[#allocation3 + $0x2b8] sm:$0xff] }
 0x2aa   : > { %11839 = vmatpush3.bf16.msra.mxu0 %v14471_v38  ;;  %10769 = vmatprep.mubr.f32.mxu1 %v14493_v26 }
 0x2ab   : > { %12095 = vmatpush3.bf16.msra.mxu1 %v14351_v56  ;;  %11841 = vmatprep.subr.bf16.mxu0 %v14485_v17  ;;  %v4520_v56 = vld [vmem:[#allocation2 + $0x21] sm:$0xff] }
 0x2ac   : > { %10322 = vmatmul.mubr.f32.gmra.mrb[30].mxu0 %v14265_v31  ;;  %12097 = vmatprep.subr.bf16.mxu1 %v14369_v35  ;;  %v14511_v31 = vpack.c.bf16 %v4733_v43, %v4732_v8  ;;  %v4739_v8 = vld [vmem:[#allocation3 + $0x2c8] sm:$0xff] }
 0x2ad   : > { %10770 = vmatmul.mubr.f32.gmra.mrb[30].mxu1 %v14502_v23  ;;  %10356 = vmatprep.mubr.f32.mxu0 %v4519_v46  ;;  %v14541_v46 = vld [vmem:[#allocation2 + $0x61] sm:$0xff]  ;;  %v14555_v43 = vld [vmem:[#allocation2 + $0x79] sm:$0xff] }
 0x2ae   : > { %11843 = vmatpush3.bf16.msra.mxu0 %v14485_v17  ;;  %10804 = vmatprep.mubr.f32.mxu1 %v14271_v22  ;;  %v14520_v22 = vld [vmem:[#allocation2 + $0x39] sm:$0xff] }
 0x2af   : > { %12099 = vmatpush3.bf16.msra.mxu1 %v14369_v35  ;;  %11845 = vmatprep.subr.bf16.mxu0 %v14499_v24  ;;  %v14523_v35 = vpack.c.bf16 %v4735_v29, %v4734_v62  ;;  %v14569_v62 = vld [vmem:[#allocation2 + $0x91] sm:$0xff] }
 0x2b0   : > { %12101 = vmatprep.subr.bf16.mxu1 %v14387_v58  ;;  %v4743_v29 = vld [vmem:[#allocation3 + $0x2e8] sm:$0xff] }
 0x2b1   : > { %10357 = vmatmul.mubr.f32.vlgmr.msra.gmra.mrb[16].mxu0 %v4520_v56  ;;  %v4741_v56 = vld [vmem:[#allocation3 + $0x2d8] sm:$0xff] }
 0x2b2   : > { %10805 = vmatmul.mubr.f32.vlgmr.msra.gmra.mrb[16].mxu1 %v14282_v44  ;;  %10359 = vmatprep.mubr.f32.mxu0 %v14513_v50  ;;  %v4736_v44 = vld [vmem:[#allocation3 + $0x2b0] sm:$0xff] }
 0x2b3   : > { %11847 = vmatpush3.bf16.msra.mxu0 %v14499_v24  ;;  %10807 = vmatprep.mubr.f32.mxu1 %v14289_v15  ;;  %v14534_v15 = vld [vmem:[#allocation2 + $0x51] sm:$0xff] }
 0x2b4   : > { %12103 = vmatpush3.bf16.msra.mxu1 %v14387_v58  ;;  %11849 = vmatprep.subr.bf16.mxu0 %v14511_v31  ;;  %v14537_v58 = vpack.c.bf16 %v4737_v12, %v4736_v44  ;;  %v14583_v44 = vld [vmem:[#allocation2 + $0xa9] sm:$0xff] }
 0x2b5   : > { %10360 = vmatmul.mubr.f32.gmra.mrb[18].mxu0 %v14520_v22  ;;  %12105 = vmatprep.subr.bf16.mxu1 %v14402_v25  ;;  %v4745_v12 = vld [vmem:[#allocation3 + $0x2f8] sm:$0xff] }
 0x2b6   : > { %10808 = vmatmul.mubr.f32.gmra.mrb[18].mxu1 %v14300_v5  ;;  %10362 = vmatprep.mubr.f32.mxu0 %v14527_v36  ;;  %v4738_v5 = vld [vmem:[#allocation3 + $0x2c0] sm:$0xff] }
 0x2b7   : > { %11851 = vmatpush3.bf16.msra.mxu0 %v14511_v31  ;;  %10810 = vmatprep.mubr.f32.mxu1 %v14307_v2  ;;  %v14548_v2 = vld [vmem:[#allocation2 + $0x69] sm:$0xff] }
 0x2b8   : > { %12107 = vmatpush3.bf16.msra.mxu1 %v14402_v25  ;;  %11853 = vmatprep.subr.bf16.mxu0 %v14523_v35  ;;  %v14551_v25 = vpack.c.bf16 %v4739_v8, %v4738_v5  ;;  %v14597_v5 = vld [vmem:[#allocation2 + $0xc1] sm:$0xff]  ;;  %v4926_v8 = vld [vmem:[#allocation3 + $0x308] sm:$0xff] }
 0x2b9   : > { %10363 = vmatmul.mubr.f32.gmra.mrb[20].mxu0 %v14534_v15  ;;  %12109 = vmatprep.subr.bf16.mxu1 %v14415_v39 }
 0x2ba   : > { %10811 = vmatmul.mubr.f32.gmra.mrb[20].mxu1 %v14318_v19  ;;  %10365 = vmatprep.mubr.f32.mxu0 %v14541_v46  ;;  %v4740_v19 = vld [vmem:[#allocation3 + $0x2d0] sm:$0xff] }
 0x2bb   : > { %11855 = vmatpush3.bf16.msra.mxu0 %v14523_v35  ;;  %10813 = vmatprep.mubr.f32.mxu1 %v14325_v53  ;;  %v14562_v53 = vld [vmem:[#allocation2 + $0x81] sm:$0xff] }
 0x2bc   : > { %12111 = vmatpush3.bf16.msra.mxu1 %v14415_v39  ;;  %11857 = vmatprep.subr.bf16.mxu0 %v14537_v58  ;;  %v14565_v39 = vpack.c.bf16 %v4741_v56, %v4740_v19  ;;  %v14612_v56 = vld [vmem:[#allocation2 + $0x188] sm:$0xff] }
 0x2bd   : > { %10366 = vmatmul.mubr.f32.gmra.mrb[22].mxu0 %v14548_v2  ;;  %12113 = vmatprep.subr.bf16.mxu1 %v14429_v28 }
 0x2be   : > { %10814 = vmatmul.mubr.f32.gmra.mrb[22].mxu1 %v14336_v41  ;;  %10368 = vmatprep.mubr.f32.mxu0 %v14555_v43  ;;  %v4742_v41 = vld [vmem:[#allocation3 + $0x2e0] sm:$0xff] }
 0x2bf   : > { %11859 = vmatpush3.bf16.msra.mxu0 %v14537_v58  ;;  %10816 = vmatprep.mubr.f32.mxu1 %v14343_v45  ;;  %v14576_v45 = vld [vmem:[#allocation2 + $0x99] sm:$0xff] }
 0x2c0   : > { %12115 = vmatpush3.bf16.msra.mxu1 %v14429_v28  ;;  %11861 = vmatprep.subr.bf16.mxu0 %v14551_v25  ;;  %v14579_v28 = vpack.c.bf16 %v4743_v29, %v4742_v41  ;;  %v4927_v41 = vld [vmem:[#allocation3 + $0x310] sm:$0xff] }
 0x2c1   : > { %10369 = vmatmul.mubr.f32.gmra.mrb[24].mxu0 %v14562_v53  ;;  %12117 = vmatprep.subr.bf16.mxu1 %v14443_v16 }
 0x2c2   : > { %10817 = vmatmul.mubr.f32.gmra.mrb[24].mxu1 %v14354_v52  ;;  %10371 = vmatprep.mubr.f32.mxu0 %v14569_v62  ;;  %v4744_v52 = vld [vmem:[#allocation3 + $0x2f0] sm:$0xff] }
 0x2c3   : > { %11863 = vmatpush3.bf16.msra.mxu0 %v14551_v25  ;;  %10819 = vmatprep.mubr.f32.mxu1 %v14361_v60  ;;  %v14590_v60 = vld [vmem:[#allocation2 + $0xb1] sm:$0xff] }
 0x2c4   : > { %12119 = vmatpush3.bf16.msra.mxu1 %v14443_v16  ;;  %11865 = vmatprep.subr.bf16.mxu0 %v14565_v39  ;;  %v14593_v16 = vpack.c.bf16 %v4745_v12, %v4744_v52  ;;  %v14627_v52 = vld [vmem:[#allocation2 + $0xe1] sm:$0xff]  ;;  %v4930_v12 = vld [vmem:[#allocation3 + $0x328] sm:$0xff] }
 0x2c5   : > { %10372 = vmatmul.mubr.f32.gmra.mrb[26].mxu0 %v14576_v45  ;;  %12121 = vmatprep.subr.bf16.mxu1 %v14457_v49 }
 0x2c6   : > { %10820 = vmatmul.mubr.f32.gmra.mrb[26].mxu1 %v14372_v55  ;;  %10374 = vmatprep.mubr.f32.mxu0 %v14583_v44  ;;  %v4925_v55 = vld [vmem:[#allocation3 + $0x300] sm:$0xff] }
 0x2c7   : > { %11867 = vmatpush3.bf16.msra.mxu0 %v14565_v39  ;;  %10822 = vmatprep.mubr.f32.mxu1 %v14379_v4  ;;  %v14601_v4 = vld [vmem:[#allocation2 + $0x180] sm:$0xff]  ;;  %v14609_v19 = vpack.c.bf16 %v4926_v8, %v4925_v55  ;;  %v14631_v55 = vld [vmem:[#allocation2 + $0xf1] sm:$0xff] }
 0x2c8   : > { %12123 = vmatpush3.bf16.msra.mxu1 %v14457_v49  ;;  %11869 = vmatprep.subr.bf16.mxu0 %v14579_v28  ;;  %v14606_v49 = vld [vmem:[#allocation2 + $0xc9] sm:$0xff]  ;;  %v4931_v8 = vld [vmem:[#allocation3 + $0x330] sm:$0xff] }
 0x2c9   : > { %10375 = vmatmul.mubr.f32.gmra.mrb[28].mxu0 %v14590_v60  ;;  %12125 = vmatprep.subr.bf16.mxu1 %v14471_v38 }
 0x2ca   : > { %10823 = vmatmul.mubr.f32.gmra.mrb[28].mxu1 %v14390_v9  ;;  %10377 = vmatprep.mubr.f32.mxu0 %v14597_v5  ;;  %v14617_v9 = vld [vmem:[#allocation2 + $0xd9] sm:$0xff] }
 0x2cb   : > { %11871 = vmatpush3.bf16.msra.mxu0 %v14579_v28  ;;  %10825 = vmatprep.mubr.f32.mxu1 %v14601_v4 }
 0x2cc   : > { %12127 = vmatpush3.bf16.msra.mxu1 %v14471_v38  ;;  %11873 = vmatprep.subr.bf16.mxu0 %v14593_v16  ;;  %v4928_v38 = vld [vmem:[#allocation3 + $0x318] sm:$0xff] }
 0x2cd   : > { %10378 = vmatmul.mubr.f32.gmra.mrb[30].mxu0 %v14606_v49  ;;  %12129 = vmatprep.subr.bf16.mxu1 %v14485_v17  ;;  %v14624_v29 = vpack.c.bf16 %v4928_v38, %v4927_v41  ;;  %v14645_v41 = vld [vmem:[#allocation2 + $0x109] sm:$0xff] }
 0x2ce   : > { %10826 = vmatmul.mubr.f32.gmra.mrb[30].mxu1 %v14612_v56  ;;  %10412 = vmatprep.mubr.f32.mxu0 %v14267_v32  ;;  %v4929_v32 = vld [vmem:[#allocation3 + $0x320] sm:$0xff] }
 0x2cf   : > { %11875 = vmatpush3.bf16.msra.mxu0 %v14593_v16  ;;  %10860 = vmatprep.mubr.f32.mxu1 %v14617_v9  ;;  %v4933_v38 = vld [vmem:[#allocation3 + $0x340] sm:$0xff] }
 0x2d0   : > { %12131 = vmatpush3.bf16.msra.mxu1 %v14485_v17  ;;  %11877 = vmatprep.subr.bf16.mxu0 %v14609_v19  ;;  %v14637_v17 = vpack.c.bf16 %v4930_v12, %v4929_v32  ;;  %v14659_v32 = vld [vmem:[#allocation2 + $0x121] sm:$0xff] }
 0x2d1   : > { %12133 = vmatprep.subr.bf16.mxu1 %v14499_v24  ;;  %v4935_v12 = vld [vmem:[#allocation3 + $0x350] sm:$0xff] }
 0x2d2   : > { %10413 = vmatmul.mubr.f32.vlgmr.msra.gmra.mrb[16].mxu0 %v14276_v47  ;;  %v14640_v47 = vld [vmem:[#allocation2 + $0xf9] sm:$0xff] }
 0x2d3   : > { %10861 = vmatmul.mubr.f32.vlgmr.msra.gmra.mrb[16].mxu1 %v14627_v52  ;;  %10415 = vmatprep.mubr.f32.mxu0 %v14285_v54  ;;  %v4932_v54 = vld [vmem:[#allocation3 + $0x338] sm:$0xff] }
 0x2d4   : > { %11879 = vmatpush3.bf16.msra.mxu0 %v14609_v19  ;;  %10863 = vmatprep.mubr.f32.mxu1 %v14631_v55 }
 0x2d5   : > { %12135 = vmatpush3.bf16.msra.mxu1 %v14499_v24  ;;  %11881 = vmatprep.subr.bf16.mxu0 %v14624_v29  ;;  %v14654_v24 = vld [vmem:[#allocation2 + $0x111] sm:$0xff] }
 0x2d6   : > { %10416 = vmatmul.mubr.f32.gmra.mrb[18].mxu0 %v14294_v61  ;;  %12137 = vmatprep.subr.bf16.mxu1 %v14511_v31  ;;  %v14651_v61 = vpack.c.bf16 %v4932_v54, %v4931_v8  ;;  %v14673_v8 = vld [vmem:[#allocation2 + $0x139] sm:$0xff]  ;;  %v4937_v54 = vld [vmem:[#allocation3 + $0x360] sm:$0xff] }
 0x2d7   : > { %10864 = vmatmul.mubr.f32.gmra.mrb[18].mxu1 %v14640_v47  ;;  %10418 = vmatprep.mubr.f32.mxu0 %v14303_v37  ;;  %v4934_v37 = vld [vmem:[#allocation3 + $0x348] sm:$0xff] }
 0x2d8   : > { %11883 = vmatpush3.bf16.msra.mxu0 %v14624_v29  ;;  %10866 = vmatprep.mubr.f32.mxu1 %v14645_v41 }
 0x2d9   : > { %12139 = vmatpush3.bf16.msra.mxu1 %v14511_v31  ;;  %11885 = vmatprep.subr.bf16.mxu0 %v14637_v17  ;;  %v14668_v31 = vld [vmem:[#allocation2 + $0x129] sm:$0xff] }
 0x2da   : > { %10419 = vmatmul.mubr.f32.gmra.mrb[20].mxu0 %v14312_v21  ;;  %12141 = vmatprep.subr.bf16.mxu1 %v14523_v35  ;;  %v14665_v21 = vpack.c.bf16 %v4934_v37, %v4933_v38  ;;  %v14687_v38 = vld [vmem:[#allocation2 + $0x151] sm:$0xff]  ;;  %v4939_v37 = vld [vmem:[#allocation3 + $0x370] sm:$0xff] }
 0x2db   : > { %10867 = vmatmul.mubr.f32.gmra.mrb[20].mxu1 %v14654_v24  ;;  %10421 = vmatprep.mubr.f32.mxu0 %v14321_v13  ;;  %v4936_v13 = vld [vmem:[#allocation3 + $0x358] sm:$0xff] }
 0x2dc   : > { %11887 = vmatpush3.bf16.msra.mxu0 %v14637_v17  ;;  %10869 = vmatprep.mubr.f32.mxu1 %v14659_v32 }
 0x2dd   : > { %12143 = vmatpush3.bf16.msra.mxu1 %v14523_v35  ;;  %11889 = vmatprep.subr.bf16.mxu0 %v14651_v61  ;;  %v14682_v35 = vld [vmem:[#allocation2 + $0x141] sm:$0xff] }
 0x2de   : > { %10422 = vmatmul.mubr.f32.gmra.mrb[22].mxu0 %v14330_v10  ;;  %12145 = vmatprep.subr.bf16.mxu1 %v14537_v58  ;;  %v14679_v10 = vpack.c.bf16 %v4936_v13, %v4935_v12  ;;  %v14701_v12 = vld [vmem:[#allocation2 + $0x169] sm:$0xff] }
 0x2df   : > { %10870 = vmatmul.mubr.f32.gmra.mrb[22].mxu1 %v14668_v31  ;;  %10424 = vmatprep.mubr.f32.mxu0 %v14339_v42  ;;  %v4938_v42 = vld [vmem:[#allocation3 + $0x368] sm:$0xff]  ;;  %v5119_v13 = vld [vmem:[#allocation3 + $0x380] sm:$0xff] }
 0x2e0   : > { %11891 = vmatpush3.bf16.msra.mxu0 %v14651_v61  ;;  %10872 = vmatprep.mubr.f32.mxu1 %v14673_v8 }
 0x2e1   : > { %12147 = vmatpush3.bf16.msra.mxu1 %v14537_v58  ;;  %11893 = vmatprep.subr.bf16.mxu0 %v14665_v21  ;;  %v14696_v58 = vld [vmem:[#allocation2 + $0x159] sm:$0xff] }
 0x2e2   : > { %10425 = vmatmul.mubr.f32.gmra.mrb[24].mxu0 %v14348_v48  ;;  %12149 = vmatprep.subr.bf16.mxu1 %v14551_v25  ;;  %v14693_v48 = vpack.c.bf16 %v4938_v42, %v4937_v54  ;;  %v14715_v54 = vld [vmem:[#allocation2 + $0x181] sm:$0xff]  ;;  %v4908_v42 = vld [vmem:[#allocation2 + $0x30] sm:$0xff] }
 0x2e3   : > { %10873 = vmatmul.mubr.f32.gmra.mrb[24].mxu1 %v14682_v35  ;;  %10427 = vmatprep.mubr.f32.mxu0 %v14357_v63  ;;  %v4940_v63 = vld [vmem:[#allocation3 + $0x378] sm:$0xff] }
 0x2e4   : > { %11895 = vmatpush3.bf16.msra.mxu0 %v14665_v21  ;;  %10875 = vmatprep.mubr.f32.mxu1 %v14687_v38 }
 0x2e5   : > { %12151 = vmatpush3.bf16.msra.mxu1 %v14551_v25  ;;  %11897 = vmatprep.subr.bf16.mxu0 %v14679_v10  ;;  %v14710_v25 = vld [vmem:[#allocation2 + $0x171] sm:$0xff] }
 0x2e6   : > { %10428 = vmatmul.mubr.f32.gmra.mrb[26].mxu0 %v14366_v20  ;;  %12153 = vmatprep.subr.bf16.mxu1 %v14565_v39  ;;  %v14707_v20 = vpack.c.bf16 %v4940_v63, %v4939_v37  ;;  %v5122_v37 = vld [vmem:[#allocation3 + $0x398] sm:$0xff] }
 0x2e7   : > { %10876 = vmatmul.mubr.f32.gmra.mrb[26].mxu1 %v14696_v58  ;;  %10430 = vmatprep.mubr.f32.mxu0 %v14375_v30  ;;  %v5120_v30 = vld [vmem:[#allocation3 + $0x388] sm:$0xff]  ;;  %v4910_v63 = vld [vmem:[#allocation2 + $0x48] sm:$0xff] }
 0x2e8   : > { %11899 = vmatpush3.bf16.msra.mxu0 %v14679_v10  ;;  %10878 = vmatprep.mubr.f32.mxu1 %v14701_v12 }
 0x2e9   : > { %12155 = vmatpush3.bf16.msra.mxu1 %v14565_v39  ;;  %11901 = vmatprep.subr.bf16.mxu0 %v14693_v48  ;;  %v14724_v39 = vld [vmem:[#allocation2 + $0x189] sm:$0xff] }
 0x2ea   : > { %10431 = vmatmul.mubr.f32.gmra.mrb[28].mxu0 %v14384_v40  ;;  %12157 = vmatprep.subr.bf16.mxu1 %v14579_v28  ;;  %v14721_v40 = vpack.c.bf16 %v5120_v30, %v5119_v13  ;;  %v5123_v13 = vld [vmem:[#allocation3 + $0x3a0] sm:$0xff]  ;;  %v5124_v30 = vld [vmem:[#allocation3 + $0x3a8] sm:$0xff] }
 0x2eb   : > { %10879 = vmatmul.mubr.f32.gmra.mrb[28].mxu1 %v14710_v25  ;;  %10433 = vmatprep.mubr.f32.mxu0 %v14395_v1  ;;  %v5121_v1 = vld [vmem:[#allocation3 + $0x390] sm:$0xff] }
 0x2ec   : > { %11903 = vmatpush3.bf16.msra.mxu0 %v14693_v48  ;;  %10881 = vmatprep.mubr.f32.mxu1 %v14715_v54 }
 0x2ed   : > { %12159 = vmatpush3.bf16.msra.mxu1 %v14579_v28  ;;  %11905 = vmatprep.subr.bf16.mxu0 %v14707_v20  ;;  %v4909_v28 = vld [vmem:[#allocation2 + $0x38] sm:$0xff] }
 0x2ee   : > { %10434 = vmatmul.mubr.f32.gmra.mrb[30].mxu0 %v14405_v27  ;;  %12161 = vmatprep.subr.bf16.mxu1 %v14593_v16  ;;  %v14733_v27 = vpack.c.bf16 %v5122_v37, %v5121_v1  ;;  %v5125_v1 = vld [vmem:[#allocation3 + $0x3b0] sm:$0xff]  ;;  %v5126_v37 = vld [vmem:[#allocation3 + $0x3b8] sm:$0xff] }
 0x2ef   : > { %10882 = vmatmul.mubr.f32.gmra.mrb[30].mxu1 %v14724_v39  ;;  %10468 = vmatprep.mubr.f32.mxu0 %v4908_v42  ;;  %v4912_v42 = vld [vmem:[#allocation2 + $0x60] sm:$0xff] }
 0x2f0   : > { %11907 = vmatpush3.bf16.msra.mxu0 %v14707_v20  ;;  %10916 = vmatprep.mubr.f32.mxu1 %v14409_v57  ;;  %v4911_v57 = vld [vmem:[#allocation2 + $0x50] sm:$0xff] }
 0x2f1   : > { %12163 = vmatpush3.bf16.msra.mxu1 %v14593_v16  ;;  %11909 = vmatprep.subr.bf16.mxu0 %v14721_v40  ;;  %v14740_v16 = vpack.c.bf16 %v5124_v30, %v5123_v13  ;;  %v5129_v13 = vld [vmem:[#allocation3 + $0x3d0] sm:$0xff]  ;;  %v5130_v30 = vld [vmem:[#allocation3 + $0x3d8] sm:$0xff] }
 0x2f2   : > { %12165 = vmatprep.subr.bf16.mxu1 %v14609_v19 }
 0x2f3   : > { %10469 = vmatmul.mubr.f32.vlgmr.msra.gmra.mrb[16].mxu0 %v4909_v28  ;;  %v5127_v28 = vld [vmem:[#allocation3 + $0x3c0] sm:$0xff] }
 0x2f4   : > { %10917 = vmatmul.mubr.f32.vlgmr.msra.gmra.mrb[16].mxu1 %v14418_v18  ;;  %10471 = vmatprep.mubr.f32.mxu0 %v4910_v63  ;;  %v4913_v18 = vld [vmem:[#allocation2 + $0x68] sm:$0xff]  ;;  %v5128_v63 = vld [vmem:[#allocation3 + $0x3c8] sm:$0xff] }
 0x2f5   : > { %11911 = vmatpush3.bf16.msra.mxu0 %v14721_v40  ;;  %10919 = vmatprep.mubr.f32.mxu1 %v14423_v34  ;;  %v14748_v34 = vpack.c.bf16 %v5126_v37, %v5125_v1  ;;  %v5133_v1 = vld [vmem:[#allocation3 + $0x3f0] sm:$0xff]  ;;  %v5134_v37 = vld [vmem:[#allocation3 + $0x3f8] sm:$0xff] }
 0x2f6   : > { %12167 = vmatpush3.bf16.msra.mxu1 %v14609_v19  ;;  %11913 = vmatprep.subr.bf16.mxu0 %v14733_v27  ;;  %v4914_v19 = vld [vmem:[#allocation2 + $0x78] sm:$0xff] }
 0x2f7   : > { %10472 = vmatmul.mubr.f32.gmra.mrb[18].mxu0 %v4911_v57  ;;  %12169 = vmatprep.subr.bf16.mxu1 %v14624_v29  ;;  %v5131_v57 = vld [vmem:[#allocation3 + $0x3e0] sm:$0xff] }
 0x2f8   : > { %10920 = vmatmul.mubr.f32.gmra.mrb[18].mxu1 %v14432_v59  ;;  %10474 = vmatprep.mubr.f32.mxu0 %v4912_v42  ;;  %v4915_v59 = vld [vmem:[#allocation2 + $0x80] sm:$0xff]  ;;  %v5132_v42 = vld [vmem:[#allocation3 + $0x3e8] sm:$0xff] }
 0x2f9   : > { %11915 = vmatpush3.bf16.msra.mxu0 %v14733_v27  ;;  %10922 = vmatprep.mubr.f32.mxu1 %v14437_v14  ;;  %v14756_v14 = vpack.c.bf16 %v5128_v63, %v5127_v28  ;;  %v14792_v28 = vld [vmem:[#allocation2 + $0x18a] sm:$0xff]  ;;  %v5315_v63 = vld [vmem:[#allocation3 + $0x410] sm:$0xff] }
 0x2fa   : > { %12171 = vmatpush3.bf16.msra.mxu1 %v14624_v29  ;;  %11917 = vmatprep.subr.bf16.mxu0 %v14740_v16  ;;  %v4916_v29 = vld [vmem:[#allocation2 + $0x90] sm:$0xff] }
 0x2fb   : > { %10475 = vmatmul.mubr.f32.gmra.mrb[20].mxu0 %v4913_v18  ;;  %12173 = vmatprep.subr.bf16.mxu1 %v14637_v17  ;;  %v5313_v18 = vld [vmem:[#allocation3 + $0x400] sm:$0xff] }
 0x2fc   : > { %10923 = vmatmul.mubr.f32.gmra.mrb[20].mxu1 %v14446_v6  ;;  %10477 = vmatprep.mubr.f32.mxu0 %v4914_v19  ;;  %v4917_v6 = vld [vmem:[#allocation2 + $0x98] sm:$0xff] }
 0x2fd   : > { %11919 = vmatpush3.bf16.msra.mxu0 %v14740_v16  ;;  %10925 = vmatprep.mubr.f32.mxu1 %v14451_v51  ;;  %v14764_v51 = vpack.c.bf16 %v5130_v30, %v5129_v13  ;;  %v5314_v19 = vld [vmem:[#allocation3 + $0x408] sm:$0xff]  ;;  %v5317_v13 = vld [vmem:[#allocation3 + $0x420] sm:$0xff] }
 0x2fe   : > { %12175 = vmatpush3.bf16.msra.mxu1 %v14637_v17  ;;  %11921 = vmatprep.subr.bf16.mxu0 %v14748_v34  ;;  %v4918_v17 = vld [vmem:[#allocation2 + $0xa8] sm:$0xff]  ;;  %v5318_v30 = vld [vmem:[#allocation3 + $0x428] sm:$0xff] }
 0x2ff   : > { %10478 = vmatmul.mubr.f32.gmra.mrb[22].mxu0 %v4915_v59  ;;  %12177 = vmatprep.subr.bf16.mxu1 %v14651_v61  ;;  %v5316_v59 = vld [vmem:[#allocation3 + $0x418] sm:$0xff] }
 0x300   : > { %10926 = vmatmul.mubr.f32.gmra.mrb[22].mxu1 %v14460_v33  ;;  %10480 = vmatprep.mubr.f32.mxu0 %v4916_v29  ;;  %v4919_v33 = vld [vmem:[#allocation2 + $0xb0] sm:$0xff]  ;;  %v6683_v29 = vld [vmem:[#allocation2 + $0xf8] sm:$0xff] }
 0x301   : > { %11923 = vmatpush3.bf16.msra.mxu0 %v14748_v34  ;;  %10928 = vmatprep.mubr.f32.mxu1 %v14465_v7  ;;  %v14772_v7 = vpack.c.bf16 %v5132_v42, %v5131_v57  ;;  %v5321_v57 = vld [vmem:[#allocation3 + $0x440] sm:$0xff]  ;;  %v5322_v42 = vld [vmem:[#allocation3 + $0x448] sm:$0xff] }
 0x302   : > { %12179 = vmatpush3.bf16.msra.mxu1 %v14651_v61  ;;  %11925 = vmatprep.subr.bf16.mxu0 %v14756_v14  ;;  %v4920_v61 = vld [vmem:[#allocation2 + $0xc0] sm:$0xff] }
 0x303   : > { %10481 = vmatmul.mubr.f32.gmra.mrb[24].mxu0 %v4917_v6  ;;  %12181 = vmatprep.subr.bf16.mxu1 %v14665_v21  ;;  %v6685_v6 = vld [vmem:[#allocation2 + $0x110] sm:$0xff] }
 0x304   : > { %10929 = vmatmul.mubr.f32.gmra.mrb[24].mxu1 %v14474_v3  ;;  %10483 = vmatprep.mubr.f32.mxu0 %v4918_v17  ;;  %v4921_v3 = vld [vmem:[#allocation2 + $0xc8] sm:$0xff] }
 0x305   : > { %11927 = vmatpush3.bf16.msra.mxu0 %v14756_v14  ;;  %10931 = vmatprep.mubr.f32.mxu1 %v14479_v11  ;;  %v14780_v11 = vpack.c.bf16 %v5134_v37, %v5133_v1  ;;  %v5320_v17 = vld [vmem:[#allocation3 + $0x438] sm:$0xff]  ;;  %v5325_v1 = vld [vmem:[#allocation3 + $0x460] sm:$0xff]  ;;  %v5326_v37 = vld [vmem:[#allocation3 + $0x468] sm:$0xff] }
 0x306   : > { %12183 = vmatpush3.bf16.msra.mxu1 %v14665_v21  ;;  %11929 = vmatprep.subr.bf16.mxu0 %v14764_v51  ;;  %v4922_v21 = vld [vmem:[#allocation2 + $0xd8] sm:$0xff] }
 0x307   : > { %10484 = vmatmul.mubr.f32.gmra.mrb[26].mxu0 %v4919_v33  ;;  %12185 = vmatprep.subr.bf16.mxu1 %v14679_v10  ;;  %v5323_v33 = vld [vmem:[#allocation3 + $0x450] sm:$0xff] }
 0x308   : > { %10932 = vmatmul.mubr.f32.gmra.mrb[26].mxu1 %v14488_v0  ;;  %10486 = vmatprep.mubr.f32.mxu0 %v4920_v61  ;;  %v14784_v0 = vld [vmem:[#allocation2 + $0x182] sm:$0xff] }
 0x309   : > { %11931 = vmatpush3.bf16.msra.mxu0 %v14764_v51  ;;  %10934 = vmatprep.mubr.f32.mxu1 %v14493_v26  ;;  %v4923_v26 = vld [vmem:[#allocation2 + $0xe0] sm:$0xff]  ;;  %v5324_v61 = vld [vmem:[#allocation3 + $0x458] sm:$0xff] }
 0x30a   : > { %12187 = vmatpush3.bf16.msra.mxu1 %v14679_v10  ;;  %11933 = vmatprep.subr.bf16.mxu0 %v14772_v7  ;;  %v14790_v10 = vpack.c.bf16 %v5314_v19, %v5313_v18  ;;  %v7074_v18 = vld [vmem:[#allocation2 + $0x13a] sm:$0xff]  ;;  %v7075_v19 = vld [vmem:[#allocation2 + $0x142] sm:$0xff] }
 0x30b   : > { %10487 = vmatmul.mubr.f32.gmra.mrb[28].mxu0 %v4921_v3  ;;  %12189 = vmatprep.subr.bf16.mxu1 %v14693_v48  ;;  %v5327_v3 = vld [vmem:[#allocation3 + $0x470] sm:$0xff] }
 0x30c   : > { %10935 = vmatmul.mubr.f32.gmra.mrb[28].mxu1 %v14502_v23  ;;  %10489 = vmatprep.mubr.f32.mxu0 %v4922_v21  ;;  %v6682_v23 = vld [vmem:[#allocation2 + $0xf0] sm:$0xff]  ;;  %v5328_v21 = vld [vmem:[#allocation3 + $0x478] sm:$0xff] }
 0x30d   : > { %11935 = vmatpush3.bf16.msra.mxu0 %v14772_v7  ;;  %10937 = vmatprep.mubr.f32.mxu1 %v14784_v0 }
 0x30e   : > { %12191 = vmatpush3.bf16.msra.mxu1 %v14693_v48  ;;  %11937 = vmatprep.subr.bf16.mxu0 %v14780_v11  ;;  %v14801_v48 = vpack.c.bf16 %v5316_v59, %v5315_v63  ;;  %v7079_v63 = vld [vmem:[#allocation2 + $0x172] sm:$0xff]  ;;  %v7082_v59 = vld [vmem:[#allocation2 + $0x19a] sm:$0xff] }
 0x30f   : > { %10490 = vmatmul.mubr.f32.gmra.mrb[30].mxu0 %v4923_v26  ;;  %12193 = vmatprep.subr.bf16.mxu1 %v14707_v20  ;;  %v7076_v26 = vld [vmem:[#allocation2 + $0x152] sm:$0xff] }
 0x310   : > { %10938 = vmatmul.mubr.f32.gmra.mrb[30].mxu1 %v14792_v28  ;;  %10524 = vmatprep.mubr.f32.mxu0 %v14513_v50  ;;  %v6684_v50 = vld [vmem:[#allocation2 + $0x108] sm:$0xff] }
 0x311   : > { %11939 = vmatpush3.bf16.msra.mxu0 %v14780_v11  ;;  %10972 = vmatprep.mubr.f32.mxu1 %v6682_v23  ;;  %v7078_v23 = vld [vmem:[#allocation2 + $0x16a] sm:$0xff] }
 0x312   : > { %12195 = vmatpush3.bf16.msra.mxu1 %v14707_v20  ;;  %11941 = vmatprep.subr.bf16.mxu0 %v14790_v10  ;;  %v14808_v20 = vpack.c.bf16 %v5318_v30, %v5317_v13 }
 0x313   : > { %12197 = vmatprep.subr.bf16.mxu1 %v14721_v40 }
 0x314   : > { %10525 = vmatmul.mubr.f32.vlgmr.msra.gmra.mrb[16].mxu0 %v14520_v22  ;;  %v5319_v22 = vld [vmem:[#allocation3 + $0x430] sm:$0xff] }
 0x315   : > { %10973 = vmatmul.mubr.f32.vlgmr.msra.gmra.mrb[16].mxu1 %v6683_v29  ;;  %10527 = vmatprep.mubr.f32.mxu0 %v14527_v36  ;;  %v6686_v36 = vld [vmem:[#allocation2 + $0x120] sm:$0xff] }
 0x316   : > { %11943 = vmatpush3.bf16.msra.mxu0 %v14790_v10  ;;  %10975 = vmatprep.mubr.f32.mxu1 %v6684_v50 }
 0x317   : > { %12199 = vmatpush3.bf16.msra.mxu1 %v14721_v40  ;;  %11945 = vmatprep.subr.bf16.mxu0 %v14801_v48  ;;  %v14816_v40 = vpack.c.bf16 %v5320_v17, %v5319_v22 }
 0x318   : > { %10528 = vmatmul.mubr.f32.gmra.mrb[18].mxu0 %v14534_v15  ;;  %12201 = vmatprep.subr.bf16.mxu1 %v14733_v27  ;;  %v6687_v15 = vld [vmem:[#allocation2 + $0x128] sm:$0xff] }
 0x319   : > { %10976 = vmatmul.mubr.f32.gmra.mrb[18].mxu1 %v6685_v6  ;;  %10530 = vmatprep.mubr.f32.mxu0 %v14541_v46  ;;  %v6688_v46 = vld [vmem:[#allocation2 + $0x138] sm:$0xff] }
 0x31a   : > { %11947 = vmatpush3.bf16.msra.mxu0 %v14801_v48  ;;  %10978 = vmatprep.mubr.f32.mxu1 %v6686_v36 }
 0x31b   : > { %12203 = vmatpush3.bf16.msra.mxu1 %v14733_v27  ;;  %11949 = vmatprep.subr.bf16.mxu0 %v14808_v20  ;;  %v14824_v27 = vpack.c.bf16 %v5322_v42, %v5321_v57 }
 0x31c   : > { %10531 = vmatmul.mubr.f32.gmra.mrb[20].mxu0 %v14548_v2  ;;  %12205 = vmatprep.subr.bf16.mxu1 %v14740_v16  ;;  %v6689_v2 = vld [vmem:[#allocation2 + $0x140] sm:$0xff] }
 0x31d   : > { %10979 = vmatmul.mubr.f32.gmra.mrb[20].mxu1 %v6687_v15  ;;  %10533 = vmatprep.mubr.f32.mxu0 %v14555_v43  ;;  %v6690_v43 = vld [vmem:[#allocation2 + $0x150] sm:$0xff] }
 0x31e   : > { %11951 = vmatpush3.bf16.msra.mxu0 %v14808_v20  ;;  %10981 = vmatprep.mubr.f32.mxu1 %v6688_v46 }
 0x31f   : > { %12207 = vmatpush3.bf16.msra.mxu1 %v14740_v16  ;;  %11953 = vmatprep.subr.bf16.mxu0 %v14816_v40  ;;  %v14832_v16 = vpack.c.bf16 %v5324_v61, %v5323_v33 }
 0x320   : > { %10534 = vmatmul.mubr.f32.gmra.mrb[22].mxu0 %v14562_v53  ;;  %12209 = vmatprep.subr.bf16.mxu1 %v14748_v34  ;;  %v6691_v53 = vld [vmem:[#allocation2 + $0x158] sm:$0xff] }
 0x321   : > { %10982 = vmatmul.mubr.f32.gmra.mrb[22].mxu1 %v6689_v2  ;;  %10536 = vmatprep.mubr.f32.mxu0 %v14569_v62  ;;  %v6692_v62 = vld [vmem:[#allocation2 + $0x168] sm:$0xff] }
 0x322   : > { %11955 = vmatpush3.bf16.msra.mxu0 %v14816_v40  ;;  %10984 = vmatprep.mubr.f32.mxu1 %v6690_v43 }
 0x323   : > { %12211 = vmatpush3.bf16.msra.mxu1 %v14748_v34  ;;  %11957 = vmatprep.subr.bf16.mxu0 %v14824_v27  ;;  %v14840_v34 = vpack.c.bf16 %v5326_v37, %v5325_v1 }
 0x324   : > { %10537 = vmatmul.mubr.f32.gmra.mrb[24].mxu0 %v14576_v45  ;;  %12213 = vmatprep.subr.bf16.mxu1 %v14756_v14  ;;  %v6693_v45 = vld [vmem:[#allocation2 + $0x170] sm:$0xff] }
 0x325   : > { %10985 = vmatmul.mubr.f32.gmra.mrb[24].mxu1 %v6691_v53  ;;  %10539 = vmatprep.mubr.f32.mxu0 %v14583_v44  ;;  %v14849_v44 = vpack.c.bf16 %v5328_v21, %v5327_v3 }
 0x326   : > { %11959 = vmatpush3.bf16.msra.mxu0 %v14824_v27  ;;  %10987 = vmatprep.mubr.f32.mxu1 %v6692_v62 }
 0x327   : > { %12215 = vmatpush3.bf16.msra.mxu1 %v14756_v14  ;;  %11961 = vmatprep.subr.bf16.mxu0 %v14832_v16  ;;  %v5311_v14 = vld [vmem:[#allocation2 + $0xe2] sm:$0xff] }
 0x328   : > { %10540 = vmatmul.mubr.f32.gmra.mrb[26].mxu0 %v14590_v60  ;;  %12217 = vmatprep.subr.bf16.mxu1 %v14764_v51  ;;  %v12828_v60 = vld [vmem:[#allocation2] sm:$0xff] }
 0x329   : > { %10988 = vmatmul.mubr.f32.gmra.mrb[26].mxu1 %v6693_v45  ;;  %10542 = vmatprep.mubr.f32.mxu0 %v14597_v5  ;;  %v5296_v5 = vld [vmem:[#allocation2 + $0x32] sm:$0xff] }
 0x32a   : > { %11963 = vmatpush3.bf16.msra.mxu0 %v14832_v16  ;;  %10990 = vmatprep.mubr.f32.mxu1 %v14601_v4  ;;  %v5297_v4 = vld [vmem:[#allocation2 + $0x3a] sm:$0xff] }
 0x32b   : > { %12219 = vmatpush3.bf16.msra.mxu1 %v14764_v51  ;;  %11965 = vmatprep.subr.bf16.mxu0 %v14840_v34  ;;  %v7070_v51 = vld [vmem:[#allocation2 + $0x10a] sm:$0xff] }
 0x32c   : > { %10543 = vmatmul.mubr.f32.gmra.mrb[28].mxu0 %v14606_v49  ;;  %12221 = vmatprep.subr.bf16.mxu1 %v14772_v7  ;;  %v5298_v49 = vld [vmem:[#allocation2 + $0x4a] sm:$0xff] }
 0x32d   : > { %10991 = vmatmul.mubr.f32.gmra.mrb[28].mxu1 %v14612_v56  ;;  %10545 = vmatprep.mubr.f32.mxu0 %v14617_v9  ;;  %v5299_v56 = vld [vmem:[#allocation2 + $0x52] sm:$0xff]  ;;  %v5300_v9 = vld [vmem:[#allocation2 + $0x62] sm:$0xff] }
 0x32e   : > { %11967 = vmatpush3.bf16.msra.mxu0 %v14840_v34  ;;  %10993 = vmatprep.mubr.f32.mxu1 %v12828_v60 }
 0x32f   : > { %12223 = vmatpush3.bf16.msra.mxu1 %v14772_v7  ;;  %11969 = vmatprep.subr.bf16.mxu0 %v14849_v44  ;;  %v7071_v7 = vld [vmem:[#allocation2 + $0x112] sm:$0xff] }
 0x330   : > { %10546 = vmatmul.mubr.f32.gmra.mrb[30].mxu0 %v14627_v52  ;;  %12225 = vmatprep.subr.bf16.mxu1 %v14780_v11  ;;  %v5301_v52 = vld [vmem:[#allocation2 + $0x6a] sm:$0xff] }
 0x331   : > { %10994 = vmatmul.mubr.f32.gmra.mrb[30].mxu1 %v12828_v60  ;;  %10580 = vmatprep.mubr.f32.mxu0 %v5296_v5 }
 0x332   : > { %11971 = vmatpush3.bf16.msra.mxu0 %v14849_v44  ;;  %11028 = vmatprep.mubr.f32.mxu1 %v14631_v55  ;;  %v5302_v55 = vld [vmem:[#allocation2 + $0x7a] sm:$0xff] }
 0x333   : > { %12227 = vmatpush3.bf16.msra.mxu1 %v14780_v11  ;;  %v7073_v11 = vld [vmem:[#allocation2 + $0x12a] sm:$0xff] }
 0x334   : > { %12229 = vmatprep.subr.bf16.mxu1 %v14790_v10 }
 0x335   : > { %10581 = vmatmul.mubr.f32.vlgmr.msra.gmra.mrb[16].mxu0 %v5297_v4 }
 0x336   : > { %11029 = vmatmul.mubr.f32.vlgmr.msra.gmra.mrb[16].mxu1 %v14640_v47  ;;  %10583 = vmatprep.mubr.f32.mxu0 %v5298_v49  ;;  %v5303_v47 = vld [vmem:[#allocation2 + $0x82] sm:$0xff] }
 0x337   : > { %11031 = vmatprep.mubr.f32.mxu1 %v14645_v41  ;;  %12231 = vmatpush3.bf16.msra.mxu1 %v14790_v10  ;;  %v5304_v41 = vld [vmem:[#allocation2 + $0x92] sm:$0xff]  ;;  %v7077_v10 = vld [vmem:[#allocation2 + $0x15a] sm:$0xff] }
 0x338   : > { %12233 = vmatprep.subr.bf16.mxu1 %v14801_v48 }
 0x339   : > { %10584 = vmatmul.mubr.f32.gmra.mrb[18].mxu0 %v5299_v56 }
 0x33a   : > { %11032 = vmatmul.mubr.f32.gmra.mrb[18].mxu1 %v14654_v24  ;;  %10586 = vmatprep.mubr.f32.mxu0 %v5300_v9  ;;  %v5305_v24 = vld [vmem:[#allocation2 + $0x9a] sm:$0xff] }
 0x33b   : > { %11034 = vmatprep.mubr.f32.mxu1 %v14659_v32  ;;  %12235 = vmatpush3.bf16.msra.mxu1 %v14801_v48  ;;  %v5306_v32 = vld [vmem:[#allocation2 + $0xaa] sm:$0xff]  ;;  %v7083_v48 = vld [vmem:[#allocation2 + $0x1a2] sm:$0xff] }
 0x33c   : > { %12237 = vmatprep.subr.bf16.mxu1 %v14808_v20 }
 0x33d   : > { %10587 = vmatmul.mubr.f32.gmra.mrb[20].mxu0 %v5301_v52 }
 0x33e   : > { %11035 = vmatmul.mubr.f32.gmra.mrb[20].mxu1 %v14668_v31  ;;  %10589 = vmatprep.mubr.f32.mxu0 %v5302_v55  ;;  %v5307_v31 = vld [vmem:[#allocation2 + $0xb2] sm:$0xff] }
 0x33f   : > { %11037 = vmatprep.mubr.f32.mxu1 %v14673_v8  ;;  %12239 = vmatpush3.bf16.msra.mxu1 %v14808_v20  ;;  %v5308_v8 = vld [vmem:[#allocation2 + $0xc2] sm:$0xff] }
 0x340   : > { %12241 = vmatprep.subr.bf16.mxu1 %v14816_v40 }
 0x341   : > { %10590 = vmatmul.mubr.f32.gmra.mrb[22].mxu0 %v5303_v47 }
 0x342   : > { %11038 = vmatmul.mubr.f32.gmra.mrb[22].mxu1 %v14682_v35  ;;  %10592 = vmatprep.mubr.f32.mxu0 %v5304_v41  ;;  %v5309_v35 = vld [vmem:[#allocation2 + $0xca] sm:$0xff] }
 0x343   : > { %11040 = vmatprep.mubr.f32.mxu1 %v14687_v38  ;;  %12243 = vmatpush3.bf16.msra.mxu1 %v14816_v40  ;;  %v6889_v38 = vld [vmem:[#allocation2 + $0x199] sm:$0xff] }
 0x344   : > { %12245 = vmatprep.subr.bf16.mxu1 %v14824_v27 }
 0x345   : > { %10593 = vmatmul.mubr.f32.gmra.mrb[24].mxu0 %v5305_v24 }
 0x346   : > { %11041 = vmatmul.mubr.f32.gmra.mrb[24].mxu1 %v14696_v58  ;;  %10595 = vmatprep.mubr.f32.mxu0 %v5306_v32  ;;  %v5310_v58 = vld [vmem:[#allocation2 + $0xda] sm:$0xff] }
 0x347   : > { %11043 = vmatprep.mubr.f32.mxu1 %v14701_v12  ;;  %12247 = vmatpush3.bf16.msra.mxu1 %v14824_v27  ;;  %v6890_v12 = vld [vmem:[#allocation2 + $0x1a1] sm:$0xff] }
 0x348   : > { %12249 = vmatprep.subr.bf16.mxu1 %v14832_v16 }
 0x349   : > { %10596 = vmatmul.mubr.f32.gmra.mrb[26].mxu0 %v5307_v31 }
 0x34a   : > { %11044 = vmatmul.mubr.f32.gmra.mrb[26].mxu1 %v14710_v25  ;;  %10598 = vmatprep.mubr.f32.mxu0 %v5308_v8  ;;  %v7068_v25 = vld [vmem:[#allocation2 + $0xf2] sm:$0xff] }
 0x34b   : > { %11046 = vmatprep.mubr.f32.mxu1 %v14715_v54  ;;  %12251 = vmatpush3.bf16.msra.mxu1 %v14832_v16  ;;  %v7069_v54 = vld [vmem:[#allocation2 + $0xfa] sm:$0xff] }
 0x34c   : > { %12253 = vmatprep.subr.bf16.mxu1 %v14840_v34 }
 0x34d   : > { %10599 = vmatmul.mubr.f32.gmra.mrb[28].mxu0 %v5309_v35 }
 0x34e   : > { %11047 = vmatmul.mubr.f32.gmra.mrb[28].mxu1 %v14724_v39  ;;  %10601 = vmatprep.mubr.f32.mxu0 %v5310_v58  ;;  %v7072_v39 = vld [vmem:[#allocation2 + $0x122] sm:$0xff] }
 0x34f   : > { %12255 = vmatpush3.bf16.msra.mxu1 %v14840_v34  ;;  %11049 = vmatprep.mubr.f32.mxu1 %v6889_v38 }
 0x350   : > { %12257 = vmatprep.subr.bf16.mxu1 %v14849_v44 }
 0x351   : > { %10602 = vmatmul.mubr.f32.gmra.mrb[30].mxu0 %v5311_v14 }
 0x352   : > { %11050 = vmatmul.mubr.f32.gmra.mrb[30].mxu1 %v6890_v12 }
 0x353   : > { %12259 = vmatpush3.bf16.msra.mxu1 %v14849_v44  ;;  %11084 = vmatprep.mubr.f32.mxu1 %v7068_v25 }
 0x356   : > { %11085 = vmatmul.mubr.f32.vlgmr.msra.gmra.mrb[16].mxu1 %v7069_v54 }
 0x357   : > { %11087 = vmatprep.mubr.f32.mxu1 %v7070_v51 }
 0x35a   : > { %11088 = vmatmul.mubr.f32.gmra.mrb[18].mxu1 %v7071_v7 }
 0x35b   : > { %11090 = vmatprep.mubr.f32.mxu1 %v7072_v39 }
 0x35e   : > { %11091 = vmatmul.mubr.f32.gmra.mrb[20].mxu1 %v7073_v11 }
 0x35f   : > { %11093 = vmatprep.mubr.f32.mxu1 %v7074_v18 }
 0x362   : > { %11094 = vmatmul.mubr.f32.gmra.mrb[22].mxu1 %v7075_v19 }
 0x363   : > { %11096 = vmatprep.mubr.f32.mxu1 %v7076_v26 }
 0x366   : > { %11097 = vmatmul.mubr.f32.gmra.mrb[24].mxu1 %v7077_v10 }
 0x367   : > { %11099 = vmatprep.mubr.f32.mxu1 %v7078_v23 }
 0x36a   : > { %11100 = vmatmul.mubr.f32.gmra.mrb[26].mxu1 %v7079_v63 }
 0x36b   : > { %11102 = vmatprep.mubr.f32.mxu1 %v14784_v0 }
 0x36e   : > { %11103 = vmatmul.mubr.f32.gmra.mrb[28].mxu1 %v14792_v28 }
 0x36f   : > { %11105 = vmatprep.mubr.f32.mxu1 %v7082_v59 }
 0x372   : > { %11106 = vmatmul.mubr.f32.gmra.mrb[30].mxu1 %v7083_v48 }
 0x408   : > { %v10582_v29 = vpop.f32.mrb[16].mxu0 }
 0x409   : > { %vm5491_vm0 = vcmp.ge.f32.partialorder %v10582_v29, 0.0  ;;  %v5507_v13 = vmul.f32 0.1, %v10582_v29  ;;  %v5395_v30 = vpop.f32.mrb[17].mxu0 }
 0x40a   : > { %vm5490_vm1 = vcmp.ge.f32.partialorder %v5395_v30, 0.0  ;;  %v5506_v50 = vmul.f32 0.1, %v5395_v30 }
 0x40b   : > { %v5523_v20 = vsel %vm5491_vm0, %v10582_v29, %v5507_v13 }
 0x40c   : > { %5539 = vst [vmem:[%s14897_s28 + $0x8] sm:$0xff] %v5523_v20  ;;  %v5522_v0 = vsel %vm5490_vm1, %v5395_v30, %v5506_v50  ;;  %v10585_v28 = vpop.f32.mrb[18].mxu0 }
 0x40d   : > { %5538 = vst [vmem:[%s14897_s28] sm:$0xff] %v5522_v0  ;;  %vm5493_vm2 = vcmp.ge.f32.partialorder %v10585_v28, 0.0  ;;  %v5509_v6 = vmul.f32 0.1, %v10585_v28  ;;  %v5405_v22 = vpop.f32.mrb[19].mxu0 }
 0x40e   : > { %vm5492_vm3 = vcmp.ge.f32.partialorder %v5405_v22, 0.0  ;;  %v5508_v17 = vmul.f32 0.1, %v5405_v22 }
 0x40f   : > { %v5525_v36 = vsel %vm5493_vm2, %v10585_v28, %v5509_v6 }
 0x410   : > { %5541 = vst [vmem:[%s14897_s28 + $0x18] sm:$0xff] %v5525_v36  ;;  %v5524_v40 = vsel %vm5492_vm3, %v5405_v22, %v5508_v17  ;;  %v10588_v15 = vpop.f32.mrb[20].mxu0 }
 0x411   : > { %5540 = vst [vmem:[%s14897_s28 + $0x10] sm:$0xff] %v5524_v40  ;;  %vm5495_vm4 = vcmp.ge.f32.partialorder %v10588_v15, 0.0  ;;  %v5511_v57 = vmul.f32 0.1, %v10588_v15  ;;  %v5415_v42 = vpop.f32.mrb[21].mxu0 }
 0x412   : > { %vm5494_vm5 = vcmp.ge.f32.partialorder %v5415_v42, 0.0  ;;  %v5510_v46 = vmul.f32 0.1, %v5415_v42 }
 0x413   : > { %v5527_v27 = vsel %vm5495_vm4, %v10588_v15, %v5511_v57 }
 0x414   : > { %5543 = vst [vmem:[%s14897_s28 + $0x28] sm:$0xff] %v5527_v27  ;;  %v5526_v2 = vsel %vm5494_vm5, %v5415_v42, %v5510_v46  ;;  %v10591_v33 = vpop.f32.mrb[22].mxu0 }
 0x415   : > { %5542 = vst [vmem:[%s14897_s28 + $0x20] sm:$0xff] %v5526_v2  ;;  %vm5497_vm6 = vcmp.ge.f32.partialorder %v10591_v33, 0.0  ;;  %v5513_v61 = vmul.f32 0.1, %v10591_v33  ;;  %v5425_v43 = vpop.f32.mrb[23].mxu0 }
 0x416   : > { %vm5496_vm7 = vcmp.ge.f32.partialorder %v5425_v43, 0.0  ;;  %v5512_v16 = vmul.f32 0.1, %v5425_v43 }
 0x417   : > { %v5529_v53 = vsel %vm5497_vm6, %v10591_v33, %v5513_v61 }
 0x418   : > { %5545 = vst [vmem:[%s14897_s28 + $0x38] sm:$0xff] %v5529_v53  ;;  %v5528_v1 = vsel %vm5496_vm7, %v5425_v43, %v5512_v16  ;;  %v10594_v37 = vpop.f32.mrb[24].mxu0 }
 0x419   : > { %5544 = vst [vmem:[%s14897_s28 + $0x30] sm:$0xff] %v5528_v1  ;;  %vm5499_vm8 = vcmp.ge.f32.partialorder %v10594_v37, 0.0  ;;  %v5515_v62 = vmul.f32 0.1, %v10594_v37  ;;  %v5435_v34 = vpop.f32.mrb[25].mxu0 }
 0x41a   : > { %vm5498_vm9 = vcmp.ge.f32.partialorder %v5435_v34, 0.0  ;;  %v5514_v45 = vmul.f32 0.1, %v5435_v34 }
 0x41b   : > { %v5531_v3 = vsel %vm5499_vm8, %v10594_v37, %v5515_v62 }
 0x41c   : > { %5547 = vst [vmem:[%s14897_s28 + $0x48] sm:$0xff] %v5531_v3  ;;  %v5530_v21 = vsel %vm5498_vm9, %v5435_v34, %v5514_v45  ;;  %v10597_v44 = vpop.f32.mrb[26].mxu0 }
 0x41d   : > { %5546 = vst [vmem:[%s14897_s28 + $0x40] sm:$0xff] %v5530_v21  ;;  %vm5501_vm10 = vcmp.ge.f32.partialorder %v10597_v44, 0.0  ;;  %v5517_v60 = vmul.f32 0.1, %v10597_v44  ;;  %v5445_v5 = vpop.f32.mrb[27].mxu0 }
 0x41e   : > { %vm5500_vm11 = vcmp.ge.f32.partialorder %v5445_v5, 0.0  ;;  %v5516_v4 = vmul.f32 0.1, %v5445_v5 }
 0x41f   : > { %v5533_v49 = vsel %vm5501_vm10, %v10597_v44, %v5517_v60 }
 0x420   : > { %5549 = vst [vmem:[%s14897_s28 + $0x58] sm:$0xff] %v5533_v49  ;;  %v5532_v56 = vsel %vm5500_vm11, %v5445_v5, %v5516_v4  ;;  %v10600_v9 = vpop.f32.mrb[28].mxu0 }
 0x421   : > { %5548 = vst [vmem:[%s14897_s28 + $0x50] sm:$0xff] %v5532_v56  ;;  %vm5503_vm12 = vcmp.ge.f32.partialorder %v10600_v9, 0.0  ;;  %v5519_v52 = vmul.f32 0.1, %v10600_v9  ;;  %v5455_v55 = vpop.f32.mrb[29].mxu0 }
 0x422   : > { %vm5502_vm13 = vcmp.ge.f32.partialorder %v5455_v55, 0.0  ;;  %v5518_v47 = vmul.f32 0.1, %v5455_v55 }
 0x423   : > { %v5535_v41 = vsel %vm5503_vm12, %v10600_v9, %v5519_v52 }
 0x424   : > { %5551 = vst [vmem:[%s14897_s28 + $0x68] sm:$0xff] %v5535_v41  ;;  %v5534_v24 = vsel %vm5502_vm13, %v5455_v55, %v5518_v47  ;;  %v10603_v32 = vpop.f32.mrb[30].mxu0 }
 0x425   : > { %5550 = vst [vmem:[%s14897_s28 + $0x60] sm:$0xff] %v5534_v24  ;;  %vm5505_vm14 = vcmp.ge.f32.partialorder %v10603_v32, 0.0  ;;  %v5521_v31 = vmul.f32 0.1, %v10603_v32  ;;  %v5465_v8 = vpop.f32.mrb[31].mxu0 }
 0x426   : > { %vm5504_vm15 = vcmp.ge.f32.partialorder %v5465_v8, 0.0  ;;  %v5520_v35 = vmul.f32 0.1, %v5465_v8 }
 0x427   : > { %v5537_v38 = vsel %vm5505_vm14, %v10603_v32, %v5521_v31 }
 0x428   : > { %5553 = vst [vmem:[%s14897_s28 + $0x78] sm:$0xff] %v5537_v38  ;;  %v5536_v58 = vsel %vm5504_vm15, %v5465_v8, %v5520_v35 }
 0x429   : > { %5552 = vst [vmem:[%s14897_s28 + $0x70] sm:$0xff] %v5536_v58  ;;  %v11086_v12 = vpop.f32.mrb[16].mxu1 }
 0x42a   : > { %vm7262_vm0 = vcmp.ge.f32.partialorder %v11086_v12, 0.0  ;;  %v7278_v14 = vmul.f32 0.1, %v11086_v12  ;;  %v7166_v25 = vpop.f32.mrb[17].mxu1 }
 0x42b   : > { %vm7261_vm1 = vcmp.ge.f32.partialorder %v7166_v25, 0.0  ;;  %v7277_v54 = vmul.f32 0.1, %v7166_v25 }
 0x42c   : > { %v7294_v51 = vsel %vm7262_vm0, %v11086_v12, %v7278_v14 }
 0x42d   : > { %7919 = vst [vmem:[%s14897_s28 + $0x88] sm:$0xff] %v7294_v51  ;;  %v7293_v7 = vsel %vm7261_vm1, %v7166_v25, %v7277_v54  ;;  %v11089_v39 = vpop.f32.mrb[18].mxu1 }
 0x42e   : > { %7918 = vst [vmem:[%s14897_s28 + $0x80] sm:$0xff] %v7293_v7  ;;  %vm7264_vm2 = vcmp.ge.f32.partialorder %v11089_v39, 0.0  ;;  %v7280_v11 = vmul.f32 0.1, %v11089_v39  ;;  %v7176_v18 = vpop.f32.mrb[19].mxu1 }
 0x42f   : > { %vm7263_vm3 = vcmp.ge.f32.partialorder %v7176_v18, 0.0  ;;  %v7279_v19 = vmul.f32 0.1, %v7176_v18 }
 0x430   : > { %v7296_v26 = vsel %vm7264_vm2, %v11089_v39, %v7280_v11 }
 0x431   : > { %7921 = vst [vmem:[%s14897_s28 + $0x98] sm:$0xff] %v7296_v26  ;;  %v7295_v10 = vsel %vm7263_vm3, %v7176_v18, %v7279_v19  ;;  %v11092_v23 = vpop.f32.mrb[20].mxu1 }
 0x432   : > { %7920 = vst [vmem:[%s14897_s28 + $0x90] sm:$0xff] %v7295_v10  ;;  %vm7266_vm4 = vcmp.ge.f32.partialorder %v11092_v23, 0.0  ;;  %v7282_v63 = vmul.f32 0.1, %v11092_v23  ;;  %v7186_v59 = vpop.f32.mrb[21].mxu1 }
 0x433   : > { %vm7265_vm5 = vcmp.ge.f32.partialorder %v7186_v59, 0.0  ;;  %v7281_v48 = vmul.f32 0.1, %v7186_v59 }
 0x434   : > { %v7298_v29 = vsel %vm7266_vm4, %v11092_v23, %v7282_v63 }
 0x435   : > { %7923 = vst [vmem:[%s14897_s28 + $0xa8] sm:$0xff] %v7298_v29  ;;  %v7297_v13 = vsel %vm7265_vm5, %v7186_v59, %v7281_v48  ;;  %v11095_v30 = vpop.f32.mrb[22].mxu1 }
 0x436   : > { %7922 = vst [vmem:[%s14897_s28 + $0xa0] sm:$0xff] %v7297_v13  ;;  %vm7268_vm6 = vcmp.ge.f32.partialorder %v11095_v30, 0.0  ;;  %v7284_v50 = vmul.f32 0.1, %v11095_v30  ;;  %v7196_v20 = vpop.f32.mrb[23].mxu1 }
 0x437   : > { %vm7267_vm7 = vcmp.ge.f32.partialorder %v7196_v20, 0.0  ;;  %v7283_v0 = vmul.f32 0.1, %v7196_v20 }
 0x438   : > { %v7300_v28 = vsel %vm7268_vm6, %v11095_v30, %v7284_v50 }
 0x439   : > { %7925 = vst [vmem:[%s14897_s28 + $0xb8] sm:$0xff] %v7300_v28  ;;  %v7299_v6 = vsel %vm7267_vm7, %v7196_v20, %v7283_v0  ;;  %v11098_v22 = vpop.f32.mrb[24].mxu1 }
 0x43a   : > { %7924 = vst [vmem:[%s14897_s28 + $0xb0] sm:$0xff] %v7299_v6  ;;  %vm7270_vm8 = vcmp.ge.f32.partialorder %v11098_v22, 0.0  ;;  %v7286_v17 = vmul.f32 0.1, %v11098_v22  ;;  %v7206_v36 = vpop.f32.mrb[25].mxu1 }
 0x43b   : > { %vm7269_vm9 = vcmp.ge.f32.partialorder %v7206_v36, 0.0  ;;  %v7285_v40 = vmul.f32 0.1, %v7206_v36 }
 0x43c   : > { %v7302_v15 = vsel %vm7270_vm8, %v11098_v22, %v7286_v17 }
 0x43d   : > { %7927 = vst [vmem:[%s14897_s28 + $0xc8] sm:$0xff] %v7302_v15  ;;  %v7301_v57 = vsel %vm7269_vm9, %v7206_v36, %v7285_v40  ;;  %v11101_v42 = vpop.f32.mrb[26].mxu1 }
 0x43e   : > { %7926 = vst [vmem:[%s14897_s28 + $0xc0] sm:$0xff] %v7301_v57  ;;  %vm7272_vm10 = vcmp.ge.f32.partialorder %v11101_v42, 0.0  ;;  %v7288_v46 = vmul.f32 0.1, %v11101_v42  ;;  %v7216_v27 = vpop.f32.mrb[27].mxu1 }
 0x43f   : > { %vm7271_vm11 = vcmp.ge.f32.partialorder %v7216_v27, 0.0  ;;  %v7287_v2 = vmul.f32 0.1, %v7216_v27 }
 0x440   : > { %v7304_v33 = vsel %vm7272_vm10, %v11101_v42, %v7288_v46 }
 0x441   : > { %7929 = vst [vmem:[%s14897_s28 + $0xd8] sm:$0xff] %v7304_v33  ;;  %v7303_v61 = vsel %vm7271_vm11, %v7216_v27, %v7287_v2  ;;  %v11104_v43 = vpop.f32.mrb[28].mxu1 }
 0x442   : > { %7928 = vst [vmem:[%s14897_s28 + $0xd0] sm:$0xff] %v7303_v61  ;;  %vm7274_vm12 = vcmp.ge.f32.partialorder %v11104_v43, 0.0  ;;  %v7290_v16 = vmul.f32 0.1, %v11104_v43  ;;  %v7226_v53 = vpop.f32.mrb[29].mxu1 }
 0x443   : > { %vm7273_vm13 = vcmp.ge.f32.partialorder %v7226_v53, 0.0  ;;  %v7289_v1 = vmul.f32 0.1, %v7226_v53 }
 0x444   : > { %v7306_v37 = vsel %vm7274_vm12, %v11104_v43, %v7290_v16 }
 0x445   : > { %7931 = vst [vmem:[%s14897_s28 + $0xe8] sm:$0xff] %v7306_v37  ;;  %v7305_v62 = vsel %vm7273_vm13, %v7226_v53, %v7289_v1  ;;  %v11107_v34 = vpop.f32.mrb[30].mxu1 }
 0x446   : > { %7930 = vst [vmem:[%s14897_s28 + $0xe0] sm:$0xff] %v7305_v62  ;;  %vm7276_vm14 = vcmp.ge.f32.partialorder %v11107_v34, 0.0  ;;  %v7292_v45 = vmul.f32 0.1, %v11107_v34  ;;  %v7236_v3 = vpop.f32.mrb[31].mxu1 }
 0x447   : > { %vm7275_vm15 = vcmp.ge.f32.partialorder %v7236_v3, 0.0  ;;  %v7291_v21 = vmul.f32 0.1, %v7236_v3 }
 0x448   : > { %v7308_v44 = vsel %vm7276_vm14, %v11107_v34, %v7292_v45 }
 0x449   : > { %7933 = vst [vmem:[%s14897_s28 + $0xf8] sm:$0xff] %v7308_v44  ;;  %v7307_v60 = vsel %vm7275_vm15, %v7236_v3, %v7291_v21 }
 0x44a   : > { %7932 = vst [vmem:[%s14897_s28 + $0xf0] sm:$0xff] %v7307_v60 }
 0x44b   : > { %12870 = shalt.err (!%p12867_p7)
}
 0x44c   : > { %s12871_s9 = scalar_lea.hbm %s14934_s4, 4096  ;;  %s12875_s19 = scalar_lea.hbm %s14986_s3, 8192 }
 0x44d   : > { %p12872_p8 = scmp.ne.s32.totalorder %s14934_s4, %s12871_s9  ;;  %p12876_p1 = scmp.lt.u32.totalorder %s14934_s4, %s14986_s3 }
 0x44e   : > { %p12877_p0 = scmp.lt.u32.totalorder %s12875_s19, %s12871_s9  ;;  %p12879_p6 = scmp.lt.u32.totalorder %s12871_s9, %s14934_s4 }
 0x44f   : > { %p12873_p11 = pnand %p12872_p8, %p15000_p9 }
 0x450   : > { %p12878_p5 = por %p12877_p0, %p12876_p1 }
 0x451   : > { %p12874_p13 = pneg %p12873_p11 }
 0x452   : > { %p12880_p10 = por %p12879_p6, %p12878_p5 }
 0x454   : > { %p12881_p12 = pnand %p12880_p10, %p12874_p13 }
 0x456   : > { %12884 = shalt.err (!%p12881_p12)
}
 0x457   : > { %s12930_s11 = smov 128   ;;  %s12931_s20 = smov 8  }
 0x458   : > { %12777 = dma.vmem_to_hbm [thread:$0]  (%p15000_p9), %s14936_s24, 4096, %s14934_s4, %s14942_s16, %s12930_s11, %s12930_s11, %s12931_s20  }
 0x459 PF: > { %p12789_p2 = scmp.ge.s32.totalorder %s12923_s15, 2  ;;  %s7355_s28 = sand.u32 1, %s12911_s12  }
 0x45a   : > { %p15001_p3 = scmp.ne.s32.totalorder %s14992_s23, 0  ;;  %s7356_s26 = scalar_lea.sflag [#allocation5], %s7355_s28 }
 0x45c   : > { %p12784_p4 = pnand %p12789_p2, %p15001_p3 }
 0x45e   : > { %12906 = dma.done.wait (!%p12784_p4), %s7356_s26, 4096  }
 0x45f   : > { %12908 = vsyncadd (!%p12784_p4), %s7356_s26, 4294963200  ;;  %p14_p7 = scmp.ge.s32.totalorder %s12977_s18, 4   ;;  %s15002_s12 = smov %s12915_s13 }
 0x460   : > { %s15003_s13 = smov %s12919_s14  ;;  %s15004_s14 = smov %s12988_s21 }
 0x461   : > { %s15005_s15 = smov %s12977_s18  ;;  %16 = sbr.rel (!%p14_p7) target bundleno = 4 (0x4), region = 100 }
 0x468   :  { %7361 = vsyncpa [#allocation4], 1 }
 0x469   :  { %7363 = vsyncpa [#allocation4 + $0x1], 1 }
 0x46a   :  { %7364 = vsyncpa [#allocation5], 1 }
 0x46b   :  { %7366 = vsyncpa [#allocation5 + $0x1], 1 }

</bundles_post_ra>
